<compile_context>
chip_gen: v7x
topology: tpu7x:2x2x1
jax: 0.10.0
libtpu: 0.0.40
codegen_flags: <defaults>
</compile_context>

<pallas_src>
import functools

import jax
import jax.numpy as jnp
from jax import lax
from jax.experimental import pallas as pl
from jax.experimental.pallas import tpu as pltpu  # noqa: F401  (TPU backend)


# ------------------------------ shared LSTM math ------------------------------
def _perm_gates(w, H):
    """Permute gate columns from PyTorch order (i,f,g,o) to (i,f,o,g)."""
    return jnp.concatenate(
        [w[..., :2 * H], w[..., 3 * H:4 * H], w[..., 2 * H:3 * H]], axis=-1)


def _lstm_update(gates, c_prev, H):
    """gates: (B, 4H) lane-dense in (i,f,o,g) order -> (h_new, c_new)."""
    sig = jax.nn.sigmoid(gates[:, :3 * H])        # i | f | o  (one contiguous EUP op)
    g = jnp.tanh(gates[:, 3 * H:])
    i = sig[:, :H]
    f = sig[:, H:2 * H]
    o = sig[:, 2 * H:3 * H]
    c_new = f * c_prev + i * g
    h_new = o * jnp.tanh(c_new)
    return h_new, c_new


# ------------------------------ fused kernel ----------------------------------
def _make_seq2seq_kernel(L, H, S, Bp, V_in, O, Opad, max_len):
    def kernel(*refs):
        pos = 0
        tok_ref = refs[pos]; pos += 1            # (S*Bp, 1) int32, time-major
        oh0_ref = refs[pos]; pos += 1            # (Bp, Opad) <sos> one-hot
        enc_x_w = refs[pos]; pos += 1            # (V_in, 4H) = enc_emb @ W_ih0
        enc_h0_w = refs[pos]; pos += 1           # (H, 4H)
        enc_b0 = refs[pos]; pos += 1             # (1, 4H)
        enc_deep = []
        for _ in range(1, L):
            enc_deep.append((refs[pos], refs[pos + 1], refs[pos + 2])); pos += 3
        dec_emb_w = refs[pos]; pos += 1          # (Opad, 4H) = dec_emb @ W_ih0[:E]
        dec_ctx_w = refs[pos]; pos += 1          # (H, 4H)    = W_ih0[E:]
        dec_h0_w = refs[pos]; pos += 1           # (H, 4H)
        dec_b0 = refs[pos]; pos += 1             # (1, 4H)
        dec_deep = []
        for _ in range(1, L):
            dec_deep.append((refs[pos], refs[pos + 1], refs[pos + 2])); pos += 3
        fc_h_w = refs[pos]; pos += 1             # (H, Opad)
        fc_c_w = refs[pos]; pos += 1             # (H, Opad)
        fc_b = refs[pos]; pos += 1               # (1, Opad)
        out_ref = refs[pos]                      # (max_len, Bp, Opad)

        f32 = jnp.float32

        # -------- encoder: layer-0 input projection for ALL timesteps at once --
        vocab = lax.broadcasted_iota(jnp.int32, (S * Bp, V_in), 1)
        onehot_x = (tok_ref[...] == vocab).astype(f32)                 # (S*Bp, V_in)
        xproj = jnp.dot(onehot_x, enc_x_w[...],
                        preferred_element_type=f32)                    # (S*Bp, 4H)

        h = [jnp.zeros((Bp, H), f32) for _ in range(L)]
        c = [jnp.zeros((Bp, H), f32) for _ in range(L)]
        for s in range(S):                                             # unrolled
            g0 = (xproj[s * Bp:(s + 1) * Bp, :]
                  + jnp.dot(h[0], enc_h0_w[...], preferred_element_type=f32)
                  + enc_b0[...])
            h[0], c[0] = _lstm_update(g0, c[0], H)
            layer_in = h[0]
            for l in range(1, L):
                wih, whh, b = enc_deep[l - 1]
                g = (jnp.dot(layer_in, wih[...], preferred_element_type=f32)
                     + jnp.dot(h[l], whh[...], preferred_element_type=f32)
                     + b[...])
                h[l], c[l] = _lstm_update(g, c[l], H)
                layer_in = h[l]

        # -------- attention collapses: encoder_outputs rows are all hidden[-1],
        #          softmax weights sum to 1 => context == encoder top hidden.
        ctx = h[L - 1]                                                 # (Bp, H)
        ctx_gate0 = (jnp.dot(ctx, dec_ctx_w[...], preferred_element_type=f32)
                     + dec_b0[...])                                    # (Bp, 4H)
        fc_bias = (jnp.dot(ctx, fc_c_w[...], preferred_element_type=f32)
                   + fc_b[...])                                        # (Bp, Opad)

        # -------- greedy decoder rollout (unrolled) ----------------------------
        out_ref[0] = jnp.zeros((Bp, Opad), f32)        # outputs[:, 0] stays zeros
        onehot = oh0_ref[...]                          # (Bp, Opad) current token 1-hot
        lanes = lax.broadcasted_iota(jnp.int32, (Bp, Opad), 1)
        valid = lanes < O
        for t in range(1, max_len):
            # layer 0: emb-gate via one-hot matmul + recurrent matmul + ctx bias
            g0 = (jnp.dot(onehot, dec_emb_w[...], preferred_element_type=f32)
                  + jnp.dot(h[0], dec_h0_w[...], preferred_element_type=f32)
                  + ctx_gate0)
            h[0], c[0] = _lstm_update(g0, c[0], H)
            layer_in = h[0]
            for l in range(1, L):
                wih, whh, b = dec_deep[l - 1]
                g = (jnp.dot(layer_in, wih[...], preferred_element_type=f32)
                     + jnp.dot(h[l], whh[...], preferred_element_type=f32)
                     + b[...])
                h[l], c[l] = _lstm_update(g, c[l], H)
                layer_in = h[l]

            pred = (jnp.dot(layer_in, fc_h_w[...], preferred_element_type=f32)
                    + fc_bias)                                         # (Bp, Opad)
            out_ref[t] = pred

            # greedy argmax over valid lanes -> one-hot for the next step
            masked = jnp.where(valid, pred, f32(-3.0e38))
            mmax = jnp.max(masked, axis=1, keepdims=True)
            is_max = jnp.logical_and(masked == mmax, valid)
            idx = jnp.min(jnp.where(is_max, lanes, Opad), axis=1, keepdims=True)
            onehot = (lanes == idx).astype(f32)

    return kernel


# ------------------------------ weight packing ---------------------------------
def pack_params(params):
    """One-time conversion of PyTorch-layout params into kernel-ready form."""
    E = params['enc_emb'].shape[1]
    H = params['enc_lstm'][0][1].shape[0]
    O = params['fc_w'].shape[1]
    Opad = ((O + 127) // 128) * 128

    packed = {}
    # --- encoder: fold embedding table into the layer-0 input-gate weights ---
    wih0, whh0, b0 = params['enc_lstm'][0]
    packed['enc_x_w'] = jnp.dot(params['enc_emb'], _perm_gates(wih0, H))
    packed['enc_h0_w'] = _perm_gates(whh0, H)
    packed['enc_b0'] = _perm_gates(b0, H)
    packed['enc_deep'] = [
        (_perm_gates(w, H), _perm_gates(u, H), _perm_gates(b, H))
        for (w, u, b) in params['enc_lstm'][1:]]

    # --- decoder: fold embedding into gate weights; split [emb | ctx] columns --
    wih0, whh0, b0 = params['dec_lstm'][0]                 # wih0: (E+H, 4H)
    emb_gate = jnp.dot(params['dec_emb'], _perm_gates(wih0[:E], H))   # (O, 4H)
    packed['dec_emb_w'] = jnp.zeros((Opad, 4 * H), jnp.float32).at[:O].set(emb_gate)
    packed['dec_ctx_w'] = _perm_gates(wih0[E:], H)
    packed['dec_h0_w'] = _perm_gates(whh0, H)
    packed['dec_b0'] = _perm_gates(b0, H)
    packed['dec_deep'] = [
        (_perm_gates(w, H), _perm_gates(u, H), _perm_gates(b, H))
        for (w, u, b) in params['dec_lstm'][1:]]

    # --- fc_out, lane-padded to a 128 multiple ---
    fcw = jnp.zeros((2 * H, Opad), jnp.float32).at[:, :O].set(params['fc_w'])
    packed['fc_h_w'] = fcw[:H]
    packed['fc_c_w'] = fcw[H:]
    packed['fc_b'] = jnp.zeros((1, Opad), jnp.float32).at[:, :O].set(params['fc_b'])
    # NOTE: attn_* params are not packed: with encoder_outputs == hidden[-1]
    # repeated, softmax weights sum to 1 and context == hidden[-1] regardless of
    # the attention parameters, so they cancel out of the forward pass exactly.
    return packed


# --------------------------------- forward -------------------------------------
@functools.partial(jax.jit, static_argnames=("max_len", "sos_token", "out_dim"))
def seq2seq_forward(packed, x, *, max_len, sos_token, out_dim):
    B, S = x.shape
    H = packed['enc_h0_w'].shape[0]
    L = 1 + len(packed['enc_deep'])
    V_in = packed['enc_x_w'].shape[0]
    Opad = packed['fc_b'].shape[1]
    Bp = ((max(B, 8) + 7) // 8) * 8                         # pad batch to 8 sublanes

    # time-major, batch-padded tokens flattened to (S*Bp, 1) for in-kernel one-hot
    tok = (jnp.zeros((S, Bp), jnp.int32)
           .at[:, :B].set(jnp.transpose(x).astype(jnp.int32))
           .reshape(S * Bp, 1))
    # <sos> one-hot (trace-time constant: sos_token is static)
    oh0 = jnp.zeros((Bp, Opad), jnp.float32).at[:, sos_token].set(1.0)

    inputs = [tok, oh0, packed['enc_x_w'], packed['enc_h0_w'], packed['enc_b0']]
    for wih, whh, b in packed['enc_deep']:
        inputs += [wih, whh, b]
    inputs += [packed['dec_emb_w'], packed['dec_ctx_w'],
               packed['dec_h0_w'], packed['dec_b0']]
    for wih, whh, b in packed['dec_deep']:
        inputs += [wih, whh, b]
    inputs += [packed['fc_h_w'], packed['fc_c_w'], packed['fc_b']]

    out = pl.pallas_call(
        _make_seq2seq_kernel(L, H, S, Bp, V_in, out_dim, Opad, max_len),
        out_shape=jax.ShapeDtypeStruct((max_len, Bp, Opad), jnp.float32),
    )(*inputs)                                              # (max_len, Bp, Opad)

    return jnp.transpose(out, (1, 0, 2))[:B, :, :out_dim]   # (B, max_len, O)


# ------------------------------ parameter init ----------------------------------
def _init_lstm_layer(key, in_dim, hidden_dim):
    k1, k2, k3 = jax.random.split(key, 3)
    s = 1.0 / float(hidden_dim) ** 0.5
    wih = jax.random.uniform(k1, (in_dim, 4 * hidden_dim), minval=-s, maxval=s)
    whh = jax.random.uniform(k2, (hidden_dim, 4 * hidden_dim), minval=-s, maxval=s)
    b = jax.random.uniform(k3, (1, 4 * hidden_dim), minval=-s, maxval=s)
    return (wih.astype(jnp.float32), whh.astype(jnp.float32), b.astype(jnp.float32))


def init_params(key, input_dim, output_dim, embed_dim, hidden_dim, num_layers):
    keys = iter(jax.random.split(key, 8 + 2 * num_layers))
    params = {}
    params['enc_emb'] = jax.random.normal(next(keys), (input_dim, embed_dim),
                                          jnp.float32)
    params['dec_emb'] = jax.random.normal(next(keys), (output_dim, embed_dim),
                                          jnp.float32)
    enc_lstm, dec_lstm = [], []
    for l in range(num_layers):
        in_e = embed_dim if l == 0 else hidden_dim
        enc_lstm.append(_init_lstm_layer(next(keys), in_e, hidden_dim))
        in_d = (embed_dim + hidden_dim) if l == 0 else hidden_dim
        dec_lstm.append(_init_lstm_layer(next(keys), in_d, hidden_dim))
    params['enc_lstm'] = enc_lstm
    params['dec_lstm'] = dec_lstm

    # Attention params (mathematically inert here: context == hidden[-1] because
    # every encoder_outputs row is identical); kept for parity with the module.
    sa = 1.0 / float(2 * hidden_dim) ** 0.5
    params['attn_wah'] = jax.random.uniform(next(keys), (hidden_dim, hidden_dim),
                                            minval=-sa, maxval=sa).astype(jnp.float32)
    params['attn_wae'] = jax.random.uniform(next(keys), (hidden_dim, hidden_dim),
                                            minval=-sa, maxval=sa).astype(jnp.float32)
    params['attn_b'] = jax.random.uniform(next(keys), (1, hidden_dim),
                                          minval=-sa, maxval=sa).astype(jnp.float32)
    sv = 1.0 / float(hidden_dim) ** 0.5
    params['attn_v'] = jax.random.uniform(next(keys), (1, hidden_dim),
                                          minval=-sv, maxval=sv).astype(jnp.float32)
    sf = 1.0 / float(2 * hidden_dim) ** 0.5
    params['fc_w'] = jax.random.uniform(next(keys), (2 * hidden_dim, output_dim),
                                        minval=-sf, maxval=sf).astype(jnp.float32)
    params['fc_b'] = jax.random.uniform(next(keys), (1, output_dim),
                                        minval=-sf, maxval=sf).astype(jnp.float32)
    return params


if __name__ == "__main__":
    INPUT_DIM, OUTPUT_DIM = 13, 11
    EMBED_DIM, HIDDEN_DIM, NUM_LAYERS = 16, 32, 2
    B, S, MAX_LEN, SOS = 2, 8, 6, 1

    key = jax.random.PRNGKey(0)
    pkey, xkey = jax.random.split(key)
    params = init_params(pkey, INPUT_DIM, OUTPUT_DIM, EMBED_DIM, HIDDEN_DIM,
                         NUM_LAYERS)
    packed = pack_params(params)
    x = jax.random.randint(xkey, (B, S), 0, INPUT_DIM, dtype=jnp.int32)

    out = seq2seq_forward(packed, x, max_len=MAX_LEN, sos_token=SOS,
                          out_dim=OUTPUT_DIM)
    out = jax.block_until_ready(out)
    assert out.shape == (B, MAX_LEN, OUTPUT_DIM), out.shape
    assert bool(jnp.all(jnp.isfinite(out)))
    print("KERNEL_OK")
</pallas_src>

<mosaic_0001>
module attributes {stable_mosaic.version = 11 : i64} {
  func.func @kernel(%arg0: memref<64x1xi32, #tpu.memory_space<vmem>>, %arg1: memref<8x128xf32, #tpu.memory_space<vmem>>, %arg2: memref<13x128xf32, #tpu.memory_space<vmem>>, %arg3: memref<32x128xf32, #tpu.memory_space<vmem>>, %arg4: memref<1x128xf32, #tpu.memory_space<vmem>>, %arg5: memref<32x128xf32, #tpu.memory_space<vmem>>, %arg6: memref<32x128xf32, #tpu.memory_space<vmem>>, %arg7: memref<1x128xf32, #tpu.memory_space<vmem>>, %arg8: memref<128x128xf32, #tpu.memory_space<vmem>>, %arg9: memref<32x128xf32, #tpu.memory_space<vmem>>, %arg10: memref<32x128xf32, #tpu.memory_space<vmem>>, %arg11: memref<1x128xf32, #tpu.memory_space<vmem>>, %arg12: memref<32x128xf32, #tpu.memory_space<vmem>>, %arg13: memref<32x128xf32, #tpu.memory_space<vmem>>, %arg14: memref<1x128xf32, #tpu.memory_space<vmem>>, %arg15: memref<32x128xf32, #tpu.memory_space<vmem>>, %arg16: memref<32x128xf32, #tpu.memory_space<vmem>>, %arg17: memref<1x128xf32, #tpu.memory_space<vmem>>, %arg18: memref<6x8x128xf32, #tpu.memory_space<vmem>>) attributes {dimension_semantics = [], scalar_prefetch = 0 : i64, scratch_operands = 0 : i64, tpu.core_type = #tpu.core_type<tc>} {
    %0 = tpu.iota {dimensions = array<i32: 1>} : vector<64x13xi32>
    %c0 = arith.constant 0 : index
    %c0_0 = arith.constant 0 : index
    %1 = vector.load %arg0[%c0, %c0_0] : memref<64x1xi32, #tpu.memory_space<vmem>>, vector<64x1xi32>
    %2 = vector.broadcast %1 : vector<64x1xi32> to vector<64x13xi32>
    %3 = arith.cmpi eq, %2, %0 : vector<64x13xi32>
    %4 = arith.extui %3 : vector<64x13xi1> to vector<64x13xi32>
    %5 = arith.sitofp %4 : vector<64x13xi32> to vector<64x13xf32>
    %c0_1 = arith.constant 0 : index
    %c0_2 = arith.constant 0 : index
    %6 = vector.load %arg2[%c0_1, %c0_2] : memref<13x128xf32, #tpu.memory_space<vmem>>, vector<13x128xf32>
    %cst = arith.constant dense<0.000000e+00> : vector<64x128xf32>
    %7 = tpu.matmul %5, %6, %cst {dimension_numbers = #tpu.dot_dimension_numbers<[1], [0], [0], [1], [0, 0, 1, 1], [], []>} : vector<64x13xf32>, vector<13x128xf32>, vector<64x128xf32> -> vector<64x128xf32>
    %cst_3 = arith.constant 0.000000e+00 : f32
    %8 = vector.broadcast %cst_3 : f32 to vector<8x32xf32>
    %cst_4 = arith.constant 0.000000e+00 : f32
    %9 = vector.broadcast %cst_4 : f32 to vector<8x32xf32>
    %cst_5 = arith.constant 0.000000e+00 : f32
    %10 = vector.broadcast %cst_5 : f32 to vector<8x32xf32>
    %cst_6 = arith.constant 0.000000e+00 : f32
    %11 = vector.broadcast %cst_6 : f32 to vector<8x32xf32>
    %12 = vector.extract_strided_slice %7 {offsets = [0, 0], sizes = [8, 128], strides = [1, 1]} : vector<64x128xf32> to vector<8x128xf32>
    %c0_7 = arith.constant 0 : index
    %c0_8 = arith.constant 0 : index
    %13 = vector.load %arg3[%c0_7, %c0_8] : memref<32x128xf32, #tpu.memory_space<vmem>>, vector<32x128xf32>
    %cst_9 = arith.constant dense<0.000000e+00> : vector<8x128xf32>
    %14 = tpu.matmul %8, %13, %cst_9 {dimension_numbers = #tpu.dot_dimension_numbers<[1], [0], [0], [1], [0, 0, 1, 1], [], []>} : vector<8x32xf32>, vector<32x128xf32>, vector<8x128xf32> -> vector<8x128xf32>
    %15 = arith.addf %12, %14 : vector<8x128xf32>
    %c0_10 = arith.constant 0 : index
    %c0_11 = arith.constant 0 : index
    %16 = vector.load %arg4[%c0_10, %c0_11] : memref<1x128xf32, #tpu.memory_space<vmem>>, vector<1x128xf32>
    %17 = vector.broadcast %16 : vector<1x128xf32> to vector<8x128xf32>
    %18 = arith.addf %15, %17 : vector<8x128xf32>
    %19 = vector.extract_strided_slice %18 {offsets = [0, 0], sizes = [8, 96], strides = [1, 1]} : vector<8x128xf32> to vector<8x96xf32>
    %20 = arith.negf %19 : vector<8x96xf32>
    %21 = math.exp %20 : vector<8x96xf32>
    %cst_12 = arith.constant 1.000000e+00 : f32
    %22 = vector.broadcast %cst_12 : f32 to vector<8x96xf32>
    %23 = arith.addf %22, %21 : vector<8x96xf32>
    %24 = arith.divf %22, %23 : vector<8x96xf32>
    %25 = vector.extract_strided_slice %18 {offsets = [0, 96], sizes = [8, 32], strides = [1, 1]} : vector<8x128xf32> to vector<8x32xf32>
    %26 = math.tanh %25 : vector<8x32xf32>
    %27 = vector.extract_strided_slice %24 {offsets = [0, 0], sizes = [8, 32], strides = [1, 1]} : vector<8x96xf32> to vector<8x32xf32>
    %28 = vector.extract_strided_slice %24 {offsets = [0, 32], sizes = [8, 32], strides = [1, 1]} : vector<8x96xf32> to vector<8x32xf32>
    %29 = vector.extract_strided_slice %24 {offsets = [0, 64], sizes = [8, 32], strides = [1, 1]} : vector<8x96xf32> to vector<8x32xf32>
    %30 = arith.mulf %28, %10 : vector<8x32xf32>
    %31 = arith.mulf %27, %26 : vector<8x32xf32>
    %32 = arith.addf %30, %31 : vector<8x32xf32>
    %33 = math.tanh %32 : vector<8x32xf32>
    %34 = arith.mulf %29, %33 : vector<8x32xf32>
    %c0_13 = arith.constant 0 : index
    %c0_14 = arith.constant 0 : index
    %35 = vector.load %arg5[%c0_13, %c0_14] : memref<32x128xf32, #tpu.memory_space<vmem>>, vector<32x128xf32>
    %cst_15 = arith.constant dense<0.000000e+00> : vector<8x128xf32>
    %36 = tpu.matmul %34, %35, %cst_15 {dimension_numbers = #tpu.dot_dimension_numbers<[1], [0], [0], [1], [0, 0, 1, 1], [], []>} : vector<8x32xf32>, vector<32x128xf32>, vector<8x128xf32> -> vector<8x128xf32>
    %c0_16 = arith.constant 0 : index
    %c0_17 = arith.constant 0 : index
    %37 = vector.load %arg6[%c0_16, %c0_17] : memref<32x128xf32, #tpu.memory_space<vmem>>, vector<32x128xf32>
    %cst_18 = arith.constant dense<0.000000e+00> : vector<8x128xf32>
    %38 = tpu.matmul %9, %37, %cst_18 {dimension_numbers = #tpu.dot_dimension_numbers<[1], [0], [0], [1], [0, 0, 1, 1], [], []>} : vector<8x32xf32>, vector<32x128xf32>, vector<8x128xf32> -> vector<8x128xf32>
    %39 = arith.addf %36, %38 : vector<8x128xf32>
    %c0_19 = arith.constant 0 : index
    %c0_20 = arith.constant 0 : index
    %40 = vector.load %arg7[%c0_19, %c0_20] : memref<1x128xf32, #tpu.memory_space<vmem>>, vector<1x128xf32>
    %41 = vector.broadcast %40 : vector<1x128xf32> to vector<8x128xf32>
    %42 = arith.addf %39, %41 : vector<8x128xf32>
    %43 = vector.extract_strided_slice %42 {offsets = [0, 0], sizes = [8, 96], strides = [1, 1]} : vector<8x128xf32> to vector<8x96xf32>
    %44 = arith.negf %43 : vector<8x96xf32>
    %45 = math.exp %44 : vector<8x96xf32>
    %cst_21 = arith.constant 1.000000e+00 : f32
    %46 = vector.broadcast %cst_21 : f32 to vector<8x96xf32>
    %47 = arith.addf %46, %45 : vector<8x96xf32>
    %48 = arith.divf %46, %47 : vector<8x96xf32>
    %49 = vector.extract_strided_slice %42 {offsets = [0, 96], sizes = [8, 32], strides = [1, 1]} : vector<8x128xf32> to vector<8x32xf32>
    %50 = math.tanh %49 : vector<8x32xf32>
    %51 = vector.extract_strided_slice %48 {offsets = [0, 0], sizes = [8, 32], strides = [1, 1]} : vector<8x96xf32> to vector<8x32xf32>
    %52 = vector.extract_strided_slice %48 {offsets = [0, 32], sizes = [8, 32], strides = [1, 1]} : vector<8x96xf32> to vector<8x32xf32>
    %53 = vector.extract_strided_slice %48 {offsets = [0, 64], sizes = [8, 32], strides = [1, 1]} : vector<8x96xf32> to vector<8x32xf32>
    %54 = arith.mulf %52, %11 : vector<8x32xf32>
    %55 = arith.mulf %51, %50 : vector<8x32xf32>
    %56 = arith.addf %54, %55 : vector<8x32xf32>
    %57 = math.tanh %56 : vector<8x32xf32>
    %58 = arith.mulf %53, %57 : vector<8x32xf32>
    %59 = vector.extract_strided_slice %7 {offsets = [8, 0], sizes = [8, 128], strides = [1, 1]} : vector<64x128xf32> to vector<8x128xf32>
    %c0_22 = arith.constant 0 : index
    %c0_23 = arith.constant 0 : index
    %60 = vector.load %arg3[%c0_22, %c0_23] : memref<32x128xf32, #tpu.memory_space<vmem>>, vector<32x128xf32>
    %cst_24 = arith.constant dense<0.000000e+00> : vector<8x128xf32>
    %61 = tpu.matmul %34, %60, %cst_24 {dimension_numbers = #tpu.dot_dimension_numbers<[1], [0], [0], [1], [0, 0, 1, 1], [], []>} : vector<8x32xf32>, vector<32x128xf32>, vector<8x128xf32> -> vector<8x128xf32>
    %62 = arith.addf %59, %61 : vector<8x128xf32>
    %c0_25 = arith.constant 0 : index
    %c0_26 = arith.constant 0 : index
    %63 = vector.load %arg4[%c0_25, %c0_26] : memref<1x128xf32, #tpu.memory_space<vmem>>, vector<1x128xf32>
    %64 = vector.broadcast %63 : vector<1x128xf32> to vector<8x128xf32>
    %65 = arith.addf %62, %64 : vector<8x128xf32>
    %66 = vector.extract_strided_slice %65 {offsets = [0, 0], sizes = [8, 96], strides = [1, 1]} : vector<8x128xf32> to vector<8x96xf32>
    %67 = arith.negf %66 : vector<8x96xf32>
    %68 = math.exp %67 : vector<8x96xf32>
    %cst_27 = arith.constant 1.000000e+00 : f32
    %69 = vector.broadcast %cst_27 : f32 to vector<8x96xf32>
    %70 = arith.addf %69, %68 : vector<8x96xf32>
    %71 = arith.divf %69, %70 : vector<8x96xf32>
    %72 = vector.extract_strided_slice %65 {offsets = [0, 96], sizes = [8, 32], strides = [1, 1]} : vector<8x128xf32> to vector<8x32xf32>
    %73 = math.tanh %72 : vector<8x32xf32>
    %74 = vector.extract_strided_slice %71 {offsets = [0, 0], sizes = [8, 32], strides = [1, 1]} : vector<8x96xf32> to vector<8x32xf32>
    %75 = vector.extract_strided_slice %71 {offsets = [0, 32], sizes = [8, 32], strides = [1, 1]} : vector<8x96xf32> to vector<8x32xf32>
    %76 = vector.extract_strided_slice %71 {offsets = [0, 64], sizes = [8, 32], strides = [1, 1]} : vector<8x96xf32> to vector<8x32xf32>
    %77 = arith.mulf %75, %32 : vector<8x32xf32>
    %78 = arith.mulf %74, %73 : vector<8x32xf32>
    %79 = arith.addf %77, %78 : vector<8x32xf32>
    %80 = math.tanh %79 : vector<8x32xf32>
    %81 = arith.mulf %76, %80 : vector<8x32xf32>
    %c0_28 = arith.constant 0 : index
    %c0_29 = arith.constant 0 : index
    %82 = vector.load %arg5[%c0_28, %c0_29] : memref<32x128xf32, #tpu.memory_space<vmem>>, vector<32x128xf32>
    %cst_30 = arith.constant dense<0.000000e+00> : vector<8x128xf32>
    %83 = tpu.matmul %81, %82, %cst_30 {dimension_numbers = #tpu.dot_dimension_numbers<[1], [0], [0], [1], [0, 0, 1, 1], [], []>} : vector<8x32xf32>, vector<32x128xf32>, vector<8x128xf32> -> vector<8x128xf32>
    %c0_31 = arith.constant 0 : index
    %c0_32 = arith.constant 0 : index
    %84 = vector.load %arg6[%c0_31, %c0_32] : memref<32x128xf32, #tpu.memory_space<vmem>>, vector<32x128xf32>
    %cst_33 = arith.constant dense<0.000000e+00> : vector<8x128xf32>
    %85 = tpu.matmul %58, %84, %cst_33 {dimension_numbers = #tpu.dot_dimension_numbers<[1], [0], [0], [1], [0, 0, 1, 1], [], []>} : vector<8x32xf32>, vector<32x128xf32>, vector<8x128xf32> -> vector<8x128xf32>
    %86 = arith.addf %83, %85 : vector<8x128xf32>
    %c0_34 = arith.constant 0 : index
    %c0_35 = arith.constant 0 : index
    %87 = vector.load %arg7[%c0_34, %c0_35] : memref<1x128xf32, #tpu.memory_space<vmem>>, vector<1x128xf32>
    %88 = vector.broadcast %87 : vector<1x128xf32> to vector<8x128xf32>
    %89 = arith.addf %86, %88 : vector<8x128xf32>
    %90 = vector.extract_strided_slice %89 {offsets = [0, 0], sizes = [8, 96], strides = [1, 1]} : vector<8x128xf32> to vector<8x96xf32>
    %91 = arith.negf %90 : vector<8x96xf32>
    %92 = math.exp %91 : vector<8x96xf32>
    %cst_36 = arith.constant 1.000000e+00 : f32
    %93 = vector.broadcast %cst_36 : f32 to vector<8x96xf32>
    %94 = arith.addf %93, %92 : vector<8x96xf32>
    %95 = arith.divf %93, %94 : vector<8x96xf32>
    %96 = vector.extract_strided_slice %89 {offsets = [0, 96], sizes = [8, 32], strides = [1, 1]} : vector<8x128xf32> to vector<8x32xf32>
    %97 = math.tanh %96 : vector<8x32xf32>
    %98 = vector.extract_strided_slice %95 {offsets = [0, 0], sizes = [8, 32], strides = [1, 1]} : vector<8x96xf32> to vector<8x32xf32>
    %99 = vector.extract_strided_slice %95 {offsets = [0, 32], sizes = [8, 32], strides = [1, 1]} : vector<8x96xf32> to vector<8x32xf32>
    %100 = vector.extract_strided_slice %95 {offsets = [0, 64], sizes = [8, 32], strides = [1, 1]} : vector<8x96xf32> to vector<8x32xf32>
    %101 = arith.mulf %99, %56 : vector<8x32xf32>
    %102 = arith.mulf %98, %97 : vector<8x32xf32>
    %103 = arith.addf %101, %102 : vector<8x32xf32>
    %104 = math.tanh %103 : vector<8x32xf32>
    %105 = arith.mulf %100, %104 : vector<8x32xf32>
    %106 = vector.extract_strided_slice %7 {offsets = [16, 0], sizes = [8, 128], strides = [1, 1]} : vector<64x128xf32> to vector<8x128xf32>
    %c0_37 = arith.constant 0 : index
    %c0_38 = arith.constant 0 : index
    %107 = vector.load %arg3[%c0_37, %c0_38] : memref<32x128xf32, #tpu.memory_space<vmem>>, vector<32x128xf32>
    %cst_39 = arith.constant dense<0.000000e+00> : vector<8x128xf32>
    %108 = tpu.matmul %81, %107, %cst_39 {dimension_numbers = #tpu.dot_dimension_numbers<[1], [0], [0], [1], [0, 0, 1, 1], [], []>} : vector<8x32xf32>, vector<32x128xf32>, vector<8x128xf32> -> vector<8x128xf32>
    %109 = arith.addf %106, %108 : vector<8x128xf32>
    %c0_40 = arith.constant 0 : index
    %c0_41 = arith.constant 0 : index
    %110 = vector.load %arg4[%c0_40, %c0_41] : memref<1x128xf32, #tpu.memory_space<vmem>>, vector<1x128xf32>
    %111 = vector.broadcast %110 : vector<1x128xf32> to vector<8x128xf32>
    %112 = arith.addf %109, %111 : vector<8x128xf32>
    %113 = vector.extract_strided_slice %112 {offsets = [0, 0], sizes = [8, 96], strides = [1, 1]} : vector<8x128xf32> to vector<8x96xf32>
    %114 = arith.negf %113 : vector<8x96xf32>
    %115 = math.exp %114 : vector<8x96xf32>
    %cst_42 = arith.constant 1.000000e+00 : f32
    %116 = vector.broadcast %cst_42 : f32 to vector<8x96xf32>
    %117 = arith.addf %116, %115 : vector<8x96xf32>
    %118 = arith.divf %116, %117 : vector<8x96xf32>
    %119 = vector.extract_strided_slice %112 {offsets = [0, 96], sizes = [8, 32], strides = [1, 1]} : vector<8x128xf32> to vector<8x32xf32>
    %120 = math.tanh %119 : vector<8x32xf32>
    %121 = vector.extract_strided_slice %118 {offsets = [0, 0], sizes = [8, 32], strides = [1, 1]} : vector<8x96xf32> to vector<8x32xf32>
    %122 = vector.extract_strided_slice %118 {offsets = [0, 32], sizes = [8, 32], strides = [1, 1]} : vector<8x96xf32> to vector<8x32xf32>
    %123 = vector.extract_strided_slice %118 {offsets = [0, 64], sizes = [8, 32], strides = [1, 1]} : vector<8x96xf32> to vector<8x32xf32>
    %124 = arith.mulf %122, %79 : vector<8x32xf32>
    %125 = arith.mulf %121, %120 : vector<8x32xf32>
    %126 = arith.addf %124, %125 : vector<8x32xf32>
    %127 = math.tanh %126 : vector<8x32xf32>
    %128 = arith.mulf %123, %127 : vector<8x32xf32>
    %c0_43 = arith.constant 0 : index
    %c0_44 = arith.constant 0 : index
    %129 = vector.load %arg5[%c0_43, %c0_44] : memref<32x128xf32, #tpu.memory_space<vmem>>, vector<32x128xf32>
    %cst_45 = arith.constant dense<0.000000e+00> : vector<8x128xf32>
    %130 = tpu.matmul %128, %129, %cst_45 {dimension_numbers = #tpu.dot_dimension_numbers<[1], [0], [0], [1], [0, 0, 1, 1], [], []>} : vector<8x32xf32>, vector<32x128xf32>, vector<8x128xf32> -> vector<8x128xf32>
    %c0_46 = arith.constant 0 : index
    %c0_47 = arith.constant 0 : index
    %131 = vector.load %arg6[%c0_46, %c0_47] : memref<32x128xf32, #tpu.memory_space<vmem>>, vector<32x128xf32>
    %cst_48 = arith.constant dense<0.000000e+00> : vector<8x128xf32>
    %132 = tpu.matmul %105, %131, %cst_48 {dimension_numbers = #tpu.dot_dimension_numbers<[1], [0], [0], [1], [0, 0, 1, 1], [], []>} : vector<8x32xf32>, vector<32x128xf32>, vector<8x128xf32> -> vector<8x128xf32>
    %133 = arith.addf %130, %132 : vector<8x128xf32>
    %c0_49 = arith.constant 0 : index
    %c0_50 = arith.constant 0 : index
    %134 = vector.load %arg7[%c0_49, %c0_50] : memref<1x128xf32, #tpu.memory_space<vmem>>, vector<1x128xf32>
    %135 = vector.broadcast %134 : vector<1x128xf32> to vector<8x128xf32>
    %136 = arith.addf %133, %135 : vector<8x128xf32>
    %137 = vector.extract_strided_slice %136 {offsets = [0, 0], sizes = [8, 96], strides = [1, 1]} : vector<8x128xf32> to vector<8x96xf32>
    %138 = arith.negf %137 : vector<8x96xf32>
    %139 = math.exp %138 : vector<8x96xf32>
    %cst_51 = arith.constant 1.000000e+00 : f32
    %140 = vector.broadcast %cst_51 : f32 to vector<8x96xf32>
    %141 = arith.addf %140, %139 : vector<8x96xf32>
    %142 = arith.divf %140, %141 : vector<8x96xf32>
    %143 = vector.extract_strided_slice %136 {offsets = [0, 96], sizes = [8, 32], strides = [1, 1]} : vector<8x128xf32> to vector<8x32xf32>
    %144 = math.tanh %143 : vector<8x32xf32>
    %145 = vector.extract_strided_slice %142 {offsets = [0, 0], sizes = [8, 32], strides = [1, 1]} : vector<8x96xf32> to vector<8x32xf32>
    %146 = vector.extract_strided_slice %142 {offsets = [0, 32], sizes = [8, 32], strides = [1, 1]} : vector<8x96xf32> to vector<8x32xf32>
    %147 = vector.extract_strided_slice %142 {offsets = [0, 64], sizes = [8, 32], strides = [1, 1]} : vector<8x96xf32> to vector<8x32xf32>
    %148 = arith.mulf %146, %103 : vector<8x32xf32>
    %149 = arith.mulf %145, %144 : vector<8x32xf32>
    %150 = arith.addf %148, %149 : vector<8x32xf32>
    %151 = math.tanh %150 : vector<8x32xf32>
    %152 = arith.mulf %147, %151 : vector<8x32xf32>
    %153 = vector.extract_strided_slice %7 {offsets = [24, 0], sizes = [8, 128], strides = [1, 1]} : vector<64x128xf32> to vector<8x128xf32>
    %c0_52 = arith.constant 0 : index
    %c0_53 = arith.constant 0 : index
    %154 = vector.load %arg3[%c0_52, %c0_53] : memref<32x128xf32, #tpu.memory_space<vmem>>, vector<32x128xf32>
    %cst_54 = arith.constant dense<0.000000e+00> : vector<8x128xf32>
    %155 = tpu.matmul %128, %154, %cst_54 {dimension_numbers = #tpu.dot_dimension_numbers<[1], [0], [0], [1], [0, 0, 1, 1], [], []>} : vector<8x32xf32>, vector<32x128xf32>, vector<8x128xf32> -> vector<8x128xf32>
    %156 = arith.addf %153, %155 : vector<8x128xf32>
    %c0_55 = arith.constant 0 : index
    %c0_56 = arith.constant 0 : index
    %157 = vector.load %arg4[%c0_55, %c0_56] : memref<1x128xf32, #tpu.memory_space<vmem>>, vector<1x128xf32>
    %158 = vector.broadcast %157 : vector<1x128xf32> to vector<8x128xf32>
    %159 = arith.addf %156, %158 : vector<8x128xf32>
    %160 = vector.extract_strided_slice %159 {offsets = [0, 0], sizes = [8, 96], strides = [1, 1]} : vector<8x128xf32> to vector<8x96xf32>
    %161 = arith.negf %160 : vector<8x96xf32>
    %162 = math.exp %161 : vector<8x96xf32>
    %cst_57 = arith.constant 1.000000e+00 : f32
    %163 = vector.broadcast %cst_57 : f32 to vector<8x96xf32>
    %164 = arith.addf %163, %162 : vector<8x96xf32>
    %165 = arith.divf %163, %164 : vector<8x96xf32>
    %166 = vector.extract_strided_slice %159 {offsets = [0, 96], sizes = [8, 32], strides = [1, 1]} : vector<8x128xf32> to vector<8x32xf32>
    %167 = math.tanh %166 : vector<8x32xf32>
    %168 = vector.extract_strided_slice %165 {offsets = [0, 0], sizes = [8, 32], strides = [1, 1]} : vector<8x96xf32> to vector<8x32xf32>
    %169 = vector.extract_strided_slice %165 {offsets = [0, 32], sizes = [8, 32], strides = [1, 1]} : vector<8x96xf32> to vector<8x32xf32>
    %170 = vector.extract_strided_slice %165 {offsets = [0, 64], sizes = [8, 32], strides = [1, 1]} : vector<8x96xf32> to vector<8x32xf32>
    %171 = arith.mulf %169, %126 : vector<8x32xf32>
    %172 = arith.mulf %168, %167 : vector<8x32xf32>
    %173 = arith.addf %171, %172 : vector<8x32xf32>
    %174 = math.tanh %173 : vector<8x32xf32>
    %175 = arith.mulf %170, %174 : vector<8x32xf32>
    %c0_58 = arith.constant 0 : index
    %c0_59 = arith.constant 0 : index
    %176 = vector.load %arg5[%c0_58, %c0_59] : memref<32x128xf32, #tpu.memory_space<vmem>>, vector<32x128xf32>
    %cst_60 = arith.constant dense<0.000000e+00> : vector<8x128xf32>
    %177 = tpu.matmul %175, %176, %cst_60 {dimension_numbers = #tpu.dot_dimension_numbers<[1], [0], [0], [1], [0, 0, 1, 1], [], []>} : vector<8x32xf32>, vector<32x128xf32>, vector<8x128xf32> -> vector<8x128xf32>
    %c0_61 = arith.constant 0 : index
    %c0_62 = arith.constant 0 : index
    %178 = vector.load %arg6[%c0_61, %c0_62] : memref<32x128xf32, #tpu.memory_space<vmem>>, vector<32x128xf32>
    %cst_63 = arith.constant dense<0.000000e+00> : vector<8x128xf32>
    %179 = tpu.matmul %152, %178, %cst_63 {dimension_numbers = #tpu.dot_dimension_numbers<[1], [0], [0], [1], [0, 0, 1, 1], [], []>} : vector<8x32xf32>, vector<32x128xf32>, vector<8x128xf32> -> vector<8x128xf32>
    %180 = arith.addf %177, %179 : vector<8x128xf32>
    %c0_64 = arith.constant 0 : index
    %c0_65 = arith.constant 0 : index
    %181 = vector.load %arg7[%c0_64, %c0_65] : memref<1x128xf32, #tpu.memory_space<vmem>>, vector<1x128xf32>
    %182 = vector.broadcast %181 : vector<1x128xf32> to vector<8x128xf32>
    %183 = arith.addf %180, %182 : vector<8x128xf32>
    %184 = vector.extract_strided_slice %183 {offsets = [0, 0], sizes = [8, 96], strides = [1, 1]} : vector<8x128xf32> to vector<8x96xf32>
    %185 = arith.negf %184 : vector<8x96xf32>
    %186 = math.exp %185 : vector<8x96xf32>
    %cst_66 = arith.constant 1.000000e+00 : f32
    %187 = vector.broadcast %cst_66 : f32 to vector<8x96xf32>
    %188 = arith.addf %187, %186 : vector<8x96xf32>
    %189 = arith.divf %187, %188 : vector<8x96xf32>
    %190 = vector.extract_strided_slice %183 {offsets = [0, 96], sizes = [8, 32], strides = [1, 1]} : vector<8x128xf32> to vector<8x32xf32>
    %191 = math.tanh %190 : vector<8x32xf32>
    %192 = vector.extract_strided_slice %189 {offsets = [0, 0], sizes = [8, 32], strides = [1, 1]} : vector<8x96xf32> to vector<8x32xf32>
    %193 = vector.extract_strided_slice %189 {offsets = [0, 32], sizes = [8, 32], strides = [1, 1]} : vector<8x96xf32> to vector<8x32xf32>
    %194 = vector.extract_strided_slice %189 {offsets = [0, 64], sizes = [8, 32], strides = [1, 1]} : vector<8x96xf32> to vector<8x32xf32>
    %195 = arith.mulf %193, %150 : vector<8x32xf32>
    %196 = arith.mulf %192, %191 : vector<8x32xf32>
    %197 = arith.addf %195, %196 : vector<8x32xf32>
    %198 = math.tanh %197 : vector<8x32xf32>
    %199 = arith.mulf %194, %198 : vector<8x32xf32>
    %200 = vector.extract_strided_slice %7 {offsets = [32, 0], sizes = [8, 128], strides = [1, 1]} : vector<64x128xf32> to vector<8x128xf32>
    %c0_67 = arith.constant 0 : index
    %c0_68 = arith.constant 0 : index
    %201 = vector.load %arg3[%c0_67, %c0_68] : memref<32x128xf32, #tpu.memory_space<vmem>>, vector<32x128xf32>
    %cst_69 = arith.constant dense<0.000000e+00> : vector<8x128xf32>
    %202 = tpu.matmul %175, %201, %cst_69 {dimension_numbers = #tpu.dot_dimension_numbers<[1], [0], [0], [1], [0, 0, 1, 1], [], []>} : vector<8x32xf32>, vector<32x128xf32>, vector<8x128xf32> -> vector<8x128xf32>
    %203 = arith.addf %200, %202 : vector<8x128xf32>
    %c0_70 = arith.constant 0 : index
    %c0_71 = arith.constant 0 : index
    %204 = vector.load %arg4[%c0_70, %c0_71] : memref<1x128xf32, #tpu.memory_space<vmem>>, vector<1x128xf32>
    %205 = vector.broadcast %204 : vector<1x128xf32> to vector<8x128xf32>
    %206 = arith.addf %203, %205 : vector<8x128xf32>
    %207 = vector.extract_strided_slice %206 {offsets = [0, 0], sizes = [8, 96], strides = [1, 1]} : vector<8x128xf32> to vector<8x96xf32>
    %208 = arith.negf %207 : vector<8x96xf32>
    %209 = math.exp %208 : vector<8x96xf32>
    %cst_72 = arith.constant 1.000000e+00 : f32
    %210 = vector.broadcast %cst_72 : f32 to vector<8x96xf32>
    %211 = arith.addf %210, %209 : vector<8x96xf32>
    %212 = arith.divf %210, %211 : vector<8x96xf32>
    %213 = vector.extract_strided_slice %206 {offsets = [0, 96], sizes = [8, 32], strides = [1, 1]} : vector<8x128xf32> to vector<8x32xf32>
    %214 = math.tanh %213 : vector<8x32xf32>
    %215 = vector.extract_strided_slice %212 {offsets = [0, 0], sizes = [8, 32], strides = [1, 1]} : vector<8x96xf32> to vector<8x32xf32>
    %216 = vector.extract_strided_slice %212 {offsets = [0, 32], sizes = [8, 32], strides = [1, 1]} : vector<8x96xf32> to vector<8x32xf32>
    %217 = vector.extract_strided_slice %212 {offsets = [0, 64], sizes = [8, 32], strides = [1, 1]} : vector<8x96xf32> to vector<8x32xf32>
    %218 = arith.mulf %216, %173 : vector<8x32xf32>
    %219 = arith.mulf %215, %214 : vector<8x32xf32>
    %220 = arith.addf %218, %219 : vector<8x32xf32>
    %221 = math.tanh %220 : vector<8x32xf32>
    %222 = arith.mulf %217, %221 : vector<8x32xf32>
    %c0_73 = arith.constant 0 : index
    %c0_74 = arith.constant 0 : index
    %223 = vector.load %arg5[%c0_73, %c0_74] : memref<32x128xf32, #tpu.memory_space<vmem>>, vector<32x128xf32>
    %cst_75 = arith.constant dense<0.000000e+00> : vector<8x128xf32>
    %224 = tpu.matmul %222, %223, %cst_75 {dimension_numbers = #tpu.dot_dimension_numbers<[1], [0], [0], [1], [0, 0, 1, 1], [], []>} : vector<8x32xf32>, vector<32x128xf32>, vector<8x128xf32> -> vector<8x128xf32>
    %c0_76 = arith.constant 0 : index
    %c0_77 = arith.constant 0 : index
    %225 = vector.load %arg6[%c0_76, %c0_77] : memref<32x128xf32, #tpu.memory_space<vmem>>, vector<32x128xf32>
    %cst_78 = arith.constant dense<0.000000e+00> : vector<8x128xf32>
    %226 = tpu.matmul %199, %225, %cst_78 {dimension_numbers = #tpu.dot_dimension_numbers<[1], [0], [0], [1], [0, 0, 1, 1], [], []>} : vector<8x32xf32>, vector<32x128xf32>, vector<8x128xf32> -> vector<8x128xf32>
    %227 = arith.addf %224, %226 : vector<8x128xf32>
    %c0_79 = arith.constant 0 : index
    %c0_80 = arith.constant 0 : index
    %228 = vector.load %arg7[%c0_79, %c0_80] : memref<1x128xf32, #tpu.memory_space<vmem>>, vector<1x128xf32>
    %229 = vector.broadcast %228 : vector<1x128xf32> to vector<8x128xf32>
    %230 = arith.addf %227, %229 : vector<8x128xf32>
    %231 = vector.extract_strided_slice %230 {offsets = [0, 0], sizes = [8, 96], strides = [1, 1]} : vector<8x128xf32> to vector<8x96xf32>
    %232 = arith.negf %231 : vector<8x96xf32>
    %233 = math.exp %232 : vector<8x96xf32>
    %cst_81 = arith.constant 1.000000e+00 : f32
    %234 = vector.broadcast %cst_81 : f32 to vector<8x96xf32>
    %235 = arith.addf %234, %233 : vector<8x96xf32>
    %236 = arith.divf %234, %235 : vector<8x96xf32>
    %237 = vector.extract_strided_slice %230 {offsets = [0, 96], sizes = [8, 32], strides = [1, 1]} : vector<8x128xf32> to vector<8x32xf32>
    %238 = math.tanh %237 : vector<8x32xf32>
    %239 = vector.extract_strided_slice %236 {offsets = [0, 0], sizes = [8, 32], strides = [1, 1]} : vector<8x96xf32> to vector<8x32xf32>
    %240 = vector.extract_strided_slice %236 {offsets = [0, 32], sizes = [8, 32], strides = [1, 1]} : vector<8x96xf32> to vector<8x32xf32>
    %241 = vector.extract_strided_slice %236 {offsets = [0, 64], sizes = [8, 32], strides = [1, 1]} : vector<8x96xf32> to vector<8x32xf32>
    %242 = arith.mulf %240, %197 : vector<8x32xf32>
    %243 = arith.mulf %239, %238 : vector<8x32xf32>
    %244 = arith.addf %242, %243 : vector<8x32xf32>
    %245 = math.tanh %244 : vector<8x32xf32>
    %246 = arith.mulf %241, %245 : vector<8x32xf32>
    %247 = vector.extract_strided_slice %7 {offsets = [40, 0], sizes = [8, 128], strides = [1, 1]} : vector<64x128xf32> to vector<8x128xf32>
    %c0_82 = arith.constant 0 : index
    %c0_83 = arith.constant 0 : index
    %248 = vector.load %arg3[%c0_82, %c0_83] : memref<32x128xf32, #tpu.memory_space<vmem>>, vector<32x128xf32>
    %cst_84 = arith.constant dense<0.000000e+00> : vector<8x128xf32>
    %249 = tpu.matmul %222, %248, %cst_84 {dimension_numbers = #tpu.dot_dimension_numbers<[1], [0], [0], [1], [0, 0, 1, 1], [], []>} : vector<8x32xf32>, vector<32x128xf32>, vector<8x128xf32> -> vector<8x128xf32>
    %250 = arith.addf %247, %249 : vector<8x128xf32>
    %c0_85 = arith.constant 0 : index
    %c0_86 = arith.constant 0 : index
    %251 = vector.load %arg4[%c0_85, %c0_86] : memref<1x128xf32, #tpu.memory_space<vmem>>, vector<1x128xf32>
    %252 = vector.broadcast %251 : vector<1x128xf32> to vector<8x128xf32>
    %253 = arith.addf %250, %252 : vector<8x128xf32>
    %254 = vector.extract_strided_slice %253 {offsets = [0, 0], sizes = [8, 96], strides = [1, 1]} : vector<8x128xf32> to vector<8x96xf32>
    %255 = arith.negf %254 : vector<8x96xf32>
    %256 = math.exp %255 : vector<8x96xf32>
    %cst_87 = arith.constant 1.000000e+00 : f32
    %257 = vector.broadcast %cst_87 : f32 to vector<8x96xf32>
    %258 = arith.addf %257, %256 : vector<8x96xf32>
    %259 = arith.divf %257, %258 : vector<8x96xf32>
    %260 = vector.extract_strided_slice %253 {offsets = [0, 96], sizes = [8, 32], strides = [1, 1]} : vector<8x128xf32> to vector<8x32xf32>
    %261 = math.tanh %260 : vector<8x32xf32>
    %262 = vector.extract_strided_slice %259 {offsets = [0, 0], sizes = [8, 32], strides = [1, 1]} : vector<8x96xf32> to vector<8x32xf32>
    %263 = vector.extract_strided_slice %259 {offsets = [0, 32], sizes = [8, 32], strides = [1, 1]} : vector<8x96xf32> to vector<8x32xf32>
    %264 = vector.extract_strided_slice %259 {offsets = [0, 64], sizes = [8, 32], strides = [1, 1]} : vector<8x96xf32> to vector<8x32xf32>
    %265 = arith.mulf %263, %220 : vector<8x32xf32>
    %266 = arith.mulf %262, %261 : vector<8x32xf32>
    %267 = arith.addf %265, %266 : vector<8x32xf32>
    %268 = math.tanh %267 : vector<8x32xf32>
    %269 = arith.mulf %264, %268 : vector<8x32xf32>
    %c0_88 = arith.constant 0 : index
    %c0_89 = arith.constant 0 : index
    %270 = vector.load %arg5[%c0_88, %c0_89] : memref<32x128xf32, #tpu.memory_space<vmem>>, vector<32x128xf32>
    %cst_90 = arith.constant dense<0.000000e+00> : vector<8x128xf32>
    %271 = tpu.matmul %269, %270, %cst_90 {dimension_numbers = #tpu.dot_dimension_numbers<[1], [0], [0], [1], [0, 0, 1, 1], [], []>} : vector<8x32xf32>, vector<32x128xf32>, vector<8x128xf32> -> vector<8x128xf32>
    %c0_91 = arith.constant 0 : index
    %c0_92 = arith.constant 0 : index
    %272 = vector.load %arg6[%c0_91, %c0_92] : memref<32x128xf32, #tpu.memory_space<vmem>>, vector<32x128xf32>
    %cst_93 = arith.constant dense<0.000000e+00> : vector<8x128xf32>
    %273 = tpu.matmul %246, %272, %cst_93 {dimension_numbers = #tpu.dot_dimension_numbers<[1], [0], [0], [1], [0, 0, 1, 1], [], []>} : vector<8x32xf32>, vector<32x128xf32>, vector<8x128xf32> -> vector<8x128xf32>
    %274 = arith.addf %271, %273 : vector<8x128xf32>
    %c0_94 = arith.constant 0 : index
    %c0_95 = arith.constant 0 : index
    %275 = vector.load %arg7[%c0_94, %c0_95] : memref<1x128xf32, #tpu.memory_space<vmem>>, vector<1x128xf32>
    %276 = vector.broadcast %275 : vector<1x128xf32> to vector<8x128xf32>
    %277 = arith.addf %274, %276 : vector<8x128xf32>
    %278 = vector.extract_strided_slice %277 {offsets = [0, 0], sizes = [8, 96], strides = [1, 1]} : vector<8x128xf32> to vector<8x96xf32>
    %279 = arith.negf %278 : vector<8x96xf32>
    %280 = math.exp %279 : vector<8x96xf32>
    %cst_96 = arith.constant 1.000000e+00 : f32
    %281 = vector.broadcast %cst_96 : f32 to vector<8x96xf32>
    %282 = arith.addf %281, %280 : vector<8x96xf32>
    %283 = arith.divf %281, %282 : vector<8x96xf32>
    %284 = vector.extract_strided_slice %277 {offsets = [0, 96], sizes = [8, 32], strides = [1, 1]} : vector<8x128xf32> to vector<8x32xf32>
    %285 = math.tanh %284 : vector<8x32xf32>
    %286 = vector.extract_strided_slice %283 {offsets = [0, 0], sizes = [8, 32], strides = [1, 1]} : vector<8x96xf32> to vector<8x32xf32>
    %287 = vector.extract_strided_slice %283 {offsets = [0, 32], sizes = [8, 32], strides = [1, 1]} : vector<8x96xf32> to vector<8x32xf32>
    %288 = vector.extract_strided_slice %283 {offsets = [0, 64], sizes = [8, 32], strides = [1, 1]} : vector<8x96xf32> to vector<8x32xf32>
    %289 = arith.mulf %287, %244 : vector<8x32xf32>
    %290 = arith.mulf %286, %285 : vector<8x32xf32>
    %291 = arith.addf %289, %290 : vector<8x32xf32>
    %292 = math.tanh %291 : vector<8x32xf32>
    %293 = arith.mulf %288, %292 : vector<8x32xf32>
    %294 = vector.extract_strided_slice %7 {offsets = [48, 0], sizes = [8, 128], strides = [1, 1]} : vector<64x128xf32> to vector<8x128xf32>
    %c0_97 = arith.constant 0 : index
    %c0_98 = arith.constant 0 : index
    %295 = vector.load %arg3[%c0_97, %c0_98] : memref<32x128xf32, #tpu.memory_space<vmem>>, vector<32x128xf32>
    %cst_99 = arith.constant dense<0.000000e+00> : vector<8x128xf32>
    %296 = tpu.matmul %269, %295, %cst_99 {dimension_numbers = #tpu.dot_dimension_numbers<[1], [0], [0], [1], [0, 0, 1, 1], [], []>} : vector<8x32xf32>, vector<32x128xf32>, vector<8x128xf32> -> vector<8x128xf32>
    %297 = arith.addf %294, %296 : vector<8x128xf32>
    %c0_100 = arith.constant 0 : index
    %c0_101 = arith.constant 0 : index
    %298 = vector.load %arg4[%c0_100, %c0_101] : memref<1x128xf32, #tpu.memory_space<vmem>>, vector<1x128xf32>
    %299 = vector.broadcast %298 : vector<1x128xf32> to vector<8x128xf32>
    %300 = arith.addf %297, %299 : vector<8x128xf32>
    %301 = vector.extract_strided_slice %300 {offsets = [0, 0], sizes = [8, 96], strides = [1, 1]} : vector<8x128xf32> to vector<8x96xf32>
    %302 = arith.negf %301 : vector<8x96xf32>
    %303 = math.exp %302 : vector<8x96xf32>
    %cst_102 = arith.constant 1.000000e+00 : f32
    %304 = vector.broadcast %cst_102 : f32 to vector<8x96xf32>
    %305 = arith.addf %304, %303 : vector<8x96xf32>
    %306 = arith.divf %304, %305 : vector<8x96xf32>
    %307 = vector.extract_strided_slice %300 {offsets = [0, 96], sizes = [8, 32], strides = [1, 1]} : vector<8x128xf32> to vector<8x32xf32>
    %308 = math.tanh %307 : vector<8x32xf32>
    %309 = vector.extract_strided_slice %306 {offsets = [0, 0], sizes = [8, 32], strides = [1, 1]} : vector<8x96xf32> to vector<8x32xf32>
    %310 = vector.extract_strided_slice %306 {offsets = [0, 32], sizes = [8, 32], strides = [1, 1]} : vector<8x96xf32> to vector<8x32xf32>
    %311 = vector.extract_strided_slice %306 {offsets = [0, 64], sizes = [8, 32], strides = [1, 1]} : vector<8x96xf32> to vector<8x32xf32>
    %312 = arith.mulf %310, %267 : vector<8x32xf32>
    %313 = arith.mulf %309, %308 : vector<8x32xf32>
    %314 = arith.addf %312, %313 : vector<8x32xf32>
    %315 = math.tanh %314 : vector<8x32xf32>
    %316 = arith.mulf %311, %315 : vector<8x32xf32>
    %c0_103 = arith.constant 0 : index
    %c0_104 = arith.constant 0 : index
    %317 = vector.load %arg5[%c0_103, %c0_104] : memref<32x128xf32, #tpu.memory_space<vmem>>, vector<32x128xf32>
    %cst_105 = arith.constant dense<0.000000e+00> : vector<8x128xf32>
    %318 = tpu.matmul %316, %317, %cst_105 {dimension_numbers = #tpu.dot_dimension_numbers<[1], [0], [0], [1], [0, 0, 1, 1], [], []>} : vector<8x32xf32>, vector<32x128xf32>, vector<8x128xf32> -> vector<8x128xf32>
    %c0_106 = arith.constant 0 : index
    %c0_107 = arith.constant 0 : index
    %319 = vector.load %arg6[%c0_106, %c0_107] : memref<32x128xf32, #tpu.memory_space<vmem>>, vector<32x128xf32>
    %cst_108 = arith.constant dense<0.000000e+00> : vector<8x128xf32>
    %320 = tpu.matmul %293, %319, %cst_108 {dimension_numbers = #tpu.dot_dimension_numbers<[1], [0], [0], [1], [0, 0, 1, 1], [], []>} : vector<8x32xf32>, vector<32x128xf32>, vector<8x128xf32> -> vector<8x128xf32>
    %321 = arith.addf %318, %320 : vector<8x128xf32>
    %c0_109 = arith.constant 0 : index
    %c0_110 = arith.constant 0 : index
    %322 = vector.load %arg7[%c0_109, %c0_110] : memref<1x128xf32, #tpu.memory_space<vmem>>, vector<1x128xf32>
    %323 = vector.broadcast %322 : vector<1x128xf32> to vector<8x128xf32>
    %324 = arith.addf %321, %323 : vector<8x128xf32>
    %325 = vector.extract_strided_slice %324 {offsets = [0, 0], sizes = [8, 96], strides = [1, 1]} : vector<8x128xf32> to vector<8x96xf32>
    %326 = arith.negf %325 : vector<8x96xf32>
    %327 = math.exp %326 : vector<8x96xf32>
    %cst_111 = arith.constant 1.000000e+00 : f32
    %328 = vector.broadcast %cst_111 : f32 to vector<8x96xf32>
    %329 = arith.addf %328, %327 : vector<8x96xf32>
    %330 = arith.divf %328, %329 : vector<8x96xf32>
    %331 = vector.extract_strided_slice %324 {offsets = [0, 96], sizes = [8, 32], strides = [1, 1]} : vector<8x128xf32> to vector<8x32xf32>
    %332 = math.tanh %331 : vector<8x32xf32>
    %333 = vector.extract_strided_slice %330 {offsets = [0, 0], sizes = [8, 32], strides = [1, 1]} : vector<8x96xf32> to vector<8x32xf32>
    %334 = vector.extract_strided_slice %330 {offsets = [0, 32], sizes = [8, 32], strides = [1, 1]} : vector<8x96xf32> to vector<8x32xf32>
    %335 = vector.extract_strided_slice %330 {offsets = [0, 64], sizes = [8, 32], strides = [1, 1]} : vector<8x96xf32> to vector<8x32xf32>
    %336 = arith.mulf %334, %291 : vector<8x32xf32>
    %337 = arith.mulf %333, %332 : vector<8x32xf32>
    %338 = arith.addf %336, %337 : vector<8x32xf32>
    %339 = math.tanh %338 : vector<8x32xf32>
    %340 = arith.mulf %335, %339 : vector<8x32xf32>
    %341 = vector.extract_strided_slice %7 {offsets = [56, 0], sizes = [8, 128], strides = [1, 1]} : vector<64x128xf32> to vector<8x128xf32>
    %c0_112 = arith.constant 0 : index
    %c0_113 = arith.constant 0 : index
    %342 = vector.load %arg3[%c0_112, %c0_113] : memref<32x128xf32, #tpu.memory_space<vmem>>, vector<32x128xf32>
    %cst_114 = arith.constant dense<0.000000e+00> : vector<8x128xf32>
    %343 = tpu.matmul %316, %342, %cst_114 {dimension_numbers = #tpu.dot_dimension_numbers<[1], [0], [0], [1], [0, 0, 1, 1], [], []>} : vector<8x32xf32>, vector<32x128xf32>, vector<8x128xf32> -> vector<8x128xf32>
    %344 = arith.addf %341, %343 : vector<8x128xf32>
    %c0_115 = arith.constant 0 : index
    %c0_116 = arith.constant 0 : index
    %345 = vector.load %arg4[%c0_115, %c0_116] : memref<1x128xf32, #tpu.memory_space<vmem>>, vector<1x128xf32>
    %346 = vector.broadcast %345 : vector<1x128xf32> to vector<8x128xf32>
    %347 = arith.addf %344, %346 : vector<8x128xf32>
    %348 = vector.extract_strided_slice %347 {offsets = [0, 0], sizes = [8, 96], strides = [1, 1]} : vector<8x128xf32> to vector<8x96xf32>
    %349 = arith.negf %348 : vector<8x96xf32>
    %350 = math.exp %349 : vector<8x96xf32>
    %cst_117 = arith.constant 1.000000e+00 : f32
    %351 = vector.broadcast %cst_117 : f32 to vector<8x96xf32>
    %352 = arith.addf %351, %350 : vector<8x96xf32>
    %353 = arith.divf %351, %352 : vector<8x96xf32>
    %354 = vector.extract_strided_slice %347 {offsets = [0, 96], sizes = [8, 32], strides = [1, 1]} : vector<8x128xf32> to vector<8x32xf32>
    %355 = math.tanh %354 : vector<8x32xf32>
    %356 = vector.extract_strided_slice %353 {offsets = [0, 0], sizes = [8, 32], strides = [1, 1]} : vector<8x96xf32> to vector<8x32xf32>
    %357 = vector.extract_strided_slice %353 {offsets = [0, 32], sizes = [8, 32], strides = [1, 1]} : vector<8x96xf32> to vector<8x32xf32>
    %358 = vector.extract_strided_slice %353 {offsets = [0, 64], sizes = [8, 32], strides = [1, 1]} : vector<8x96xf32> to vector<8x32xf32>
    %359 = arith.mulf %357, %314 : vector<8x32xf32>
    %360 = arith.mulf %356, %355 : vector<8x32xf32>
    %361 = arith.addf %359, %360 : vector<8x32xf32>
    %362 = math.tanh %361 : vector<8x32xf32>
    %363 = arith.mulf %358, %362 : vector<8x32xf32>
    %c0_118 = arith.constant 0 : index
    %c0_119 = arith.constant 0 : index
    %364 = vector.load %arg5[%c0_118, %c0_119] : memref<32x128xf32, #tpu.memory_space<vmem>>, vector<32x128xf32>
    %cst_120 = arith.constant dense<0.000000e+00> : vector<8x128xf32>
    %365 = tpu.matmul %363, %364, %cst_120 {dimension_numbers = #tpu.dot_dimension_numbers<[1], [0], [0], [1], [0, 0, 1, 1], [], []>} : vector<8x32xf32>, vector<32x128xf32>, vector<8x128xf32> -> vector<8x128xf32>
    %c0_121 = arith.constant 0 : index
    %c0_122 = arith.constant 0 : index
    %366 = vector.load %arg6[%c0_121, %c0_122] : memref<32x128xf32, #tpu.memory_space<vmem>>, vector<32x128xf32>
    %cst_123 = arith.constant dense<0.000000e+00> : vector<8x128xf32>
    %367 = tpu.matmul %340, %366, %cst_123 {dimension_numbers = #tpu.dot_dimension_numbers<[1], [0], [0], [1], [0, 0, 1, 1], [], []>} : vector<8x32xf32>, vector<32x128xf32>, vector<8x128xf32> -> vector<8x128xf32>
    %368 = arith.addf %365, %367 : vector<8x128xf32>
    %c0_124 = arith.constant 0 : index
    %c0_125 = arith.constant 0 : index
    %369 = vector.load %arg7[%c0_124, %c0_125] : memref<1x128xf32, #tpu.memory_space<vmem>>, vector<1x128xf32>
    %370 = vector.broadcast %369 : vector<1x128xf32> to vector<8x128xf32>
    %371 = arith.addf %368, %370 : vector<8x128xf32>
    %372 = vector.extract_strided_slice %371 {offsets = [0, 0], sizes = [8, 96], strides = [1, 1]} : vector<8x128xf32> to vector<8x96xf32>
    %373 = arith.negf %372 : vector<8x96xf32>
    %374 = math.exp %373 : vector<8x96xf32>
    %cst_126 = arith.constant 1.000000e+00 : f32
    %375 = vector.broadcast %cst_126 : f32 to vector<8x96xf32>
    %376 = arith.addf %375, %374 : vector<8x96xf32>
    %377 = arith.divf %375, %376 : vector<8x96xf32>
    %378 = vector.extract_strided_slice %371 {offsets = [0, 96], sizes = [8, 32], strides = [1, 1]} : vector<8x128xf32> to vector<8x32xf32>
    %379 = math.tanh %378 : vector<8x32xf32>
    %380 = vector.extract_strided_slice %377 {offsets = [0, 0], sizes = [8, 32], strides = [1, 1]} : vector<8x96xf32> to vector<8x32xf32>
    %381 = vector.extract_strided_slice %377 {offsets = [0, 32], sizes = [8, 32], strides = [1, 1]} : vector<8x96xf32> to vector<8x32xf32>
    %382 = vector.extract_strided_slice %377 {offsets = [0, 64], sizes = [8, 32], strides = [1, 1]} : vector<8x96xf32> to vector<8x32xf32>
    %383 = arith.mulf %381, %338 : vector<8x32xf32>
    %384 = arith.mulf %380, %379 : vector<8x32xf32>
    %385 = arith.addf %383, %384 : vector<8x32xf32>
    %386 = math.tanh %385 : vector<8x32xf32>
    %387 = arith.mulf %382, %386 : vector<8x32xf32>
    %c0_127 = arith.constant 0 : index
    %c0_128 = arith.constant 0 : index
    %388 = vector.load %arg9[%c0_127, %c0_128] : memref<32x128xf32, #tpu.memory_space<vmem>>, vector<32x128xf32>
    %cst_129 = arith.constant dense<0.000000e+00> : vector<8x128xf32>
    %389 = tpu.matmul %387, %388, %cst_129 {dimension_numbers = #tpu.dot_dimension_numbers<[1], [0], [0], [1], [0, 0, 1, 1], [], []>} : vector<8x32xf32>, vector<32x128xf32>, vector<8x128xf32> -> vector<8x128xf32>
    %c0_130 = arith.constant 0 : index
    %c0_131 = arith.constant 0 : index
    %390 = vector.load %arg11[%c0_130, %c0_131] : memref<1x128xf32, #tpu.memory_space<vmem>>, vector<1x128xf32>
    %391 = vector.broadcast %390 : vector<1x128xf32> to vector<8x128xf32>
    %392 = arith.addf %389, %391 : vector<8x128xf32>
    %c0_132 = arith.constant 0 : index
    %c0_133 = arith.constant 0 : index
    %393 = vector.load %arg16[%c0_132, %c0_133] : memref<32x128xf32, #tpu.memory_space<vmem>>, vector<32x128xf32>
    %cst_134 = arith.constant dense<0.000000e+00> : vector<8x128xf32>
    %394 = tpu.matmul %387, %393, %cst_134 {dimension_numbers = #tpu.dot_dimension_numbers<[1], [0], [0], [1], [0, 0, 1, 1], [], []>} : vector<8x32xf32>, vector<32x128xf32>, vector<8x128xf32> -> vector<8x128xf32>
    %c0_135 = arith.constant 0 : index
    %c0_136 = arith.constant 0 : index
    %395 = vector.load %arg17[%c0_135, %c0_136] : memref<1x128xf32, #tpu.memory_space<vmem>>, vector<1x128xf32>
    %396 = vector.broadcast %395 : vector<1x128xf32> to vector<8x128xf32>
    %397 = arith.addf %394, %396 : vector<8x128xf32>
    %cst_137 = arith.constant 0.000000e+00 : f32
    %398 = vector.broadcast %cst_137 : f32 to vector<8x128xf32>
    %c0_138 = arith.constant 0 : index
    %c0_139 = arith.constant 0 : index
    %c0_140 = arith.constant 0 : index
    %399 = vector.load %arg18[%c0_138, %c0_139, %c0_140] : memref<6x8x128xf32, #tpu.memory_space<vmem>>, vector<1x8x128xf32>
    %400 = vector.shape_cast %399 : vector<1x8x128xf32> to vector<8x128xf32>
    %401 = vector.shape_cast %398 : vector<8x128xf32> to vector<1x8x128xf32>
    tpu.vector_store %arg18[%c0_138, %c0_139, %c0_140], %401 {strides = array<i32>} : memref<6x8x128xf32, #tpu.memory_space<vmem>>, vector<1x8x128xf32>,
    %c0_141 = arith.constant 0 : index
    %c0_142 = arith.constant 0 : index
    %402 = vector.load %arg1[%c0_141, %c0_142] : memref<8x128xf32, #tpu.memory_space<vmem>>, vector<8x128xf32>
    %403 = tpu.iota {dimensions = array<i32: 1>} : vector<8x128xi32>
    %c11_i32 = arith.constant 11 : i32
    %404 = vector.broadcast %c11_i32 : i32 to vector<8x128xi32>
    %405 = arith.cmpi slt, %403, %404 : vector<8x128xi32>
    %c0_143 = arith.constant 0 : index
    %c0_144 = arith.constant 0 : index
    %406 = vector.load %arg8[%c0_143, %c0_144] : memref<128x128xf32, #tpu.memory_space<vmem>>, vector<128x128xf32>
    %cst_145 = arith.constant dense<0.000000e+00> : vector<8x128xf32>
    %407 = tpu.matmul %402, %406, %cst_145 {dimension_numbers = #tpu.dot_dimension_numbers<[1], [0], [0], [1], [0, 0, 1, 1], [], []>} : vector<8x128xf32>, vector<128x128xf32>, vector<8x128xf32> -> vector<8x128xf32>
    %c0_146 = arith.constant 0 : index
    %c0_147 = arith.constant 0 : index
    %408 = vector.load %arg10[%c0_146, %c0_147] : memref<32x128xf32, #tpu.memory_space<vmem>>, vector<32x128xf32>
    %cst_148 = arith.constant dense<0.000000e+00> : vector<8x128xf32>
    %409 = tpu.matmul %363, %408, %cst_148 {dimension_numbers = #tpu.dot_dimension_numbers<[1], [0], [0], [1], [0, 0, 1, 1], [], []>} : vector<8x32xf32>, vector<32x128xf32>, vector<8x128xf32> -> vector<8x128xf32>
    %410 = arith.addf %407, %409 : vector<8x128xf32>
    %411 = arith.addf %410, %392 : vector<8x128xf32>
    %412 = vector.extract_strided_slice %411 {offsets = [0, 0], sizes = [8, 96], strides = [1, 1]} : vector<8x128xf32> to vector<8x96xf32>
    %413 = arith.negf %412 : vector<8x96xf32>
    %414 = math.exp %413 : vector<8x96xf32>
    %cst_149 = arith.constant 1.000000e+00 : f32
    %415 = vector.broadcast %cst_149 : f32 to vector<8x96xf32>
    %416 = arith.addf %415, %414 : vector<8x96xf32>
    %417 = arith.divf %415, %416 : vector<8x96xf32>
    %418 = vector.extract_strided_slice %411 {offsets = [0, 96], sizes = [8, 32], strides = [1, 1]} : vector<8x128xf32> to vector<8x32xf32>
    %419 = math.tanh %418 : vector<8x32xf32>
    %420 = vector.extract_strided_slice %417 {offsets = [0, 0], sizes = [8, 32], strides = [1, 1]} : vector<8x96xf32> to vector<8x32xf32>
    %421 = vector.extract_strided_slice %417 {offsets = [0, 32], sizes = [8, 32], strides = [1, 1]} : vector<8x96xf32> to vector<8x32xf32>
    %422 = vector.extract_strided_slice %417 {offsets = [0, 64], sizes = [8, 32], strides = [1, 1]} : vector<8x96xf32> to vector<8x32xf32>
    %423 = arith.mulf %421, %361 : vector<8x32xf32>
    %424 = arith.mulf %420, %419 : vector<8x32xf32>
    %425 = arith.addf %423, %424 : vector<8x32xf32>
    %426 = math.tanh %425 : vector<8x32xf32>
    %427 = arith.mulf %422, %426 : vector<8x32xf32>
    %c0_150 = arith.constant 0 : index
    %c0_151 = arith.constant 0 : index
    %428 = vector.load %arg12[%c0_150, %c0_151] : memref<32x128xf32, #tpu.memory_space<vmem>>, vector<32x128xf32>
    %cst_152 = arith.constant dense<0.000000e+00> : vector<8x128xf32>
    %429 = tpu.matmul %427, %428, %cst_152 {dimension_numbers = #tpu.dot_dimension_numbers<[1], [0], [0], [1], [0, 0, 1, 1], [], []>} : vector<8x32xf32>, vector<32x128xf32>, vector<8x128xf32> -> vector<8x128xf32>
    %c0_153 = arith.constant 0 : index
    %c0_154 = arith.constant 0 : index
    %430 = vector.load %arg13[%c0_153, %c0_154] : memref<32x128xf32, #tpu.memory_space<vmem>>, vector<32x128xf32>
    %cst_155 = arith.constant dense<0.000000e+00> : vector<8x128xf32>
    %431 = tpu.matmul %387, %430, %cst_155 {dimension_numbers = #tpu.dot_dimension_numbers<[1], [0], [0], [1], [0, 0, 1, 1], [], []>} : vector<8x32xf32>, vector<32x128xf32>, vector<8x128xf32> -> vector<8x128xf32>
    %432 = arith.addf %429, %431 : vector<8x128xf32>
    %c0_156 = arith.constant 0 : index
    %c0_157 = arith.constant 0 : index
    %433 = vector.load %arg14[%c0_156, %c0_157] : memref<1x128xf32, #tpu.memory_space<vmem>>, vector<1x128xf32>
    %434 = vector.broadcast %433 : vector<1x128xf32> to vector<8x128xf32>
    %435 = arith.addf %432, %434 : vector<8x128xf32>
    %436 = vector.extract_strided_slice %435 {offsets = [0, 0], sizes = [8, 96], strides = [1, 1]} : vector<8x128xf32> to vector<8x96xf32>
    %437 = arith.negf %436 : vector<8x96xf32>
    %438 = math.exp %437 : vector<8x96xf32>
    %cst_158 = arith.constant 1.000000e+00 : f32
    %439 = vector.broadcast %cst_158 : f32 to vector<8x96xf32>
    %440 = arith.addf %439, %438 : vector<8x96xf32>
    %441 = arith.divf %439, %440 : vector<8x96xf32>
    %442 = vector.extract_strided_slice %435 {offsets = [0, 96], sizes = [8, 32], strides = [1, 1]} : vector<8x128xf32> to vector<8x32xf32>
    %443 = math.tanh %442 : vector<8x32xf32>
    %444 = vector.extract_strided_slice %441 {offsets = [0, 0], sizes = [8, 32], strides = [1, 1]} : vector<8x96xf32> to vector<8x32xf32>
    %445 = vector.extract_strided_slice %441 {offsets = [0, 32], sizes = [8, 32], strides = [1, 1]} : vector<8x96xf32> to vector<8x32xf32>
    %446 = vector.extract_strided_slice %441 {offsets = [0, 64], sizes = [8, 32], strides = [1, 1]} : vector<8x96xf32> to vector<8x32xf32>
    %447 = arith.mulf %445, %385 : vector<8x32xf32>
    %448 = arith.mulf %444, %443 : vector<8x32xf32>
    %449 = arith.addf %447, %448 : vector<8x32xf32>
    %450 = math.tanh %449 : vector<8x32xf32>
    %451 = arith.mulf %446, %450 : vector<8x32xf32>
    %c0_159 = arith.constant 0 : index
    %c0_160 = arith.constant 0 : index
    %452 = vector.load %arg15[%c0_159, %c0_160] : memref<32x128xf32, #tpu.memory_space<vmem>>, vector<32x128xf32>
    %cst_161 = arith.constant dense<0.000000e+00> : vector<8x128xf32>
    %453 = tpu.matmul %451, %452, %cst_161 {dimension_numbers = #tpu.dot_dimension_numbers<[1], [0], [0], [1], [0, 0, 1, 1], [], []>} : vector<8x32xf32>, vector<32x128xf32>, vector<8x128xf32> -> vector<8x128xf32>
    %454 = arith.addf %453, %397 : vector<8x128xf32>
    %c1 = arith.constant 1 : index
    %c0_162 = arith.constant 0 : index
    %c0_163 = arith.constant 0 : index
    %455 = vector.load %arg18[%c1, %c0_162, %c0_163] : memref<6x8x128xf32, #tpu.memory_space<vmem>>, vector<1x8x128xf32>
    %456 = vector.shape_cast %455 : vector<1x8x128xf32> to vector<8x128xf32>
    %457 = vector.shape_cast %454 : vector<8x128xf32> to vector<1x8x128xf32>
    tpu.vector_store %arg18[%c1, %c0_162, %c0_163], %457 {strides = array<i32>} : memref<6x8x128xf32, #tpu.memory_space<vmem>>, vector<1x8x128xf32>,
    %cst_164 = arith.constant -3.000000e+38 : f32
    %458 = vector.broadcast %cst_164 : f32 to vector<8x128xf32>
    %459 = arith.select %405, %454, %458 : vector<8x128xi1>, vector<8x128xf32>
    %cst_165 = arith.constant dense<0xFF800000> : vector<8xf32>
    %460 = vector.multi_reduction <maximumf>, %459, %cst_165 [1] : vector<8x128xf32> to vector<8xf32>
    %461 = vector.shape_cast %460 : vector<8xf32> to vector<8x1xf32>
    %462 = vector.broadcast %461 : vector<8x1xf32> to vector<8x128xf32>
    %463 = arith.cmpf oeq, %459, %462 : vector<8x128xf32>
    %464 = arith.andi %463, %405 : vector<8x128xi1>
    %c128_i32 = arith.constant 128 : i32
    %465 = vector.broadcast %c128_i32 : i32 to vector<8x128xi32>
    %466 = arith.select %464, %403, %465 : vector<8x128xi1>, vector<8x128xi32>
    %cst_166 = arith.constant dense<2147483647> : vector<8xi32>
    %467 = vector.multi_reduction <minsi>, %466, %cst_166 [1] : vector<8x128xi32> to vector<8xi32>
    %468 = vector.shape_cast %467 : vector<8xi32> to vector<8x1xi32>
    %469 = vector.broadcast %468 : vector<8x1xi32> to vector<8x128xi32>
    %470 = arith.cmpi eq, %403, %469 : vector<8x128xi32>
    %471 = arith.extui %470 : vector<8x128xi1> to vector<8x128xi32>
    %472 = arith.sitofp %471 : vector<8x128xi32> to vector<8x128xf32>
    %c0_167 = arith.constant 0 : index
    %c0_168 = arith.constant 0 : index
    %473 = vector.load %arg8[%c0_167, %c0_168] : memref<128x128xf32, #tpu.memory_space<vmem>>, vector<128x128xf32>
    %cst_169 = arith.constant dense<0.000000e+00> : vector<8x128xf32>
    %474 = tpu.matmul %472, %473, %cst_169 {dimension_numbers = #tpu.dot_dimension_numbers<[1], [0], [0], [1], [0, 0, 1, 1], [], []>} : vector<8x128xf32>, vector<128x128xf32>, vector<8x128xf32> -> vector<8x128xf32>
    %c0_170 = arith.constant 0 : index
    %c0_171 = arith.constant 0 : index
    %475 = vector.load %arg10[%c0_170, %c0_171] : memref<32x128xf32, #tpu.memory_space<vmem>>, vector<32x128xf32>
    %cst_172 = arith.constant dense<0.000000e+00> : vector<8x128xf32>
    %476 = tpu.matmul %427, %475, %cst_172 {dimension_numbers = #tpu.dot_dimension_numbers<[1], [0], [0], [1], [0, 0, 1, 1], [], []>} : vector<8x32xf32>, vector<32x128xf32>, vector<8x128xf32> -> vector<8x128xf32>
    %477 = arith.addf %474, %476 : vector<8x128xf32>
    %478 = arith.addf %477, %392 : vector<8x128xf32>
    %479 = vector.extract_strided_slice %478 {offsets = [0, 0], sizes = [8, 96], strides = [1, 1]} : vector<8x128xf32> to vector<8x96xf32>
    %480 = arith.negf %479 : vector<8x96xf32>
    %481 = math.exp %480 : vector<8x96xf32>
    %cst_173 = arith.constant 1.000000e+00 : f32
    %482 = vector.broadcast %cst_173 : f32 to vector<8x96xf32>
    %483 = arith.addf %482, %481 : vector<8x96xf32>
    %484 = arith.divf %482, %483 : vector<8x96xf32>
    %485 = vector.extract_strided_slice %478 {offsets = [0, 96], sizes = [8, 32], strides = [1, 1]} : vector<8x128xf32> to vector<8x32xf32>
    %486 = math.tanh %485 : vector<8x32xf32>
    %487 = vector.extract_strided_slice %484 {offsets = [0, 0], sizes = [8, 32], strides = [1, 1]} : vector<8x96xf32> to vector<8x32xf32>
    %488 = vector.extract_strided_slice %484 {offsets = [0, 32], sizes = [8, 32], strides = [1, 1]} : vector<8x96xf32> to vector<8x32xf32>
    %489 = vector.extract_strided_slice %484 {offsets = [0, 64], sizes = [8, 32], strides = [1, 1]} : vector<8x96xf32> to vector<8x32xf32>
    %490 = arith.mulf %488, %425 : vector<8x32xf32>
    %491 = arith.mulf %487, %486 : vector<8x32xf32>
    %492 = arith.addf %490, %491 : vector<8x32xf32>
    %493 = math.tanh %492 : vector<8x32xf32>
    %494 = arith.mulf %489, %493 : vector<8x32xf32>
    %c0_174 = arith.constant 0 : index
    %c0_175 = arith.constant 0 : index
    %495 = vector.load %arg12[%c0_174, %c0_175] : memref<32x128xf32, #tpu.memory_space<vmem>>, vector<32x128xf32>
    %cst_176 = arith.constant dense<0.000000e+00> : vector<8x128xf32>
    %496 = tpu.matmul %494, %495, %cst_176 {dimension_numbers = #tpu.dot_dimension_numbers<[1], [0], [0], [1], [0, 0, 1, 1], [], []>} : vector<8x32xf32>, vector<32x128xf32>, vector<8x128xf32> -> vector<8x128xf32>
    %c0_177 = arith.constant 0 : index
    %c0_178 = arith.constant 0 : index
    %497 = vector.load %arg13[%c0_177, %c0_178] : memref<32x128xf32, #tpu.memory_space<vmem>>, vector<32x128xf32>
    %cst_179 = arith.constant dense<0.000000e+00> : vector<8x128xf32>
    %498 = tpu.matmul %451, %497, %cst_179 {dimension_numbers = #tpu.dot_dimension_numbers<[1], [0], [0], [1], [0, 0, 1, 1], [], []>} : vector<8x32xf32>, vector<32x128xf32>, vector<8x128xf32> -> vector<8x128xf32>
    %499 = arith.addf %496, %498 : vector<8x128xf32>
    %c0_180 = arith.constant 0 : index
    %c0_181 = arith.constant 0 : index
    %500 = vector.load %arg14[%c0_180, %c0_181] : memref<1x128xf32, #tpu.memory_space<vmem>>, vector<1x128xf32>
    %501 = vector.broadcast %500 : vector<1x128xf32> to vector<8x128xf32>
    %502 = arith.addf %499, %501 : vector<8x128xf32>
    %503 = vector.extract_strided_slice %502 {offsets = [0, 0], sizes = [8, 96], strides = [1, 1]} : vector<8x128xf32> to vector<8x96xf32>
    %504 = arith.negf %503 : vector<8x96xf32>
    %505 = math.exp %504 : vector<8x96xf32>
    %cst_182 = arith.constant 1.000000e+00 : f32
    %506 = vector.broadcast %cst_182 : f32 to vector<8x96xf32>
    %507 = arith.addf %506, %505 : vector<8x96xf32>
    %508 = arith.divf %506, %507 : vector<8x96xf32>
    %509 = vector.extract_strided_slice %502 {offsets = [0, 96], sizes = [8, 32], strides = [1, 1]} : vector<8x128xf32> to vector<8x32xf32>
    %510 = math.tanh %509 : vector<8x32xf32>
    %511 = vector.extract_strided_slice %508 {offsets = [0, 0], sizes = [8, 32], strides = [1, 1]} : vector<8x96xf32> to vector<8x32xf32>
    %512 = vector.extract_strided_slice %508 {offsets = [0, 32], sizes = [8, 32], strides = [1, 1]} : vector<8x96xf32> to vector<8x32xf32>
    %513 = vector.extract_strided_slice %508 {offsets = [0, 64], sizes = [8, 32], strides = [1, 1]} : vector<8x96xf32> to vector<8x32xf32>
    %514 = arith.mulf %512, %449 : vector<8x32xf32>
    %515 = arith.mulf %511, %510 : vector<8x32xf32>
    %516 = arith.addf %514, %515 : vector<8x32xf32>
    %517 = math.tanh %516 : vector<8x32xf32>
    %518 = arith.mulf %513, %517 : vector<8x32xf32>
    %c0_183 = arith.constant 0 : index
    %c0_184 = arith.constant 0 : index
    %519 = vector.load %arg15[%c0_183, %c0_184] : memref<32x128xf32, #tpu.memory_space<vmem>>, vector<32x128xf32>
    %cst_185 = arith.constant dense<0.000000e+00> : vector<8x128xf32>
    %520 = tpu.matmul %518, %519, %cst_185 {dimension_numbers = #tpu.dot_dimension_numbers<[1], [0], [0], [1], [0, 0, 1, 1], [], []>} : vector<8x32xf32>, vector<32x128xf32>, vector<8x128xf32> -> vector<8x128xf32>
    %521 = arith.addf %520, %397 : vector<8x128xf32>
    %c2 = arith.constant 2 : index
    %c0_186 = arith.constant 0 : index
    %c0_187 = arith.constant 0 : index
    %522 = vector.load %arg18[%c2, %c0_186, %c0_187] : memref<6x8x128xf32, #tpu.memory_space<vmem>>, vector<1x8x128xf32>
    %523 = vector.shape_cast %522 : vector<1x8x128xf32> to vector<8x128xf32>
    %524 = vector.shape_cast %521 : vector<8x128xf32> to vector<1x8x128xf32>
    tpu.vector_store %arg18[%c2, %c0_186, %c0_187], %524 {strides = array<i32>} : memref<6x8x128xf32, #tpu.memory_space<vmem>>, vector<1x8x128xf32>,
    %cst_188 = arith.constant -3.000000e+38 : f32
    %525 = vector.broadcast %cst_188 : f32 to vector<8x128xf32>
    %526 = arith.select %405, %521, %525 : vector<8x128xi1>, vector<8x128xf32>
    %cst_189 = arith.constant dense<0xFF800000> : vector<8xf32>
    %527 = vector.multi_reduction <maximumf>, %526, %cst_189 [1] : vector<8x128xf32> to vector<8xf32>
    %528 = vector.shape_cast %527 : vector<8xf32> to vector<8x1xf32>
    %529 = vector.broadcast %528 : vector<8x1xf32> to vector<8x128xf32>
    %530 = arith.cmpf oeq, %526, %529 : vector<8x128xf32>
    %531 = arith.andi %530, %405 : vector<8x128xi1>
    %c128_i32_190 = arith.constant 128 : i32
    %532 = vector.broadcast %c128_i32_190 : i32 to vector<8x128xi32>
    %533 = arith.select %531, %403, %532 : vector<8x128xi1>, vector<8x128xi32>
    %cst_191 = arith.constant dense<2147483647> : vector<8xi32>
    %534 = vector.multi_reduction <minsi>, %533, %cst_191 [1] : vector<8x128xi32> to vector<8xi32>
    %535 = vector.shape_cast %534 : vector<8xi32> to vector<8x1xi32>
    %536 = vector.broadcast %535 : vector<8x1xi32> to vector<8x128xi32>
    %537 = arith.cmpi eq, %403, %536 : vector<8x128xi32>
    %538 = arith.extui %537 : vector<8x128xi1> to vector<8x128xi32>
    %539 = arith.sitofp %538 : vector<8x128xi32> to vector<8x128xf32>
    %c0_192 = arith.constant 0 : index
    %c0_193 = arith.constant 0 : index
    %540 = vector.load %arg8[%c0_192, %c0_193] : memref<128x128xf32, #tpu.memory_space<vmem>>, vector<128x128xf32>
    %cst_194 = arith.constant dense<0.000000e+00> : vector<8x128xf32>
    %541 = tpu.matmul %539, %540, %cst_194 {dimension_numbers = #tpu.dot_dimension_numbers<[1], [0], [0], [1], [0, 0, 1, 1], [], []>} : vector<8x128xf32>, vector<128x128xf32>, vector<8x128xf32> -> vector<8x128xf32>
    %c0_195 = arith.constant 0 : index
    %c0_196 = arith.constant 0 : index
    %542 = vector.load %arg10[%c0_195, %c0_196] : memref<32x128xf32, #tpu.memory_space<vmem>>, vector<32x128xf32>
    %cst_197 = arith.constant dense<0.000000e+00> : vector<8x128xf32>
    %543 = tpu.matmul %494, %542, %cst_197 {dimension_numbers = #tpu.dot_dimension_numbers<[1], [0], [0], [1], [0, 0, 1, 1], [], []>} : vector<8x32xf32>, vector<32x128xf32>, vector<8x128xf32> -> vector<8x128xf32>
    %544 = arith.addf %541, %543 : vector<8x128xf32>
    %545 = arith.addf %544, %392 : vector<8x128xf32>
    %546 = vector.extract_strided_slice %545 {offsets = [0, 0], sizes = [8, 96], strides = [1, 1]} : vector<8x128xf32> to vector<8x96xf32>
    %547 = arith.negf %546 : vector<8x96xf32>
    %548 = math.exp %547 : vector<8x96xf32>
    %cst_198 = arith.constant 1.000000e+00 : f32
    %549 = vector.broadcast %cst_198 : f32 to vector<8x96xf32>
    %550 = arith.addf %549, %548 : vector<8x96xf32>
    %551 = arith.divf %549, %550 : vector<8x96xf32>
    %552 = vector.extract_strided_slice %545 {offsets = [0, 96], sizes = [8, 32], strides = [1, 1]} : vector<8x128xf32> to vector<8x32xf32>
    %553 = math.tanh %552 : vector<8x32xf32>
    %554 = vector.extract_strided_slice %551 {offsets = [0, 0], sizes = [8, 32], strides = [1, 1]} : vector<8x96xf32> to vector<8x32xf32>
    %555 = vector.extract_strided_slice %551 {offsets = [0, 32], sizes = [8, 32], strides = [1, 1]} : vector<8x96xf32> to vector<8x32xf32>
    %556 = vector.extract_strided_slice %551 {offsets = [0, 64], sizes = [8, 32], strides = [1, 1]} : vector<8x96xf32> to vector<8x32xf32>
    %557 = arith.mulf %555, %492 : vector<8x32xf32>
    %558 = arith.mulf %554, %553 : vector<8x32xf32>
    %559 = arith.addf %557, %558 : vector<8x32xf32>
    %560 = math.tanh %559 : vector<8x32xf32>
    %561 = arith.mulf %556, %560 : vector<8x32xf32>
    %c0_199 = arith.constant 0 : index
    %c0_200 = arith.constant 0 : index
    %562 = vector.load %arg12[%c0_199, %c0_200] : memref<32x128xf32, #tpu.memory_space<vmem>>, vector<32x128xf32>
    %cst_201 = arith.constant dense<0.000000e+00> : vector<8x128xf32>
    %563 = tpu.matmul %561, %562, %cst_201 {dimension_numbers = #tpu.dot_dimension_numbers<[1], [0], [0], [1], [0, 0, 1, 1], [], []>} : vector<8x32xf32>, vector<32x128xf32>, vector<8x128xf32> -> vector<8x128xf32>
    %c0_202 = arith.constant 0 : index
    %c0_203 = arith.constant 0 : index
    %564 = vector.load %arg13[%c0_202, %c0_203] : memref<32x128xf32, #tpu.memory_space<vmem>>, vector<32x128xf32>
    %cst_204 = arith.constant dense<0.000000e+00> : vector<8x128xf32>
    %565 = tpu.matmul %518, %564, %cst_204 {dimension_numbers = #tpu.dot_dimension_numbers<[1], [0], [0], [1], [0, 0, 1, 1], [], []>} : vector<8x32xf32>, vector<32x128xf32>, vector<8x128xf32> -> vector<8x128xf32>
    %566 = arith.addf %563, %565 : vector<8x128xf32>
    %c0_205 = arith.constant 0 : index
    %c0_206 = arith.constant 0 : index
    %567 = vector.load %arg14[%c0_205, %c0_206] : memref<1x128xf32, #tpu.memory_space<vmem>>, vector<1x128xf32>
    %568 = vector.broadcast %567 : vector<1x128xf32> to vector<8x128xf32>
    %569 = arith.addf %566, %568 : vector<8x128xf32>
    %570 = vector.extract_strided_slice %569 {offsets = [0, 0], sizes = [8, 96], strides = [1, 1]} : vector<8x128xf32> to vector<8x96xf32>
    %571 = arith.negf %570 : vector<8x96xf32>
    %572 = math.exp %571 : vector<8x96xf32>
    %cst_207 = arith.constant 1.000000e+00 : f32
    %573 = vector.broadcast %cst_207 : f32 to vector<8x96xf32>
    %574 = arith.addf %573, %572 : vector<8x96xf32>
    %575 = arith.divf %573, %574 : vector<8x96xf32>
    %576 = vector.extract_strided_slice %569 {offsets = [0, 96], sizes = [8, 32], strides = [1, 1]} : vector<8x128xf32> to vector<8x32xf32>
    %577 = math.tanh %576 : vector<8x32xf32>
    %578 = vector.extract_strided_slice %575 {offsets = [0, 0], sizes = [8, 32], strides = [1, 1]} : vector<8x96xf32> to vector<8x32xf32>
    %579 = vector.extract_strided_slice %575 {offsets = [0, 32], sizes = [8, 32], strides = [1, 1]} : vector<8x96xf32> to vector<8x32xf32>
    %580 = vector.extract_strided_slice %575 {offsets = [0, 64], sizes = [8, 32], strides = [1, 1]} : vector<8x96xf32> to vector<8x32xf32>
    %581 = arith.mulf %579, %516 : vector<8x32xf32>
    %582 = arith.mulf %578, %577 : vector<8x32xf32>
    %583 = arith.addf %581, %582 : vector<8x32xf32>
    %584 = math.tanh %583 : vector<8x32xf32>
    %585 = arith.mulf %580, %584 : vector<8x32xf32>
    %c0_208 = arith.constant 0 : index
    %c0_209 = arith.constant 0 : index
    %586 = vector.load %arg15[%c0_208, %c0_209] : memref<32x128xf32, #tpu.memory_space<vmem>>, vector<32x128xf32>
    %cst_210 = arith.constant dense<0.000000e+00> : vector<8x128xf32>
    %587 = tpu.matmul %585, %586, %cst_210 {dimension_numbers = #tpu.dot_dimension_numbers<[1], [0], [0], [1], [0, 0, 1, 1], [], []>} : vector<8x32xf32>, vector<32x128xf32>, vector<8x128xf32> -> vector<8x128xf32>
    %588 = arith.addf %587, %397 : vector<8x128xf32>
    %c3 = arith.constant 3 : index
    %c0_211 = arith.constant 0 : index
    %c0_212 = arith.constant 0 : index
    %589 = vector.load %arg18[%c3, %c0_211, %c0_212] : memref<6x8x128xf32, #tpu.memory_space<vmem>>, vector<1x8x128xf32>
    %590 = vector.shape_cast %589 : vector<1x8x128xf32> to vector<8x128xf32>
    %591 = vector.shape_cast %588 : vector<8x128xf32> to vector<1x8x128xf32>
    tpu.vector_store %arg18[%c3, %c0_211, %c0_212], %591 {strides = array<i32>} : memref<6x8x128xf32, #tpu.memory_space<vmem>>, vector<1x8x128xf32>,
    %cst_213 = arith.constant -3.000000e+38 : f32
    %592 = vector.broadcast %cst_213 : f32 to vector<8x128xf32>
    %593 = arith.select %405, %588, %592 : vector<8x128xi1>, vector<8x128xf32>
    %cst_214 = arith.constant dense<0xFF800000> : vector<8xf32>
    %594 = vector.multi_reduction <maximumf>, %593, %cst_214 [1] : vector<8x128xf32> to vector<8xf32>
    %595 = vector.shape_cast %594 : vector<8xf32> to vector<8x1xf32>
    %596 = vector.broadcast %595 : vector<8x1xf32> to vector<8x128xf32>
    %597 = arith.cmpf oeq, %593, %596 : vector<8x128xf32>
    %598 = arith.andi %597, %405 : vector<8x128xi1>
    %c128_i32_215 = arith.constant 128 : i32
    %599 = vector.broadcast %c128_i32_215 : i32 to vector<8x128xi32>
    %600 = arith.select %598, %403, %599 : vector<8x128xi1>, vector<8x128xi32>
    %cst_216 = arith.constant dense<2147483647> : vector<8xi32>
    %601 = vector.multi_reduction <minsi>, %600, %cst_216 [1] : vector<8x128xi32> to vector<8xi32>
    %602 = vector.shape_cast %601 : vector<8xi32> to vector<8x1xi32>
    %603 = vector.broadcast %602 : vector<8x1xi32> to vector<8x128xi32>
    %604 = arith.cmpi eq, %403, %603 : vector<8x128xi32>
    %605 = arith.extui %604 : vector<8x128xi1> to vector<8x128xi32>
    %606 = arith.sitofp %605 : vector<8x128xi32> to vector<8x128xf32>
    %c0_217 = arith.constant 0 : index
    %c0_218 = arith.constant 0 : index
    %607 = vector.load %arg8[%c0_217, %c0_218] : memref<128x128xf32, #tpu.memory_space<vmem>>, vector<128x128xf32>
    %cst_219 = arith.constant dense<0.000000e+00> : vector<8x128xf32>
    %608 = tpu.matmul %606, %607, %cst_219 {dimension_numbers = #tpu.dot_dimension_numbers<[1], [0], [0], [1], [0, 0, 1, 1], [], []>} : vector<8x128xf32>, vector<128x128xf32>, vector<8x128xf32> -> vector<8x128xf32>
    %c0_220 = arith.constant 0 : index
    %c0_221 = arith.constant 0 : index
    %609 = vector.load %arg10[%c0_220, %c0_221] : memref<32x128xf32, #tpu.memory_space<vmem>>, vector<32x128xf32>
    %cst_222 = arith.constant dense<0.000000e+00> : vector<8x128xf32>
    %610 = tpu.matmul %561, %609, %cst_222 {dimension_numbers = #tpu.dot_dimension_numbers<[1], [0], [0], [1], [0, 0, 1, 1], [], []>} : vector<8x32xf32>, vector<32x128xf32>, vector<8x128xf32> -> vector<8x128xf32>
    %611 = arith.addf %608, %610 : vector<8x128xf32>
    %612 = arith.addf %611, %392 : vector<8x128xf32>
    %613 = vector.extract_strided_slice %612 {offsets = [0, 0], sizes = [8, 96], strides = [1, 1]} : vector<8x128xf32> to vector<8x96xf32>
    %614 = arith.negf %613 : vector<8x96xf32>
    %615 = math.exp %614 : vector<8x96xf32>
    %cst_223 = arith.constant 1.000000e+00 : f32
    %616 = vector.broadcast %cst_223 : f32 to vector<8x96xf32>
    %617 = arith.addf %616, %615 : vector<8x96xf32>
    %618 = arith.divf %616, %617 : vector<8x96xf32>
    %619 = vector.extract_strided_slice %612 {offsets = [0, 96], sizes = [8, 32], strides = [1, 1]} : vector<8x128xf32> to vector<8x32xf32>
    %620 = math.tanh %619 : vector<8x32xf32>
    %621 = vector.extract_strided_slice %618 {offsets = [0, 0], sizes = [8, 32], strides = [1, 1]} : vector<8x96xf32> to vector<8x32xf32>
    %622 = vector.extract_strided_slice %618 {offsets = [0, 32], sizes = [8, 32], strides = [1, 1]} : vector<8x96xf32> to vector<8x32xf32>
    %623 = vector.extract_strided_slice %618 {offsets = [0, 64], sizes = [8, 32], strides = [1, 1]} : vector<8x96xf32> to vector<8x32xf32>
    %624 = arith.mulf %622, %559 : vector<8x32xf32>
    %625 = arith.mulf %621, %620 : vector<8x32xf32>
    %626 = arith.addf %624, %625 : vector<8x32xf32>
    %627 = math.tanh %626 : vector<8x32xf32>
    %628 = arith.mulf %623, %627 : vector<8x32xf32>
    %c0_224 = arith.constant 0 : index
    %c0_225 = arith.constant 0 : index
    %629 = vector.load %arg12[%c0_224, %c0_225] : memref<32x128xf32, #tpu.memory_space<vmem>>, vector<32x128xf32>
    %cst_226 = arith.constant dense<0.000000e+00> : vector<8x128xf32>
    %630 = tpu.matmul %628, %629, %cst_226 {dimension_numbers = #tpu.dot_dimension_numbers<[1], [0], [0], [1], [0, 0, 1, 1], [], []>} : vector<8x32xf32>, vector<32x128xf32>, vector<8x128xf32> -> vector<8x128xf32>
    %c0_227 = arith.constant 0 : index
    %c0_228 = arith.constant 0 : index
    %631 = vector.load %arg13[%c0_227, %c0_228] : memref<32x128xf32, #tpu.memory_space<vmem>>, vector<32x128xf32>
    %cst_229 = arith.constant dense<0.000000e+00> : vector<8x128xf32>
    %632 = tpu.matmul %585, %631, %cst_229 {dimension_numbers = #tpu.dot_dimension_numbers<[1], [0], [0], [1], [0, 0, 1, 1], [], []>} : vector<8x32xf32>, vector<32x128xf32>, vector<8x128xf32> -> vector<8x128xf32>
    %633 = arith.addf %630, %632 : vector<8x128xf32>
    %c0_230 = arith.constant 0 : index
    %c0_231 = arith.constant 0 : index
    %634 = vector.load %arg14[%c0_230, %c0_231] : memref<1x128xf32, #tpu.memory_space<vmem>>, vector<1x128xf32>
    %635 = vector.broadcast %634 : vector<1x128xf32> to vector<8x128xf32>
    %636 = arith.addf %633, %635 : vector<8x128xf32>
    %637 = vector.extract_strided_slice %636 {offsets = [0, 0], sizes = [8, 96], strides = [1, 1]} : vector<8x128xf32> to vector<8x96xf32>
    %638 = arith.negf %637 : vector<8x96xf32>
    %639 = math.exp %638 : vector<8x96xf32>
    %cst_232 = arith.constant 1.000000e+00 : f32
    %640 = vector.broadcast %cst_232 : f32 to vector<8x96xf32>
    %641 = arith.addf %640, %639 : vector<8x96xf32>
    %642 = arith.divf %640, %641 : vector<8x96xf32>
    %643 = vector.extract_strided_slice %636 {offsets = [0, 96], sizes = [8, 32], strides = [1, 1]} : vector<8x128xf32> to vector<8x32xf32>
    %644 = math.tanh %643 : vector<8x32xf32>
    %645 = vector.extract_strided_slice %642 {offsets = [0, 0], sizes = [8, 32], strides = [1, 1]} : vector<8x96xf32> to vector<8x32xf32>
    %646 = vector.extract_strided_slice %642 {offsets = [0, 32], sizes = [8, 32], strides = [1, 1]} : vector<8x96xf32> to vector<8x32xf32>
    %647 = vector.extract_strided_slice %642 {offsets = [0, 64], sizes = [8, 32], strides = [1, 1]} : vector<8x96xf32> to vector<8x32xf32>
    %648 = arith.mulf %646, %583 : vector<8x32xf32>
    %649 = arith.mulf %645, %644 : vector<8x32xf32>
    %650 = arith.addf %648, %649 : vector<8x32xf32>
    %651 = math.tanh %650 : vector<8x32xf32>
    %652 = arith.mulf %647, %651 : vector<8x32xf32>
    %c0_233 = arith.constant 0 : index
    %c0_234 = arith.constant 0 : index
    %653 = vector.load %arg15[%c0_233, %c0_234] : memref<32x128xf32, #tpu.memory_space<vmem>>, vector<32x128xf32>
    %cst_235 = arith.constant dense<0.000000e+00> : vector<8x128xf32>
    %654 = tpu.matmul %652, %653, %cst_235 {dimension_numbers = #tpu.dot_dimension_numbers<[1], [0], [0], [1], [0, 0, 1, 1], [], []>} : vector<8x32xf32>, vector<32x128xf32>, vector<8x128xf32> -> vector<8x128xf32>
    %655 = arith.addf %654, %397 : vector<8x128xf32>
    %c4 = arith.constant 4 : index
    %c0_236 = arith.constant 0 : index
    %c0_237 = arith.constant 0 : index
    %656 = vector.load %arg18[%c4, %c0_236, %c0_237] : memref<6x8x128xf32, #tpu.memory_space<vmem>>, vector<1x8x128xf32>
    %657 = vector.shape_cast %656 : vector<1x8x128xf32> to vector<8x128xf32>
    %658 = vector.shape_cast %655 : vector<8x128xf32> to vector<1x8x128xf32>
    tpu.vector_store %arg18[%c4, %c0_236, %c0_237], %658 {strides = array<i32>} : memref<6x8x128xf32, #tpu.memory_space<vmem>>, vector<1x8x128xf32>,
    %cst_238 = arith.constant -3.000000e+38 : f32
    %659 = vector.broadcast %cst_238 : f32 to vector<8x128xf32>
    %660 = arith.select %405, %655, %659 : vector<8x128xi1>, vector<8x128xf32>
    %cst_239 = arith.constant dense<0xFF800000> : vector<8xf32>
    %661 = vector.multi_reduction <maximumf>, %660, %cst_239 [1] : vector<8x128xf32> to vector<8xf32>
    %662 = vector.shape_cast %661 : vector<8xf32> to vector<8x1xf32>
    %663 = vector.broadcast %662 : vector<8x1xf32> to vector<8x128xf32>
    %664 = arith.cmpf oeq, %660, %663 : vector<8x128xf32>
    %665 = arith.andi %664, %405 : vector<8x128xi1>
    %c128_i32_240 = arith.constant 128 : i32
    %666 = vector.broadcast %c128_i32_240 : i32 to vector<8x128xi32>
    %667 = arith.select %665, %403, %666 : vector<8x128xi1>, vector<8x128xi32>
    %cst_241 = arith.constant dense<2147483647> : vector<8xi32>
    %668 = vector.multi_reduction <minsi>, %667, %cst_241 [1] : vector<8x128xi32> to vector<8xi32>
    %669 = vector.shape_cast %668 : vector<8xi32> to vector<8x1xi32>
    %670 = vector.broadcast %669 : vector<8x1xi32> to vector<8x128xi32>
    %671 = arith.cmpi eq, %403, %670 : vector<8x128xi32>
    %672 = arith.extui %671 : vector<8x128xi1> to vector<8x128xi32>
    %673 = arith.sitofp %672 : vector<8x128xi32> to vector<8x128xf32>
    %c0_242 = arith.constant 0 : index
    %c0_243 = arith.constant 0 : index
    %674 = vector.load %arg8[%c0_242, %c0_243] : memref<128x128xf32, #tpu.memory_space<vmem>>, vector<128x128xf32>
    %cst_244 = arith.constant dense<0.000000e+00> : vector<8x128xf32>
    %675 = tpu.matmul %673, %674, %cst_244 {dimension_numbers = #tpu.dot_dimension_numbers<[1], [0], [0], [1], [0, 0, 1, 1], [], []>} : vector<8x128xf32>, vector<128x128xf32>, vector<8x128xf32> -> vector<8x128xf32>
    %c0_245 = arith.constant 0 : index
    %c0_246 = arith.constant 0 : index
    %676 = vector.load %arg10[%c0_245, %c0_246] : memref<32x128xf32, #tpu.memory_space<vmem>>, vector<32x128xf32>
    %cst_247 = arith.constant dense<0.000000e+00> : vector<8x128xf32>
    %677 = tpu.matmul %628, %676, %cst_247 {dimension_numbers = #tpu.dot_dimension_numbers<[1], [0], [0], [1], [0, 0, 1, 1], [], []>} : vector<8x32xf32>, vector<32x128xf32>, vector<8x128xf32> -> vector<8x128xf32>
    %678 = arith.addf %675, %677 : vector<8x128xf32>
    %679 = arith.addf %678, %392 : vector<8x128xf32>
    %680 = vector.extract_strided_slice %679 {offsets = [0, 0], sizes = [8, 96], strides = [1, 1]} : vector<8x128xf32> to vector<8x96xf32>
    %681 = arith.negf %680 : vector<8x96xf32>
    %682 = math.exp %681 : vector<8x96xf32>
    %cst_248 = arith.constant 1.000000e+00 : f32
    %683 = vector.broadcast %cst_248 : f32 to vector<8x96xf32>
    %684 = arith.addf %683, %682 : vector<8x96xf32>
    %685 = arith.divf %683, %684 : vector<8x96xf32>
    %686 = vector.extract_strided_slice %679 {offsets = [0, 96], sizes = [8, 32], strides = [1, 1]} : vector<8x128xf32> to vector<8x32xf32>
    %687 = math.tanh %686 : vector<8x32xf32>
    %688 = vector.extract_strided_slice %685 {offsets = [0, 0], sizes = [8, 32], strides = [1, 1]} : vector<8x96xf32> to vector<8x32xf32>
    %689 = vector.extract_strided_slice %685 {offsets = [0, 32], sizes = [8, 32], strides = [1, 1]} : vector<8x96xf32> to vector<8x32xf32>
    %690 = vector.extract_strided_slice %685 {offsets = [0, 64], sizes = [8, 32], strides = [1, 1]} : vector<8x96xf32> to vector<8x32xf32>
    %691 = arith.mulf %689, %626 : vector<8x32xf32>
    %692 = arith.mulf %688, %687 : vector<8x32xf32>
    %693 = arith.addf %691, %692 : vector<8x32xf32>
    %694 = math.tanh %693 : vector<8x32xf32>
    %695 = arith.mulf %690, %694 : vector<8x32xf32>
    %c0_249 = arith.constant 0 : index
    %c0_250 = arith.constant 0 : index
    %696 = vector.load %arg12[%c0_249, %c0_250] : memref<32x128xf32, #tpu.memory_space<vmem>>, vector<32x128xf32>
    %cst_251 = arith.constant dense<0.000000e+00> : vector<8x128xf32>
    %697 = tpu.matmul %695, %696, %cst_251 {dimension_numbers = #tpu.dot_dimension_numbers<[1], [0], [0], [1], [0, 0, 1, 1], [], []>} : vector<8x32xf32>, vector<32x128xf32>, vector<8x128xf32> -> vector<8x128xf32>
    %c0_252 = arith.constant 0 : index
    %c0_253 = arith.constant 0 : index
    %698 = vector.load %arg13[%c0_252, %c0_253] : memref<32x128xf32, #tpu.memory_space<vmem>>, vector<32x128xf32>
    %cst_254 = arith.constant dense<0.000000e+00> : vector<8x128xf32>
    %699 = tpu.matmul %652, %698, %cst_254 {dimension_numbers = #tpu.dot_dimension_numbers<[1], [0], [0], [1], [0, 0, 1, 1], [], []>} : vector<8x32xf32>, vector<32x128xf32>, vector<8x128xf32> -> vector<8x128xf32>
    %700 = arith.addf %697, %699 : vector<8x128xf32>
    %c0_255 = arith.constant 0 : index
    %c0_256 = arith.constant 0 : index
    %701 = vector.load %arg14[%c0_255, %c0_256] : memref<1x128xf32, #tpu.memory_space<vmem>>, vector<1x128xf32>
    %702 = vector.broadcast %701 : vector<1x128xf32> to vector<8x128xf32>
    %703 = arith.addf %700, %702 : vector<8x128xf32>
    %704 = vector.extract_strided_slice %703 {offsets = [0, 0], sizes = [8, 96], strides = [1, 1]} : vector<8x128xf32> to vector<8x96xf32>
    %705 = arith.negf %704 : vector<8x96xf32>
    %706 = math.exp %705 : vector<8x96xf32>
    %cst_257 = arith.constant 1.000000e+00 : f32
    %707 = vector.broadcast %cst_257 : f32 to vector<8x96xf32>
    %708 = arith.addf %707, %706 : vector<8x96xf32>
    %709 = arith.divf %707, %708 : vector<8x96xf32>
    %710 = vector.extract_strided_slice %703 {offsets = [0, 96], sizes = [8, 32], strides = [1, 1]} : vector<8x128xf32> to vector<8x32xf32>
    %711 = math.tanh %710 : vector<8x32xf32>
    %712 = vector.extract_strided_slice %709 {offsets = [0, 0], sizes = [8, 32], strides = [1, 1]} : vector<8x96xf32> to vector<8x32xf32>
    %713 = vector.extract_strided_slice %709 {offsets = [0, 32], sizes = [8, 32], strides = [1, 1]} : vector<8x96xf32> to vector<8x32xf32>
    %714 = vector.extract_strided_slice %709 {offsets = [0, 64], sizes = [8, 32], strides = [1, 1]} : vector<8x96xf32> to vector<8x32xf32>
    %715 = arith.mulf %713, %650 : vector<8x32xf32>
    %716 = arith.mulf %712, %711 : vector<8x32xf32>
    %717 = arith.addf %715, %716 : vector<8x32xf32>
    %718 = math.tanh %717 : vector<8x32xf32>
    %719 = arith.mulf %714, %718 : vector<8x32xf32>
    %c0_258 = arith.constant 0 : index
    %c0_259 = arith.constant 0 : index
    %720 = vector.load %arg15[%c0_258, %c0_259] : memref<32x128xf32, #tpu.memory_space<vmem>>, vector<32x128xf32>
    %cst_260 = arith.constant dense<0.000000e+00> : vector<8x128xf32>
    %721 = tpu.matmul %719, %720, %cst_260 {dimension_numbers = #tpu.dot_dimension_numbers<[1], [0], [0], [1], [0, 0, 1, 1], [], []>} : vector<8x32xf32>, vector<32x128xf32>, vector<8x128xf32> -> vector<8x128xf32>
    %722 = arith.addf %721, %397 : vector<8x128xf32>
    %c5 = arith.constant 5 : index
    %c0_261 = arith.constant 0 : index
    %c0_262 = arith.constant 0 : index
    %723 = vector.load %arg18[%c5, %c0_261, %c0_262] : memref<6x8x128xf32, #tpu.memory_space<vmem>>, vector<1x8x128xf32>
    %724 = vector.shape_cast %723 : vector<1x8x128xf32> to vector<8x128xf32>
    %725 = vector.shape_cast %722 : vector<8x128xf32> to vector<1x8x128xf32>
    tpu.vector_store %arg18[%c5, %c0_261, %c0_262], %725 {strides = array<i32>} : memref<6x8x128xf32, #tpu.memory_space<vmem>>, vector<1x8x128xf32>,
    return
  }
}

</mosaic_0001>

<bundles_post_ra>
// kernel: seq2seq_forward.1
= control target key start
LH: loop header
LB: loop body
LE: loop exit
PB: predicated region body
PF: predicated region fallthrough
CT: control target
= control target key end

     0   :  { %s8376_s0 = inlined_call_operand.vmem [shape: s32[64,1], index: 0, kind: input, shape index: {}]   ;;  %s8377_s1 = inlined_call_operand.vmem [shape: f32[8,128], index: 1, kind: input, shape index: {}]   ;;  %s8378_s2 = inlined_call_operand.vmem [shape: f32[13,128], index: 2, kind: input, shape index: {}]   ;;  %s8379_s3 = inlined_call_operand.vmem [shape: f32[32,128], index: 3, kind: input, shape index: {}]   ;;  %s8380_s4 = inlined_call_operand.vmem [shape: f32[1,128], index: 4, kind: input, shape index: {}]   ;;  %s8381_s5 = inlined_call_operand.hbm [shape: f32[32,128], index: 5, kind: input, shape index: {}]   ;;  %s8382_s6 = inlined_call_operand.hbm [shape: f32[32,128], index: 6, kind: input, shape index: {}]   ;;  %s8383_s7 = inlined_call_operand.hbm [shape: f32[1,128], index: 7, kind: input, shape index: {}]   ;;  %s8384_s8 = inlined_call_operand.vmem [shape: f32[128,128], index: 8, kind: input, shape index: {}]   ;;  %s8385_s9 = inlined_call_operand.hbm [shape: f32[32,128], index: 9, kind: input, shape index: {}]   ;;  %s8386_s10 = inlined_call_operand.hbm [shape: f32[32,128], index: 10, kind: input, shape index: {}]   ;;  %s8387_s11 = inlined_call_operand.hbm [shape: f32[1,128], index: 11, kind: input, shape index: {}]   ;;  %s8388_s12 = inlined_call_operand.hbm [shape: f32[32,128], index: 12, kind: input, shape index: {}]   ;;  %s8389_s13 = inlined_call_operand.hbm [shape: f32[32,128], index: 13, kind: input, shape index: {}]   ;;  %s8390_s14 = inlined_call_operand.hbm [shape: f32[1,128], index: 14, kind: input, shape index: {}]   ;;  %s8391_s15 = inlined_call_operand.hbm [shape: f32[32,128], index: 15, kind: input, shape index: {}]   ;;  %s8392_s16 = inlined_call_operand.hbm [shape: f32[32,128], index: 16, kind: input, shape index: {}]   ;;  %s8393_s17 = inlined_call_operand.vmem [shape: f32[1,128], index: 17, kind: input, shape index: {}]   ;;  %s8394_s18 = inlined_call_operand.vmem [shape: f32[6,8,128], index: 18, kind: output, shape index: {}]  }
   0x1   :  { %8397 = sst [smem:[#allocation25_spill]] %s8376_s0 }
   0x2   :  { %8398 = sst [smem:[#allocation26_spill]] %s8377_s1 }
   0x3   :  { %8399 = sst [smem:[#allocation27_spill]] %s8378_s2 }
   0x4   :  { %23 = vsyncpa [#allocation3], 0 }
   0x5   :  { %24 = vsyncpa [#allocation5], 0 }
   0x6   :  { %25 = vsyncpa [#allocation8], 0 }
   0x7   :  { %26 = vsyncpa [#allocation11], 0 }
   0x8   :  { %27 = vsyncpa [#allocation14], 0 }
   0x9   :  { %28 = vsyncpa [#allocation17], 0  ;;  %s7137_s27 = smov [#allocation4]   ;;  %s7138_s29 = smov [#allocation7]  }
   0xa   :  { %s56_s28 = sshll.u32 %s7137_s27, 4  ;;  %s80_s30 = sshll.u32 %s7138_s29, 4  ;;  %s57_s28 = int_to_ptr.vmem [resolvable:$true] %s56_s28  ;;  %s7253_s30 = int_to_ptr.vmem [resolvable:$true] %s80_s30 }
   0xb   :  { %s6883_s1 = scalar_lea.hbm %s8382_s6, 512 }
   0xc   :  { %p6884_p0 = scmp.ne.s32.totalorder %s8382_s6, %s6883_s1  ;;  %p6887_p1 = scmp.lt.u32.totalorder %s6883_s1, %s8382_s6 }
   0xe   :  { %p6889_p2 = pnand %p6887_p1, %p6884_p0 }
  0x10   :  { %6892 = shalt.err (!%p6889_p2)
}
  0x11   :  { %s6893_s23 = scalar_lea.vmem %s57_s28, 512  ;;  %p6898_p4 = scmp.lt.s32.totalorder %s57_s28, %s57_s28 }
  0x12   :  { %p6894_p3 = scmp.ne.s32.totalorder %s57_s28, %s6893_s23  ;;  %p6899_p5 = scmp.lt.s32.totalorder %s6893_s23, %s6893_s23 }
  0x14   :  { %p6900_p6 = por %p6899_p5, %p6898_p4 }
  0x16   :  { %p6901_p7 = pnand %p6900_p6, %p6894_p3 }
  0x18   :  { %6904 = shalt.err (!%p6901_p7)
}
  0x19   :  { %s7139_s24 = smov 128   ;;  %s7140_s25 = smov 8  }
  0x1a   :  { %62 = dma.hbm_to_vmem [thread:$0]  %s8382_s6, 512, %s57_s28, [#allocation5], %s7139_s24, %s7139_s24, %s7140_s25  }
  0x1b   :  { %s6905_s19 = scalar_lea.hbm %s8385_s9, 512 }
  0x1c   :  { %p6906_p8 = scmp.ne.s32.totalorder %s8385_s9, %s6905_s19  ;;  %p6909_p9 = scmp.lt.u32.totalorder %s6905_s19, %s8385_s9 }
  0x1e   :  { %p6911_p10 = pnand %p6909_p9, %p6906_p8 }
  0x20   :  { %6914 = shalt.err (!%p6911_p10)
}
  0x21   :  { %s6915_s2 = scalar_lea.vmem %s7253_s30, 512  ;;  %p6920_p12 = scmp.lt.s32.totalorder %s7253_s30, %s7253_s30 }
  0x22   :  { %p6916_p11 = scmp.ne.s32.totalorder %s7253_s30, %s6915_s2  ;;  %p6921_p13 = scmp.lt.s32.totalorder %s6915_s2, %s6915_s2 }
  0x24   :  { %p6922_p0 = por %p6921_p13, %p6920_p12 }
  0x26   :  { %p6923_p1 = pnand %p6922_p0, %p6916_p11 }
  0x28   :  { %6926 = shalt.err (!%p6923_p1)
}
  0x29   :  { %86 = dma.hbm_to_vmem [thread:$0]  %s8385_s9, 512, %s7253_s30, [#allocation8], %s7139_s24, %s7139_s24, %s7140_s25  }
  0x2a   :  { %s7141_s23 = smov [#allocation10]   ;;  %s7142_s27 = smov [#allocation13]  }
  0x2b   :  { %s105_s26 = sshll.u32 %s7141_s23, 4  ;;  %s126_s29 = sshll.u32 %s7142_s27, 4  ;;  %s106_s26 = int_to_ptr.vmem [resolvable:$true] %s105_s26  ;;  %s7290_s29 = int_to_ptr.vmem [resolvable:$true] %s126_s29 }
  0x2c   :  { %s6927_s1 = scalar_lea.hbm %s8387_s11, 16 }
  0x2d   :  { %p6928_p2 = scmp.ne.s32.totalorder %s8387_s11, %s6927_s1  ;;  %p6931_p3 = scmp.lt.u32.totalorder %s6927_s1, %s8387_s11 }
  0x2f   :  { %p6933_p4 = pnand %p6931_p3, %p6928_p2 }
  0x31   :  { %6936 = shalt.err (!%p6933_p4)
}
  0x32   :  { %s6937_s9 = scalar_lea.vmem %s106_s26, 16  ;;  %s6941_s30 = scalar_lea.vmem %s106_s26, 32 }
  0x33   :  { %p6938_p5 = scmp.ne.s32.totalorder %s106_s26, %s6937_s9  ;;  %p6942_p6 = scmp.lt.s32.totalorder %s106_s26, %s106_s26 }
  0x34   :  { %p6943_p7 = scmp.lt.s32.totalorder %s6941_s30, %s6937_s9 }
  0x36   :  { %p6944_p8 = por %p6943_p7, %p6942_p6 }
  0x38   :  { %p6945_p9 = pnand %p6944_p8, %p6938_p5 }
  0x3a   :  { %6948 = shalt.err (!%p6945_p9)
}
  0x3b   :  { %108 = dma.hbm_to_vmem [thread:$0]  %s8387_s11, 16, %s106_s26, [#allocation11]  }
  0x3c   :  { %s6949_s0 = scalar_lea.hbm %s8389_s13, 512 }
  0x3d   :  { %p6950_p10 = scmp.ne.s32.totalorder %s8389_s13, %s6949_s0  ;;  %p6953_p11 = scmp.lt.u32.totalorder %s6949_s0, %s8389_s13 }
  0x3f   :  { %p6955_p12 = pnand %p6953_p11, %p6950_p10 }
  0x41   :  { %6958 = shalt.err (!%p6955_p12)
}
  0x42   :  { %s6959_s22 = scalar_lea.vmem %s7290_s29, 512  ;;  %p6964_p0 = scmp.lt.s32.totalorder %s7290_s29, %s7290_s29 }
  0x43   :  { %p6960_p13 = scmp.ne.s32.totalorder %s7290_s29, %s6959_s22  ;;  %p6965_p1 = scmp.lt.s32.totalorder %s6959_s22, %s6959_s22 }
  0x45   :  { %p6966_p2 = por %p6965_p1, %p6964_p0 }
  0x47   :  { %p6967_p3 = pnand %p6966_p2, %p6960_p13 }
  0x49   :  { %6970 = shalt.err (!%p6967_p3)
}
  0x4a   :  { %132 = dma.hbm_to_vmem [thread:$0]  %s8389_s13, 512, %s7290_s29, [#allocation14], %s7139_s24, %s7139_s24, %s7140_s25  }
  0x4b   :  { %s7143_s2 = smov [#allocation16]   ;;  %s7144_s30 = smov [#allocation2]  }
  0x4c   :  { %s148_s9 = sshll.u32 %s7143_s2, 4  ;;  %s44_s6 = sshll.u32 %s7144_s30, 4  ;;  %s149_s9 = int_to_ptr.vmem [resolvable:$true] %s148_s9  ;;  %s7324_s6 = int_to_ptr.vmem [resolvable:$true] %s44_s6 }
  0x4d   :  { %s6971_s27 = scalar_lea.hbm %s8391_s15, 512 }
  0x4e   :  { %p6972_p4 = scmp.ne.s32.totalorder %s8391_s15, %s6971_s27  ;;  %p6975_p5 = scmp.lt.u32.totalorder %s6971_s27, %s8391_s15 }
  0x50   :  { %p6977_p6 = pnand %p6975_p5, %p6972_p4 }
  0x52   :  { %6980 = shalt.err (!%p6977_p6)
}
  0x53   :  { %s6981_s13 = scalar_lea.vmem %s149_s9, 512  ;;  %p6986_p8 = scmp.lt.s32.totalorder %s149_s9, %s149_s9 }
  0x54   :  { %p6982_p7 = scmp.ne.s32.totalorder %s149_s9, %s6981_s13  ;;  %p6987_p9 = scmp.lt.s32.totalorder %s6981_s13, %s6981_s13 }
  0x56   :  { %p6988_p10 = por %p6987_p9, %p6986_p8 }
  0x58   :  { %p6989_p11 = pnand %p6988_p10, %p6982_p7 }
  0x5a   :  { %6992 = shalt.err (!%p6989_p11)
}
  0x5b   :  { %154 = dma.hbm_to_vmem [thread:$0]  %s8391_s15, 512, %s149_s9, [#allocation17], %s7139_s24, %s7139_s24, %s7140_s25  }
  0x5c   :  { %s6993_s26 = scalar_lea.hbm %s8381_s5, 512 }
  0x5d   :  { %p6994_p12 = scmp.ne.s32.totalorder %s8381_s5, %s6993_s26  ;;  %p6997_p13 = scmp.lt.u32.totalorder %s6993_s26, %s8381_s5 }
  0x5f   :  { %p6999_p0 = pnand %p6997_p13, %p6994_p12 }
  0x61   :  { %7002 = shalt.err (!%p6999_p0)
}
  0x62   :  { %s7003_s27 = scalar_lea.vmem %s7324_s6, 512  ;;  %p7008_p2 = scmp.lt.s32.totalorder %s7324_s6, %s7324_s6 }
  0x63   :  { %p7004_p1 = scmp.ne.s32.totalorder %s7324_s6, %s7003_s27  ;;  %p7009_p3 = scmp.lt.s32.totalorder %s7003_s27, %s7003_s27 }
  0x65   :  { %p7010_p4 = por %p7009_p3, %p7008_p2 }
  0x67   :  { %p7011_p5 = pnand %p7010_p4, %p7004_p1 }
  0x69   :  { %7014 = shalt.err (!%p7011_p5)
}
  0x6a   :  { %50 = dma.hbm_to_vmem [thread:$0]  %s8381_s5, 512, %s7324_s6, [#allocation3], %s7139_s24, %s7139_s24, %s7140_s25  }
  0x6b   :  { %s7145_s0 = smov [#allocation6]   ;;  %s7146_s1 = smov [#allocation9]  }
  0x6c   :  { %s69_s19 = sshll.u32 %s7145_s0, 4  ;;  %s92_s20 = sshll.u32 %s7146_s1, 4  ;;  %s70_s19 = int_to_ptr.vmem [resolvable:$true] %s69_s19  ;;  %s7361_s20 = int_to_ptr.vmem [resolvable:$true] %s92_s20 }
  0x6d   :  { %s7015_s21 = scalar_lea.hbm %s8383_s7, 16 }
  0x6e   :  { %p7016_p6 = scmp.ne.s32.totalorder %s8383_s7, %s7015_s21  ;;  %p7019_p7 = scmp.lt.u32.totalorder %s7015_s21, %s8383_s7 }
  0x70   :  { %p7021_p8 = pnand %p7019_p7, %p7016_p6 }
  0x72   :  { %7024 = shalt.err (!%p7021_p8)
}
  0x73   :  { %s7025_s5 = scalar_lea.vmem %s70_s19, 16  ;;  %s7029_s6 = scalar_lea.vmem %s70_s19, 32 }
  0x74   :  { %p7026_p9 = scmp.ne.s32.totalorder %s70_s19, %s7025_s5  ;;  %p7030_p10 = scmp.lt.s32.totalorder %s70_s19, %s70_s19 }
  0x75   :  { %p7031_p11 = scmp.lt.s32.totalorder %s7029_s6, %s7025_s5 }
  0x77   :  { %p7032_p12 = por %p7031_p11, %p7030_p10 }
  0x79   :  { %p7033_p13 = pnand %p7032_p12, %p7026_p9 }
  0x7b   :  { %7036 = shalt.err (!%p7033_p13)
}
  0x7c   :  { %72 = dma.hbm_to_vmem [thread:$0]  %s8383_s7, 16, %s70_s19, [#allocation5]  }
  0x7d   :  { %s7037_s15 = scalar_lea.hbm %s8386_s10, 512 }
  0x7e   :  { %p7038_p0 = scmp.ne.s32.totalorder %s8386_s10, %s7037_s15  ;;  %p7041_p1 = scmp.lt.u32.totalorder %s7037_s15, %s8386_s10 }
  0x80   :  { %p7043_p2 = pnand %p7041_p1, %p7038_p0 }
  0x82   :  { %7046 = shalt.err (!%p7043_p2)
}
  0x83   :  { %s7047_s29 = scalar_lea.vmem %s7361_s20, 512  ;;  %p7052_p4 = scmp.lt.s32.totalorder %s7361_s20, %s7361_s20 }
  0x84   :  { %p7048_p3 = scmp.ne.s32.totalorder %s7361_s20, %s7047_s29  ;;  %p7053_p5 = scmp.lt.s32.totalorder %s7047_s29, %s7047_s29 }
  0x86   :  { %p7054_p6 = por %p7053_p5, %p7052_p4 }
  0x88   :  { %p7055_p7 = pnand %p7054_p6, %p7048_p3 }
  0x8a   :  { %7058 = shalt.err (!%p7055_p7)
}
  0x8b   :  { %98 = dma.hbm_to_vmem [thread:$0]  %s8386_s10, 512, %s7361_s20, [#allocation8], %s7139_s24, %s7139_s24, %s7140_s25  }
  0x8c   :  { %s7147_s21 = smov [#allocation12]   ;;  %s7148_s11 = smov [#allocation15]  }
  0x8d   :  { %s114_s22 = sshll.u32 %s7147_s21, 4  ;;  %s139_s26 = sshll.u32 %s7148_s11, 4  ;;  %s115_s22 = int_to_ptr.vmem [resolvable:$true] %s114_s22  ;;  %s140_s26 = int_to_ptr.vmem [resolvable:$true] %s139_s26 }
  0x8e   :  { %s7059_s6 = scalar_lea.hbm %s8388_s12, 512 }
  0x8f   :  { %p7060_p8 = scmp.ne.s32.totalorder %s8388_s12, %s7059_s6  ;;  %p7063_p9 = scmp.lt.u32.totalorder %s7059_s6, %s8388_s12 }
  0x91   :  { %p7065_p10 = pnand %p7063_p9, %p7060_p8 }
  0x93   :  { %7068 = shalt.err (!%p7065_p10)
}
  0x94   :  { %s7069_s10 = scalar_lea.vmem %s115_s22, 512  ;;  %p7074_p12 = scmp.lt.s32.totalorder %s115_s22, %s115_s22 }
  0x95   :  { %p7070_p11 = scmp.ne.s32.totalorder %s115_s22, %s7069_s10  ;;  %p7075_p13 = scmp.lt.s32.totalorder %s7069_s10, %s7069_s10 }
  0x97   :  { %p7076_p0 = por %p7075_p13, %p7074_p12 }
  0x99   :  { %p7077_p1 = pnand %p7076_p0, %p7070_p11 }
  0x9b   :  { %7080 = shalt.err (!%p7077_p1)
}
  0x9c   :  { %120 = dma.hbm_to_vmem [thread:$0]  %s8388_s12, 512, %s115_s22, [#allocation11], %s7139_s24, %s7139_s24, %s7140_s25  }
  0x9d   :  { %s7081_s1 = scalar_lea.hbm %s8390_s14, 16 }
  0x9e   :  { %p7082_p2 = scmp.ne.s32.totalorder %s8390_s14, %s7081_s1  ;;  %p7085_p3 = scmp.lt.u32.totalorder %s7081_s1, %s8390_s14 }
  0xa0   :  { %p7087_p4 = pnand %p7085_p3, %p7082_p2 }
  0xa2   :  { %7090 = shalt.err (!%p7087_p4)
}
  0xa3   :  { %s7091_s21 = scalar_lea.vmem %s140_s26, 16  ;;  %s7095_s11 = scalar_lea.vmem %s140_s26, 32 }
  0xa4   :  { %p7092_p5 = scmp.ne.s32.totalorder %s140_s26, %s7091_s21  ;;  %p7096_p6 = scmp.lt.s32.totalorder %s140_s26, %s140_s26 }
  0xa5   :  { %p7097_p7 = scmp.lt.s32.totalorder %s7095_s11, %s7091_s21 }
  0xa7   :  { %p7098_p8 = por %p7097_p7, %p7096_p6 }
  0xa9   :  { %p7099_p9 = pnand %p7098_p8, %p7092_p5 }
  0xab   :  { %7102 = shalt.err (!%p7099_p9)
}
  0xac   :  { %142 = dma.hbm_to_vmem [thread:$0]  %s8390_s14, 16, %s140_s26, [#allocation14]  }
  0xad   :  { %s7149_s2 = smov [#allocation18]   ;;  %s7103_s28 = scalar_lea.hbm %s8392_s16, 512 }
  0xae   :  { %s160_s5 = sshll.u32 %s7149_s2, 4  ;;  %p7104_p10 = scmp.ne.s32.totalorder %s8392_s16, %s7103_s28  ;;  %s161_s5 = int_to_ptr.vmem [resolvable:$true] %s160_s5 }
  0xaf   :  { %p7107_p11 = scmp.lt.u32.totalorder %s7103_s28, %s8392_s16 }
  0xb1   :  { %p7109_p12 = pnand %p7107_p11, %p7104_p10 }
  0xb3   :  { %7112 = shalt.err (!%p7109_p12)
}
  0xb4   :  { %s7113_s15 = scalar_lea.vmem %s161_s5, 512  ;;  %p7118_p0 = scmp.lt.s32.totalorder %s161_s5, %s161_s5 }
  0xb5   :  { %p7114_p13 = scmp.ne.s32.totalorder %s161_s5, %s7113_s15  ;;  %p7119_p1 = scmp.lt.s32.totalorder %s7113_s15, %s7113_s15 }
  0xb7   :  { %p7120_p2 = por %p7119_p1, %p7118_p0 }
  0xb9   :  { %p7121_p3 = pnand %p7120_p2, %p7114_p13 }
  0xbb   :  { %7124 = shalt.err (!%p7121_p3)
}
  0xbc   :  { %166 = dma.hbm_to_vmem [thread:$0]  %s8392_s16, 512, %s161_s5, [#allocation17], %s7139_s24, %s7139_s24, %s7140_s25  }
  0xbd   :  { %7125 = dma.done.wait [#allocation3], 512  }
  0xbe   :  { %7126 = vsyncadd [#allocation3], 4294966784 }
  0xbf   :  { %7127 = dma.done.wait [#allocation5], 528  }
  0xc0   :  { %7128 = vsyncadd [#allocation5], 4294966768 }
  0xc1   :  { %7129 = dma.done.wait [#allocation8], 1024  }
  0xc2   :  { %7130 = vsyncadd [#allocation8], 4294966272 }
  0xc3   :  { %7131 = dma.done.wait [#allocation11], 528  }
  0xc4   :  { %7132 = vsyncadd [#allocation11], 4294966768 }
  0xc5   :  { %7133 = dma.done.wait [#allocation14], 528  }
  0xc6   :  { %7134 = vsyncadd [#allocation14], 4294966768 }
  0xc7   :  { %7135 = dma.done.wait [#allocation17], 1024  }
  0xc8   :  { %7136 = vsyncadd [#allocation17], 4294966272  ;;  %v7150_v0 = vmov 0.0   ;;  %v7151_v1 = vmov 0   ;;  %v7152_v2 = vmov 0.0|0.0   ;;  %s8400_s25 = sld [smem:[#allocation25_spill]]  ;;  %v202_v14 = vlaneseq }
  0xc9   :  { %2756 = vst [vmem:[%s8394_s18] sm:$0xff] %v7150_v0  ;;  %6670 = vset.pattern.permute.xlu0 %v7151_v1  ;;  %6253 = vmatprep.subr.bf16.mxu1 %v7152_v2  ;;  %v396_v5 = vld [vmem:[%s8379_s3] sm:$0xff]  ;;  %vm287_vm0 = vcmask 1044480   ;;  %v397_v6 = vld [vmem:[%s8379_s3 + $0x8] sm:$0xff]  ;;  %s8401_s22 = sld [smem:[#allocation27_spill]]  ;;  %vm7153_vm1 = vmmov 1   ;;  %v398_v11 = vld [vmem:[%s8379_s3 + $0x10] sm:$0xff] }
  0xca   :  { %6671 = vset.pattern.permute.xlu1 %v7151_v1  ;;  %v7460_v9 = vpack.c.bf16 %v397_v6, %v396_v5  ;;  %vm6248_vm2 = vmpackc.low %vm287_vm0, %vm7153_vm1  ;;  %v399_v12 = vld [vmem:[%s8379_s3 + $0x18] sm:$0xff]  ;;  %vm7154_vm3 = vmmov 0   ;;  %v7480_v15 = vand.u32 127, %v202_v14  ;;  %vm262_vm4 = vcmask 105472   ;;  %v7493_v24 = vld [vmem:[%s8380_s4] ss:$0 sm:$0xff] }
  0xcb   :  { %v7469_v13 = vpack.c.bf16 %v399_v12, %v398_v11  ;;  %5574 = vmatprep.mubr.msk.f32.mxu1 %vm7154_vm3, %v7150_v0  ;;  %s7155_s10 = smov 32   ;;  %v507_v46 = vld [vmem:[#allocation2] sm:$0xff]  ;;  %v508_v47 = vld [vmem:[#allocation2 + $0x8] sm:$0xff]  ;;  %v513_v51 = vld [vmem:[#allocation4 + $0x10] sm:$0xff]  ;;  %vm400_vm13 = vcmask 261120   ;;  %s8402_s3 = sld [smem:[#allocation26_spill]] }
  0xcc   :  { %6255 = vmatpush3.bf16.msra.mxu1 %v7460_v9  ;;  %v511_v48 = vld [vmem:[#allocation4] sm:$0xff]  ;;  %v7523_v49 = vpack.c.bf16 %v508_v47, %v507_v46  ;;  %v512_v50 = vld [vmem:[#allocation4 + $0x8] sm:$0xff]  ;;  %v514_v52 = vld [vmem:[#allocation4 + $0x18] sm:$0xff]  ;;  %vm2758_vm14 = vcmp.lt.s32.totalorder %v7480_v15, 11 }
  0xcd   :  { %6256 = vmatprep.subr.bf16.mxu1 %v7152_v2  ;;  %v7525_v53 = vpack.c.bf16 %v512_v50, %v511_v48  ;;  %v509_v54 = vld [vmem:[#allocation2 + $0x10] sm:$0xff]  ;;  %v510_v55 = vld [vmem:[#allocation2 + $0x18] sm:$0xff]  ;;  %v7531_v57 = vpack.c.bf16 %v514_v52, %v513_v51 }
  0xce   :  { %v204_v3 = vld [vmem:[%s8400_s25] sm:$0xff]  ;;  %v205_v4 = vld [vmem:[%s8400_s25 + $0x8] sm:$0xff]  ;;  %v206_v34 = vld [vmem:[%s8400_s25 + $0x10] sm:$0xff]  ;;  %v7528_v56 = vpack.c.bf16 %v510_v55, %v509_v54 }
  0xcf   :  { %213 = vperm.xlu0 %6670, %v204_v3   ;;  %v260_v7 = vld [vmem:[%s8401_s22] sm:$0xff]  ;;  %v261_v8 = vld [vmem:[%s8401_s22 + $0x8] sm:$0x1f]  ;;  %v210_v36 = vld [vmem:[%s8400_s25 + $0x30] sm:$0xff] }
  0xd0   :  { %v6247_v10 = vpack.c.bf16 %v261_v8, %v260_v7  ;;  %6258 = vmatpush3.bf16.msra.mxu1 %v7469_v13  ;;  %v208_v35 = vld [vmem:[%s8400_s25 + $0x20] sm:$0xff]  ;;  %v207_v41 = vld [vmem:[%s8400_s25 + $0x18] sm:$0xff]  ;;  %v209_v43 = vld [vmem:[%s8400_s25 + $0x28] sm:$0xff] }
  0xd1   :  { %6259 = vmatprep.subr.bf16.mxu1 %v7152_v2  ;;  %v211_v45 = vld [vmem:[%s8400_s25 + $0x38] sm:$0xff]  ;;  %s7156_s25 = smov 64  }
  0xd2   :  { %6249 = vmatprep.subr.msk.bf16.mxu0 %vm6248_vm2, %v6247_v10 }
  0xd3   :  { %216 = vperm.xlu0 %6670, %v205_v4   ;;  %6252 = vmatpush3.bf16.msk.msra.mxu0 %vm6248_vm2, %v6247_v10 }
  0xd4   :  { %6265 = vmatprep.subr.bf16.mxu0 %v7152_v2  ;;  %5575 = vmatmul.mubr.f32.vlgmr.msra.gmra.mrb[0].mxu1 %v7150_v0 }
  0xd5   :  { %5585 = vmatprep.mubr.msk.f32.mxu1 %vm7154_vm3, %v7150_v0  ;;  %6261 = vmatpush3.bf16.msra.mxu1 %v7525_v53 }
  0xd6   :  { %6262 = vmatprep.subr.bf16.mxu1 %v7152_v2 }
  0xd9   :  { %6264 = vmatpush3.bf16.msra.mxu1 %v7531_v57 }
  0xda   :  { %6271 = vmatprep.subr.bf16.mxu1 %v7152_v2 }
  0xdc   :  { %5586 = vmatmul.mubr.f32.vlgmr.msra.gmra.mrb[2].mxu1 %v7150_v0 }
  0xdd   :  { %6273 = vmatpush3.bf16.msra.mxu1 %v7460_v9  ;;  %5607 = vmatprep.mubr.msk.f32.mxu1 %vm7154_vm3, %v7150_v0 }
  0xde   :  { %6274 = vmatprep.subr.bf16.mxu1 %v7152_v2 }
  0xe1   :  { %6276 = vmatpush3.bf16.msra.mxu1 %v7469_v13 }
  0xe2   :  { %6283 = vmatprep.subr.bf16.mxu1 %v7152_v2 }
 0x14e   :  { %v214_v16 = vpop.permute.xlu0 %213 }
 0x14f   :  { %vm236_vm5 = vcmp.eq.s32.totalorder %v214_v16, %v7480_v15 }
 0x150   :  { %v5116_v17 = vsel %vm236_vm5, 1.0, %v7150_v0 }
 0x151   :  { %5554 = vmatprep.mubr.msk.f32.mxu0 %vm262_vm4, %v5116_v17 }
 0x152   :  { %v217_v18 = vpop.permute.xlu0 %216 }
 0x153   :  { %vm237_vm6 = vcmp.eq.s32.totalorder %v217_v18, %v7480_v15 }
 0x154   :  { %v5117_v19 = vsel %vm237_vm6, 1.0, %v7150_v0 }
 0x155   :  { %5555 = vmatmul.mubr.msk.f32.vlgmr.msra.gmra.mrb[0].mxu0 %vm262_vm4, %v5117_v19 }
 0x156   :  { %6267 = vmatpush3.bf16.msra.mxu0 %v7523_v49 }
 0x157   :  { %6268 = vmatprep.subr.bf16.mxu0 %v7152_v2 }
 0x15a   :  { %6270 = vmatpush3.bf16.msra.mxu0 %v7528_v56 }
 0x15b   :  { %6277 = vmatprep.subr.bf16.mxu0 %v7152_v2 }
 0x1a7   :  { %v470_v20 = vpop.f32.mrb[0].mxu1 }
 0x1a8   :  { %v5576_v21 = vpop.f32.mrb[1].mxu1 }
 0x1a9   :  { %v7590_v21 = vld [vmem:[#allocation6] ss:$0 sm:$0xff] }
 0x1af   :  { %v581_v10 = vpop.f32.mrb[2].mxu1 }
 0x1b0   :  { %v5587_v11 = vpop.f32.mrb[3].mxu1 }
 0x228   :  { %v7488_v22 = vpop.f32.mrb[0].mxu0 }
 0x229   :  { %v357_v23 = vpop.f32.mrb[1].mxu0 }
 0x22a   :  { %v474_v25 = vadd.f32 %v470_v20, %v357_v23 }
 0x22c   :  { %v482_v26 = vadd.f32 %v7493_v24, %v474_v25 }
 0x22e   :  { %6672 = vtanh.f32 %v482_v26  ;;  %v5134_v28 = vmul.f32 -1.442695, %v482_v26 }
 0x230   :  { %6674 = vpow2.f32 %v5134_v28 }
 0x238   :  { %v6673_v27 = vpop.eup %6672 }
 0x239   :  { %492 = vrot.lane.b32.xlu1 %v6673_v27, %s7155_s10 }
 0x23a   :  { %v6675_v29 = vpop.eup %6674 }
 0x23b   :  { %v486_v30 = vadd.f32 1.0, %v6675_v29 }
 0x23d   :  { %6676 = vrcp.f32 %v486_v30 }
 0x247   :  { %v6677_v31 = vpop.eup %6676 }
 0x248   :  { %v490_v37 = vmul.f32 0.0, %v6677_v31 }
 0x2ab   :  { %v493_v32 = vpop.permute.xlu1 %492 }
 0x2ac   :  { %v495_v33 = vmul.f32 %v6677_v31, %v493_v32 }
 0x2ae   :  { %497 = vrot.lane.b32.xlu1 %v495_v33, %s7155_s10 }
 0x2b2   :  { %219 = vperm.xlu1 %6671, %v206_v34  }
 0x2b6   :  { %225 = vperm.xlu1 %6671, %v208_v35  }
 0x2ba   :  { %231 = vperm.xlu1 %6671, %v210_v36  }
 0x320   :  { %v498_v38 = vpop.permute.xlu1 %497 }
 0x321   :  { %v7507_v39 = vadd.f32 %v498_v38, %v490_v37 }
 0x323   :  { %6678 = vtanh.f32 %v7507_v39 }
 0x32d   :  { %v6679_v40 = vpop.eup %6678 }
 0x32e   :  { %503 = vrot.lane.b32.xlu0 %v6679_v40, %s7155_s10 }
 0x331   :  { %v220_v42 = vpop.permute.xlu1 %219 }
 0x332   :  { %222 = vperm.xlu0 %6670, %v207_v41   ;;  %vm238_vm7 = vcmp.eq.s32.totalorder %v220_v42, %v7480_v15 }
 0x333   :  { %v5118_v44 = vsel %vm238_vm7, 1.0, %v7150_v0 }
 0x334   :  { %5557 = vmatprep.mubr.msk.f32.mxu0 %vm262_vm4, %v5118_v44 }
 0x335   :  { %v226_v60 = vpop.permute.xlu1 %225 }
 0x336   :  { %228 = vperm.xlu0 %6670, %v209_v43   ;;  %vm240_vm8 = vcmp.eq.s32.totalorder %v226_v60, %v7480_v15 }
 0x337   :  { %v5120_v63 = vsel %vm240_vm8, 1.0, %v7150_v0 }
 0x339   :  { %v232_v61 = vpop.permute.xlu1 %231 }
 0x33a   :  { %234 = vperm.xlu0 %6670, %v211_v45   ;;  %vm242_vm10 = vcmp.eq.s32.totalorder %v232_v61, %v7480_v15 }
 0x33b   :  { %v5122_v4 = vsel %vm242_vm10, 1.0, %v7150_v0 }
 0x3a0   :  { %v504_v58 = vpop.permute.xlu0 %503 }
 0x3a1   :  { %v506_v59 = vmul.f32 %v6677_v31, %v504_v58 }
 0x3a3   :  { %586 = vrot.lane.b32.xlu1 %v506_v59, %s7156_s25 }
 0x3b1   :  { %v223_v62 = vpop.permute.xlu0 %222 }
 0x3b2   :  { %vm239_vm9 = vcmp.eq.s32.totalorder %v223_v62, %v7480_v15 }
 0x3b3   :  { %v5119_v1 = vsel %vm239_vm9, 1.0, %v7150_v0 }
 0x3b4   :  { %5558 = vmatmul.mubr.msk.f32.gmra.mrb[2].mxu0 %vm262_vm4, %v5119_v1 }
 0x3b5   :  { %v229_v3 = vpop.permute.xlu0 %228  ;;  %5560 = vmatprep.mubr.msk.f32.mxu0 %vm262_vm4, %v5120_v63 }
 0x3b6   :  { %vm241_vm11 = vcmp.eq.s32.totalorder %v229_v3, %v7480_v15 }
 0x3b7   :  { %v5121_v5 = vsel %vm241_vm11, 1.0, %v7150_v0 }
 0x3b8   :  { %5561 = vmatmul.mubr.msk.f32.gmra.mrb[4].mxu0 %vm262_vm4, %v5121_v5 }
 0x3b9   :  { %v235_v6 = vpop.permute.xlu0 %234  ;;  %5563 = vmatprep.mubr.msk.f32.mxu0 %vm262_vm4, %v5122_v4 }
 0x3ba   :  { %vm243_vm12 = vcmp.eq.s32.totalorder %v235_v6, %v7480_v15 }
 0x3bb   :  { %v5123_v7 = vsel %vm243_vm12, 1.0, %v7150_v0 }
 0x3bc   :  { %5564 = vmatmul.mubr.msk.f32.gmra.mrb[6].mxu0 %vm262_vm4, %v5123_v7 }
 0x3bd   :  { %5596 = vmatprep.mubr.msk.f32.mxu0 %vm7154_vm3, %v7150_v0 }
 0x415   :  { %v587_v8 = vpop.permute.xlu1 %586 }
 0x416   :  { %5597 = vmatmul.mubr.msk.f32.vlgmr.msra.gmra.mrb[8].mxu0 %vm400_vm13, %v587_v8  ;;  %5608 = vmatmul.mubr.msk.f32.vlgmr.msra.gmra.mrb[4].mxu1 %vm400_vm13, %v587_v8 }
 0x417   :  { %6279 = vmatpush3.bf16.msra.mxu0 %v7525_v53  ;;  %6285 = vmatpush3.bf16.msra.mxu1 %v7523_v49 }
 0x418   :  { %6280 = vmatprep.subr.bf16.mxu0 %v7152_v2  ;;  %6286 = vmatprep.subr.bf16.mxu1 %v7152_v2 }
 0x419   :  { %5629 = vmatprep.mubr.msk.f32.mxu1 %vm7154_vm3, %v7150_v0  ;;  %5618 = vmatprep.mubr.msk.f32.mxu0 %vm7154_vm3, %v7150_v0 }
 0x41b   :  { %6282 = vmatpush3.bf16.msra.mxu0 %v7531_v57  ;;  %6288 = vmatpush3.bf16.msra.mxu1 %v7528_v56 }
 0x41c   :  { %6289 = vmatprep.subr.bf16.mxu0 %v7152_v2  ;;  %6295 = vmatprep.subr.bf16.mxu1 %v7152_v2 }
 0x487   :  { %v7578_v12 = vpop.f32.mrb[2].mxu0 }
 0x488   :  { %v7580_v14 = vpop.f32.mrb[3].mxu0 }
 0x48b   :  { %v7582_v16 = vpop.f32.mrb[4].mxu0 }
 0x48c   :  { %v7584_v17 = vpop.f32.mrb[5].mxu0 }
 0x48f   :  { %v7586_v18 = vpop.f32.mrb[6].mxu0 }
 0x490   :  { %v7588_v19 = vpop.f32.mrb[7].mxu0 }
 0x4e9   :  { %v656_v20 = vpop.f32.mrb[8].mxu0  ;;  %v758_v23 = vpop.f32.mrb[4].mxu1 }
 0x4ea   :  { %v657_v25 = vadd.f32 %v656_v20, %v581_v10  ;;  %v762_v26 = vadd.f32 %v7488_v22, %v758_v23  ;;  %v5598_v27 = vpop.f32.mrb[9].mxu0  ;;  %v5609_v28 = vpop.f32.mrb[5].mxu1 }
 0x4ec   :  { %v667_v29 = vadd.f32 %v7590_v21, %v657_v25  ;;  %v763_v30 = vadd.f32 %v7493_v24, %v762_v26 }
 0x4ee   :  { %6680 = vtanh.f32 %v667_v29  ;;  %v5137_v33 = vmul.f32 -1.442695, %v667_v29  ;;  %v5139_v34 = vmul.f32 -1.442695, %v763_v30 }
 0x4ef   :  { %6682 = vtanh.f32 %v763_v30 }
 0x4f0   :  { %6684 = vpow2.f32 %v5137_v33 }
 0x4f1   :  { %6686 = vpow2.f32 %v5139_v34 }
 0x4f8   :  { %v6681_v31 = vpop.eup %6680 }
 0x4f9   :  { %v6683_v32 = vpop.eup %6682  ;;  %677 = vrot.lane.b32.xlu0 %v6681_v31, %s7155_s10 }
 0x4fa   :  { %773 = vrot.lane.b32.xlu1 %v6683_v32, %s7155_s10  ;;  %v6685_v35 = vpop.eup %6684 }
 0x4fb   :  { %v6687_v22 = vpop.eup %6686  ;;  %v671_v36 = vadd.f32 1.0, %v6685_v35 }
 0x4fc   :  { %v767_v37 = vadd.f32 1.0, %v6687_v22 }
 0x4fd   :  { %6688 = vrcp.f32 %v671_v36 }
 0x4fe   :  { %6690 = vrcp.f32 %v767_v37 }
 0x507   :  { %v6689_v38 = vpop.eup %6688 }
 0x508   :  { %v6691_v41 = vpop.eup %6690  ;;  %v675_v45 = vmul.f32 0.0, %v6689_v38 }
 0x509   :  { %v771_v46 = vmul.f32 %v6691_v41, %v7507_v39 }
 0x56b   :  { %v678_v40 = vpop.permute.xlu0 %677 }
 0x56c   :  { %v774_v42 = vpop.permute.xlu1 %773  ;;  %v680_v43 = vmul.f32 %v6689_v38, %v678_v40 }
 0x56d   :  { %v776_v44 = vmul.f32 %v6691_v41, %v774_v42 }
 0x56e   :  { %682 = vrot.lane.b32.xlu0 %v680_v43, %s7155_s10 }
 0x56f   :  { %778 = vrot.lane.b32.xlu1 %v776_v44, %s7155_s10 }
 0x5e0   :  { %v683_v47 = vpop.permute.xlu0 %682 }
 0x5e1   :  { %v779_v48 = vpop.permute.xlu1 %778  ;;  %v7600_v50 = vadd.f32 %v683_v47, %v675_v45 }
 0x5e2   :  { %v7602_v51 = vadd.f32 %v779_v48, %v771_v46 }
 0x5e3   :  { %6692 = vtanh.f32 %v7600_v50 }
 0x5e4   :  { %6694 = vtanh.f32 %v7602_v51 }
 0x5ed   :  { %v6693_v52 = vpop.eup %6692 }
 0x5ee   :  { %v6695_v54 = vpop.eup %6694  ;;  %688 = vrot.lane.b32.xlu0 %v6693_v52, %s7155_s10 }
 0x5ef   :  { %784 = vrot.lane.b32.xlu1 %v6695_v54, %s7155_s10 }
 0x660   :  { %v689_v55 = vpop.permute.xlu0 %688 }
 0x661   :  { %v785_v58 = vpop.permute.xlu1 %784  ;;  %v691_v59 = vmul.f32 %v6689_v38, %v689_v55 }
 0x662   :  { %v787_v39 = vmul.f32 %v6691_v41, %v785_v58 }
 0x663   :  { %789 = vrot.lane.b32.xlu0 %v691_v59, %s7156_s25 }
 0x664   :  { %864 = vrot.lane.b32.xlu1 %v787_v39, %s7156_s25 }
 0x6d5   :  { %v790_v60 = vpop.permute.xlu0 %789 }
 0x6d6   :  { %v865_v61 = vpop.permute.xlu1 %864  ;;  %5619 = vmatmul.mubr.msk.f32.vlgmr.msra.gmra.mrb[10].mxu0 %vm400_vm13, %v790_v60 }
 0x6d7   :  { %5630 = vmatmul.mubr.msk.f32.vlgmr.msra.gmra.mrb[6].mxu1 %vm400_vm13, %v865_v61  ;;  %6291 = vmatpush3.bf16.msra.mxu0 %v7460_v9 }
 0x6d8   :  { %6292 = vmatprep.subr.bf16.mxu0 %v7152_v2  ;;  %5640 = vmatprep.mubr.msk.f32.mxu0 %vm7154_vm3, %v7150_v0 }
 0x6d9   :  { %6297 = vmatpush3.bf16.msra.mxu1 %v7525_v53  ;;  %5651 = vmatprep.mubr.msk.f32.mxu1 %vm7154_vm3, %v7150_v0 }
 0x6da   :  { %6298 = vmatprep.subr.bf16.mxu1 %v7152_v2 }
 0x6db   :  { %6294 = vmatpush3.bf16.msra.mxu0 %v7469_v13 }
 0x6dc   :  { %6301 = vmatprep.subr.bf16.mxu0 %v7152_v2 }
 0x6dd   :  { %6300 = vmatpush3.bf16.msra.mxu1 %v7531_v57 }
 0x6de   :  { %5641 = vmatmul.mubr.msk.f32.vlgmr.msra.gmra.mrb[12].mxu0 %vm400_vm13, %v865_v61  ;;  %6307 = vmatprep.subr.bf16.mxu1 %v7152_v2 }
 0x6df   :  { %6303 = vmatpush3.bf16.msra.mxu0 %v7523_v49  ;;  %5662 = vmatprep.mubr.msk.f32.mxu0 %vm7154_vm3, %v7150_v0 }
 0x6e0   :  { %6304 = vmatprep.subr.bf16.mxu0 %v7152_v2 }
 0x6e3   :  { %6306 = vmatpush3.bf16.msra.mxu0 %v7528_v56 }
 0x6e4   :  { %6313 = vmatprep.subr.bf16.mxu0 %v7152_v2 }
 0x7a9   :  { %v859_v62 = vpop.f32.mrb[10].mxu0 }
 0x7aa   :  { %v934_v63 = vpop.f32.mrb[6].mxu1  ;;  %v5620_v1 = vpop.f32.mrb[11].mxu0 }
 0x7ab   :  { %v935_v3 = vadd.f32 %v934_v63, %v859_v62  ;;  %v5631_v4 = vpop.f32.mrb[7].mxu1 }
 0x7ad   :  { %v938_v5 = vadd.f32 %v7590_v21, %v935_v3 }
 0x7af   :  { %6696 = vtanh.f32 %v938_v5  ;;  %v5142_v23 = vmul.f32 -1.442695, %v938_v5 }
 0x7b1   :  { %v1029_v6 = vpop.f32.mrb[12].mxu0 }
 0x7b2   :  { %v1033_v7 = vadd.f32 %v1029_v6, %v7580_v14  ;;  %v5642_v8 = vpop.f32.mrb[13].mxu0 }
 0x7b4   :  { %v1034_v10 = vadd.f32 %v7493_v24, %v1033_v7 }
 0x7b6   :  { %6698 = vtanh.f32 %v1034_v10  ;;  %v5144_v25 = vmul.f32 -1.442695, %v1034_v10 }
 0x7b7   :  { %6700 = vpow2.f32 %v5142_v23 }
 0x7b8   :  { %6702 = vpow2.f32 %v5144_v25 }
 0x7b9   :  { %v6697_v11 = vpop.eup %6696 }
 0x7ba   :  { %948 = vrot.lane.b32.xlu0 %v6697_v11, %s7155_s10 }
 0x7c0   :  { %v6699_v20 = vpop.eup %6698 }
 0x7c1   :  { %1044 = vrot.lane.b32.xlu1 %v6699_v20, %s7155_s10  ;;  %v6701_v26 = vpop.eup %6700 }
 0x7c2   :  { %v942_v27 = vadd.f32 1.0, %v6701_v26  ;;  %v6703_v28 = vpop.eup %6702 }
 0x7c3   :  { %v1038_v29 = vadd.f32 1.0, %v6703_v28 }
 0x7c4   :  { %6704 = vrcp.f32 %v942_v27 }
 0x7c5   :  { %6706 = vrcp.f32 %v1038_v29 }
 0x7ce   :  { %v6705_v14 = vpop.eup %6704 }
 0x7cf   :  { %v6707_v32 = vpop.eup %6706  ;;  %v946_v35 = vmul.f32 %v6705_v14, %v7600_v50 }
 0x7d0   :  { %v1042_v37 = vmul.f32 %v6707_v32, %v7602_v51 }
 0x82c   :  { %v949_v30 = vpop.permute.xlu0 %948 }
 0x82d   :  { %v951_v31 = vmul.f32 %v6705_v14, %v949_v30 }
 0x82f   :  { %953 = vrot.lane.b32.xlu0 %v951_v31, %s7155_s10 }
 0x833   :  { %v1045_v33 = vpop.permute.xlu1 %1044 }
 0x834   :  { %v1047_v34 = vmul.f32 %v6707_v32, %v1045_v33 }
 0x836   :  { %1049 = vrot.lane.b32.xlu1 %v1047_v34, %s7155_s10 }
 0x8a1   :  { %v954_v22 = vpop.permute.xlu0 %953 }
 0x8a2   :  { %v7639_v36 = vadd.f32 %v954_v22, %v946_v35 }
 0x8a4   :  { %6708 = vtanh.f32 %v7639_v36 }
 0x8a8   :  { %v1050_v38 = vpop.permute.xlu1 %1049 }
 0x8a9   :  { %v7643_v40 = vadd.f32 %v1050_v38, %v1042_v37 }
 0x8ab   :  { %6710 = vtanh.f32 %v7643_v40 }
 0x8ae   :  { %v6709_v41 = vpop.eup %6708 }
 0x8af   :  { %959 = vrot.lane.b32.xlu0 %v6709_v41, %s7155_s10 }
 0x8b5   :  { %v6711_v42 = vpop.eup %6710 }
 0x8b6   :  { %1055 = vrot.lane.b32.xlu1 %v6711_v42, %s7155_s10 }
 0x921   :  { %v960_v43 = vpop.permute.xlu0 %959 }
 0x922   :  { %v962_v44 = vmul.f32 %v6705_v14, %v960_v43 }
 0x924   :  { %1060 = vrot.lane.b32.xlu0 %v962_v44, %s7156_s25 }
 0x928   :  { %v1056_v45 = vpop.permute.xlu1 %1055 }
 0x929   :  { %v1058_v46 = vmul.f32 %v6707_v32, %v1056_v45 }
 0x92b   :  { %1135 = vrot.lane.b32.xlu1 %v1058_v46, %s7156_s25 }
 0x996   :  { %v1061_v47 = vpop.permute.xlu0 %1060 }
 0x997   :  { %5652 = vmatmul.mubr.msk.f32.vlgmr.msra.gmra.mrb[8].mxu1 %vm400_vm13, %v1061_v47 }
 0x998   :  { %6309 = vmatpush3.bf16.msra.mxu1 %v7460_v9  ;;  %5673 = vmatprep.mubr.msk.f32.mxu1 %vm7154_vm3, %v7150_v0 }
 0x999   :  { %6310 = vmatprep.subr.bf16.mxu1 %v7152_v2 }
 0x99c   :  { %6312 = vmatpush3.bf16.msra.mxu1 %v7469_v13 }
 0x99d   :  { %v1136_v48 = vpop.permute.xlu1 %1135  ;;  %6319 = vmatprep.subr.bf16.mxu1 %v7152_v2 }
 0x99e   :  { %5663 = vmatmul.mubr.msk.f32.vlgmr.msra.gmra.mrb[14].mxu0 %vm400_vm13, %v1136_v48 }
 0x99f   :  { %5674 = vmatmul.mubr.msk.f32.vlgmr.msra.gmra.mrb[10].mxu1 %vm400_vm13, %v1136_v48  ;;  %6315 = vmatpush3.bf16.msra.mxu0 %v7525_v53 }
 0x9a0   :  { %6321 = vmatpush3.bf16.msra.mxu1 %v7523_v49  ;;  %6316 = vmatprep.subr.bf16.mxu0 %v7152_v2 }
 0x9a1   :  { %6322 = vmatprep.subr.bf16.mxu1 %v7152_v2  ;;  %5695 = vmatprep.mubr.msk.f32.mxu1 %vm7154_vm3, %v7150_v0 }
 0x9a2   :  { %5684 = vmatprep.mubr.msk.f32.mxu0 %vm7154_vm3, %v7150_v0 }
 0x9a3   :  { %6318 = vmatpush3.bf16.msra.mxu0 %v7531_v57 }
 0x9a4   :  { %6324 = vmatpush3.bf16.msra.mxu1 %v7528_v56  ;;  %6325 = vmatprep.subr.bf16.mxu0 %v7152_v2 }
 0x9a5   :  { %6331 = vmatprep.subr.bf16.mxu1 %v7152_v2 }
 0xa6a   :  { %v1130_v50 = vpop.f32.mrb[8].mxu1 }
 0xa6b   :  { %v5653_v51 = vpop.f32.mrb[9].mxu1 }
 0xa71   :  { %v1205_v52 = vpop.f32.mrb[14].mxu0 }
 0xa72   :  { %v1206_v54 = vadd.f32 %v1205_v52, %v1130_v50  ;;  %v1300_v55 = vpop.f32.mrb[10].mxu1  ;;  %v5664_v58 = vpop.f32.mrb[15].mxu0 }
 0xa73   :  { %v1304_v59 = vadd.f32 %v7578_v12, %v1300_v55  ;;  %v5675_v39 = vpop.f32.mrb[11].mxu1 }
 0xa74   :  { %v1209_v60 = vadd.f32 %v7590_v21, %v1206_v54 }
 0xa75   :  { %v1305_v61 = vadd.f32 %v7493_v24, %v1304_v59 }
 0xa76   :  { %6712 = vtanh.f32 %v1209_v60  ;;  %v5147_v1 = vmul.f32 -1.442695, %v1209_v60 }
 0xa77   :  { %6714 = vtanh.f32 %v1305_v61  ;;  %v5149_v3 = vmul.f32 -1.442695, %v1305_v61 }
 0xa78   :  { %6716 = vpow2.f32 %v5147_v1 }
 0xa79   :  { %6718 = vpow2.f32 %v5149_v3 }
 0xa80   :  { %v6713_v62 = vpop.eup %6712 }
 0xa81   :  { %v6715_v63 = vpop.eup %6714  ;;  %1219 = vrot.lane.b32.xlu0 %v6713_v62, %s7155_s10 }
 0xa82   :  { %1315 = vrot.lane.b32.xlu1 %v6715_v63, %s7155_s10  ;;  %v6717_v4 = vpop.eup %6716 }
 0xa83   :  { %v6719_v5 = vpop.eup %6718  ;;  %v1213_v12 = vadd.f32 1.0, %v6717_v4 }
 0xa84   :  { %v1309_v6 = vadd.f32 1.0, %v6719_v5 }
 0xa85   :  { %6720 = vrcp.f32 %v1213_v12 }
 0xa86   :  { %6722 = vrcp.f32 %v1309_v6 }
 0xa8f   :  { %v6721_v7 = vpop.eup %6720 }
 0xa90   :  { %v6723_v10 = vpop.eup %6722  ;;  %v1217_v25 = vmul.f32 %v6721_v7, %v7639_v36 }
 0xa91   :  { %v1313_v26 = vmul.f32 %v6723_v10, %v7643_v40 }
 0xaf3   :  { %v1220_v8 = vpop.permute.xlu0 %1219 }
 0xaf4   :  { %v1316_v11 = vpop.permute.xlu1 %1315  ;;  %v1222_v20 = vmul.f32 %v6721_v7, %v1220_v8 }
 0xaf5   :  { %v1318_v23 = vmul.f32 %v6723_v10, %v1316_v11 }
 0xaf6   :  { %1224 = vrot.lane.b32.xlu0 %v1222_v20, %s7155_s10 }
 0xaf7   :  { %1320 = vrot.lane.b32.xlu1 %v1318_v23, %s7155_s10 }
 0xb68   :  { %v1225_v27 = vpop.permute.xlu0 %1224 }
 0xb69   :  { %v1321_v28 = vpop.permute.xlu1 %1320  ;;  %v7680_v29 = vadd.f32 %v1225_v27, %v1217_v25 }
 0xb6a   :  { %v7682_v14 = vadd.f32 %v1321_v28, %v1313_v26 }
 0xb6b   :  { %6724 = vtanh.f32 %v7680_v29 }
 0xb6c   :  { %6726 = vtanh.f32 %v7682_v14 }
 0xb75   :  { %v6725_v30 = vpop.eup %6724 }
 0xb76   :  { %v6727_v31 = vpop.eup %6726  ;;  %1230 = vrot.lane.b32.xlu0 %v6725_v30, %s7155_s10 }
 0xb77   :  { %1326 = vrot.lane.b32.xlu1 %v6727_v31, %s7155_s10 }
 0xbe8   :  { %v1231_v32 = vpop.permute.xlu0 %1230 }
 0xbe9   :  { %v1327_v33 = vpop.permute.xlu1 %1326  ;;  %v1233_v34 = vmul.f32 %v6721_v7, %v1231_v32 }
 0xbea   :  { %v1329_v35 = vmul.f32 %v6723_v10, %v1327_v33 }
 0xbeb   :  { %1331 = vrot.lane.b32.xlu0 %v1233_v34, %s7156_s25 }
 0xbec   :  { %1406 = vrot.lane.b32.xlu1 %v1329_v35, %s7156_s25 }
 0xc5d   :  { %v1332_v22 = vpop.permute.xlu0 %1331 }
 0xc5e   :  { %v1407_v36 = vpop.permute.xlu1 %1406  ;;  %5685 = vmatmul.mubr.msk.f32.vlgmr.msra.gmra.mrb[16].mxu0 %vm400_vm13, %v1332_v22 }
 0xc5f   :  { %5696 = vmatmul.mubr.msk.f32.vlgmr.msra.gmra.mrb[12].mxu1 %vm400_vm13, %v1407_v36  ;;  %6327 = vmatpush3.bf16.msra.mxu0 %v7460_v9 }
 0xc60   :  { %6328 = vmatprep.subr.bf16.mxu0 %v7152_v2  ;;  %5706 = vmatprep.mubr.msk.f32.mxu0 %vm7154_vm3, %v7150_v0 }
 0xc61   :  { %6333 = vmatpush3.bf16.msra.mxu1 %v7525_v53  ;;  %5717 = vmatprep.mubr.msk.f32.mxu1 %vm7154_vm3, %v7150_v0 }
 0xc62   :  { %6334 = vmatprep.subr.bf16.mxu1 %v7152_v2 }
 0xc63   :  { %6330 = vmatpush3.bf16.msra.mxu0 %v7469_v13 }
 0xc64   :  { %6337 = vmatprep.subr.bf16.mxu0 %v7152_v2 }
 0xc65   :  { %6336 = vmatpush3.bf16.msra.mxu1 %v7531_v57 }
 0xc66   :  { %5707 = vmatmul.mubr.msk.f32.vlgmr.msra.gmra.mrb[18].mxu0 %vm400_vm13, %v1407_v36  ;;  %6343 = vmatprep.subr.bf16.mxu1 %v7152_v2 }
 0xc67   :  { %6339 = vmatpush3.bf16.msra.mxu0 %v7523_v49  ;;  %5728 = vmatprep.mubr.msk.f32.mxu0 %vm7154_vm3, %v7150_v0 }
 0xc68   :  { %6340 = vmatprep.subr.bf16.mxu0 %v7152_v2 }
 0xc6b   :  { %6342 = vmatpush3.bf16.msra.mxu0 %v7528_v56 }
 0xc6c   :  { %6349 = vmatprep.subr.bf16.mxu0 %v7152_v2 }
 0xd31   :  { %v1401_v37 = vpop.f32.mrb[16].mxu0 }
 0xd32   :  { %v1476_v38 = vpop.f32.mrb[12].mxu1  ;;  %v5686_v40 = vpop.f32.mrb[17].mxu0 }
 0xd33   :  { %v1477_v41 = vadd.f32 %v1476_v38, %v1401_v37  ;;  %v5697_v42 = vpop.f32.mrb[13].mxu1 }
 0xd35   :  { %v1480_v43 = vadd.f32 %v7590_v21, %v1477_v41 }
 0xd37   :  { %6728 = vtanh.f32 %v1480_v43  ;;  %v5152_v51 = vmul.f32 -1.442695, %v1480_v43 }
 0xd39   :  { %v1571_v44 = vpop.f32.mrb[18].mxu0 }
 0xd3a   :  { %v1575_v45 = vadd.f32 %v1571_v44, %v7584_v17  ;;  %v5708_v46 = vpop.f32.mrb[19].mxu0 }
 0xd3c   :  { %v1576_v47 = vadd.f32 %v7493_v24, %v1575_v45 }
 0xd3e   :  { %6730 = vtanh.f32 %v1576_v47  ;;  %v5154_v52 = vmul.f32 -1.442695, %v1576_v47 }
 0xd3f   :  { %6732 = vpow2.f32 %v5152_v51 }
 0xd40   :  { %6734 = vpow2.f32 %v5154_v52 }
 0xd41   :  { %v6729_v48 = vpop.eup %6728 }
 0xd42   :  { %1490 = vrot.lane.b32.xlu0 %v6729_v48, %s7155_s10 }
 0xd48   :  { %v6731_v50 = vpop.eup %6730 }
 0xd49   :  { %1586 = vrot.lane.b32.xlu1 %v6731_v50, %s7155_s10  ;;  %v6733_v54 = vpop.eup %6732 }
 0xd4a   :  { %v1484_v55 = vadd.f32 1.0, %v6733_v54  ;;  %v6735_v58 = vpop.eup %6734 }
 0xd4b   :  { %v1580_v59 = vadd.f32 1.0, %v6735_v58 }
 0xd4c   :  { %6736 = vrcp.f32 %v1484_v55 }
 0xd4d   :  { %6738 = vrcp.f32 %v1580_v59 }
 0xd56   :  { %v6737_v17 = vpop.eup %6736 }
 0xd57   :  { %v6739_v61 = vpop.eup %6738  ;;  %v1488_v1 = vmul.f32 %v6737_v17, %v7680_v29 }
 0xd58   :  { %v1584_v5 = vmul.f32 %v6739_v61, %v7682_v14 }
 0xdb4   :  { %v1491_v39 = vpop.permute.xlu0 %1490 }
 0xdb5   :  { %v1493_v60 = vmul.f32 %v6737_v17, %v1491_v39 }
 0xdb7   :  { %1495 = vrot.lane.b32.xlu0 %v1493_v60, %s7155_s10 }
 0xdbb   :  { %v1587_v62 = vpop.permute.xlu1 %1586 }
 0xdbc   :  { %v1589_v63 = vmul.f32 %v6739_v61, %v1587_v62 }
 0xdbe   :  { %1591 = vrot.lane.b32.xlu1 %v1589_v63, %s7155_s10 }
 0xe29   :  { %v1496_v3 = vpop.permute.xlu0 %1495 }
 0xe2a   :  { %v7719_v4 = vadd.f32 %v1496_v3, %v1488_v1  ;;  %v7789_v3 = vld [vmem:[%s8394_s18] sm:$0xff] }
 0xe2c   :  { %6740 = vtanh.f32 %v7719_v4 }
 0xe30   :  { %v1592_v12 = vpop.permute.xlu1 %1591 }
 0xe31   :  { %v7723_v6 = vadd.f32 %v1592_v12, %v1584_v5 }
 0xe33   :  { %6742 = vtanh.f32 %v7723_v6 }
 0xe36   :  { %v6741_v7 = vpop.eup %6740 }
 0xe37   :  { %1501 = vrot.lane.b32.xlu0 %v6741_v7, %s7155_s10 }
 0xe3d   :  { %v6743_v8 = vpop.eup %6742 }
 0xe3e   :  { %1597 = vrot.lane.b32.xlu1 %v6743_v8, %s7155_s10 }
 0xea9   :  { %v1502_v10 = vpop.permute.xlu0 %1501 }
 0xeaa   :  { %v1504_v11 = vmul.f32 %v6737_v17, %v1502_v10 }
 0xeac   :  { %1602 = vrot.lane.b32.xlu0 %v1504_v11, %s7156_s25 }
 0xeb0   :  { %v1598_v20 = vpop.permute.xlu1 %1597 }
 0xeb1   :  { %v1600_v23 = vmul.f32 %v6739_v61, %v1598_v20 }
 0xeb3   :  { %1677 = vrot.lane.b32.xlu1 %v1600_v23, %s7156_s25 }
 0xf1e   :  { %v1603_v25 = vpop.permute.xlu0 %1602 }
 0xf1f   :  { %5718 = vmatmul.mubr.msk.f32.vlgmr.msra.gmra.mrb[14].mxu1 %vm400_vm13, %v1603_v25 }
 0xf20   :  { %6345 = vmatpush3.bf16.msra.mxu1 %v7460_v9  ;;  %5739 = vmatprep.mubr.msk.f32.mxu1 %vm7154_vm3, %v7150_v0 }
 0xf21   :  { %6346 = vmatprep.subr.bf16.mxu1 %v7152_v2 }
 0xf24   :  { %6348 = vmatpush3.bf16.msra.mxu1 %v7469_v13 }
 0xf25   :  { %v1678_v26 = vpop.permute.xlu1 %1677  ;;  %6355 = vmatprep.subr.bf16.mxu1 %v7152_v2 }
 0xf26   :  { %5729 = vmatmul.mubr.msk.f32.vlgmr.msra.gmra.mrb[20].mxu0 %vm400_vm13, %v1678_v26 }
 0xf27   :  { %5740 = vmatmul.mubr.msk.f32.vlgmr.msra.gmra.mrb[16].mxu1 %vm400_vm13, %v1678_v26  ;;  %6351 = vmatpush3.bf16.msra.mxu0 %v7525_v53 }
 0xf28   :  { %6357 = vmatpush3.bf16.msra.mxu1 %v7523_v49  ;;  %6352 = vmatprep.subr.bf16.mxu0 %v7152_v2 }
 0xf29   :  { %6358 = vmatprep.subr.bf16.mxu1 %v7152_v2  ;;  %5761 = vmatprep.mubr.msk.f32.mxu1 %vm7154_vm3, %v7150_v0 }
 0xf2a   :  { %5750 = vmatprep.mubr.msk.f32.mxu0 %vm7154_vm3, %v7150_v0 }
 0xf2b   :  { %6354 = vmatpush3.bf16.msra.mxu0 %v7531_v57 }
 0xf2c   :  { %6360 = vmatpush3.bf16.msra.mxu1 %v7528_v56  ;;  %6361 = vmatprep.subr.bf16.mxu0 %v7152_v2 }
 0xf2d   :  { %6367 = vmatprep.subr.bf16.mxu1 %v7152_v2 }
 0xff2   :  { %v1672_v27 = vpop.f32.mrb[14].mxu1 }
 0xff3   :  { %v5719_v28 = vpop.f32.mrb[15].mxu1 }
 0xff9   :  { %v1747_v29 = vpop.f32.mrb[20].mxu0 }
 0xffa   :  { %v1748_v14 = vadd.f32 %v1747_v29, %v1672_v27  ;;  %v1842_v30 = vpop.f32.mrb[16].mxu1  ;;  %v5730_v31 = vpop.f32.mrb[21].mxu0 }
 0xffb   :  { %v1846_v32 = vadd.f32 %v7582_v16, %v1842_v30  ;;  %v5741_v33 = vpop.f32.mrb[17].mxu1 }
 0xffc   :  { %v1751_v34 = vadd.f32 %v7590_v21, %v1748_v14 }
 0xffd   :  { %v1847_v35 = vadd.f32 %v7493_v24, %v1846_v32 }
 0xffe   :  { %6744 = vtanh.f32 %v1751_v34  ;;  %v5157_v37 = vmul.f32 -1.442695, %v1751_v34 }
 0xfff   :  { %6746 = vtanh.f32 %v1847_v35  ;;  %v5159_v38 = vmul.f32 -1.442695, %v1847_v35 }
0x1000   :  { %6748 = vpow2.f32 %v5157_v37 }
0x1001   :  { %6750 = vpow2.f32 %v5159_v38 }
0x1008   :  { %v6745_v22 = vpop.eup %6744 }
0x1009   :  { %v6747_v36 = vpop.eup %6746  ;;  %1761 = vrot.lane.b32.xlu0 %v6745_v22, %s7155_s10 }
0x100a   :  { %1857 = vrot.lane.b32.xlu1 %v6747_v36, %s7155_s10  ;;  %v6749_v40 = vpop.eup %6748 }
0x100b   :  { %v6751_v41 = vpop.eup %6750  ;;  %v1755_v16 = vadd.f32 1.0, %v6749_v40 }
0x100c   :  { %v1851_v42 = vadd.f32 1.0, %v6751_v41 }
0x100d   :  { %6752 = vrcp.f32 %v1755_v16 }
0x100e   :  { %6754 = vrcp.f32 %v1851_v42 }
0x1017   :  { %v6753_v43 = vpop.eup %6752 }
0x1018   :  { %v6755_v45 = vpop.eup %6754  ;;  %v1759_v50 = vmul.f32 %v6753_v43, %v7719_v4 }
0x1019   :  { %v1855_v51 = vmul.f32 %v6755_v45, %v7723_v6 }
0x107b   :  { %v1762_v44 = vpop.permute.xlu0 %1761 }
0x107c   :  { %v1858_v46 = vpop.permute.xlu1 %1857  ;;  %v1764_v47 = vmul.f32 %v6753_v43, %v1762_v44 }
0x107d   :  { %v1860_v48 = vmul.f32 %v6755_v45, %v1858_v46 }
0x107e   :  { %1766 = vrot.lane.b32.xlu0 %v1764_v47, %s7155_s10 }
0x107f   :  { %1862 = vrot.lane.b32.xlu1 %v1860_v48, %s7155_s10 }
0x10f0   :  { %v1767_v52 = vpop.permute.xlu0 %1766 }
0x10f1   :  { %v1863_v54 = vpop.permute.xlu1 %1862  ;;  %v7760_v55 = vadd.f32 %v1767_v52, %v1759_v50 }
0x10f2   :  { %v7762_v58 = vadd.f32 %v1863_v54, %v1855_v51 }
0x10f3   :  { %6756 = vtanh.f32 %v7760_v55 }
0x10f4   :  { %6758 = vtanh.f32 %v7762_v58 }
0x10fd   :  { %v6757_v59 = vpop.eup %6756 }
0x10fe   :  { %v6759_v17 = vpop.eup %6758  ;;  %1772 = vrot.lane.b32.xlu0 %v6757_v59, %s7155_s10 }
0x10ff   :  { %1868 = vrot.lane.b32.xlu1 %v6759_v17, %s7155_s10 }
0x1170   :  { %v1773_v39 = vpop.permute.xlu0 %1772 }
0x1171   :  { %v1869_v60 = vpop.permute.xlu1 %1868  ;;  %v1775_v61 = vmul.f32 %v6753_v43, %v1773_v39 }
0x1172   :  { %v1871_v62 = vmul.f32 %v6755_v45, %v1869_v60 }
0x1173   :  { %1873 = vrot.lane.b32.xlu0 %v1775_v61, %s7156_s25 }
0x1174   :  { %1948 = vrot.lane.b32.xlu1 %v1871_v62, %s7156_s25 }
0x11e5   :  { %v1874_v63 = vpop.permute.xlu0 %1873 }
0x11e6   :  { %v1949_v1 = vpop.permute.xlu1 %1948  ;;  %5751 = vmatmul.mubr.msk.f32.vlgmr.msra.gmra.mrb[22].mxu0 %vm400_vm13, %v1874_v63 }
0x11e7   :  { %5762 = vmatmul.mubr.msk.f32.vlgmr.msra.gmra.mrb[18].mxu1 %vm400_vm13, %v1949_v1  ;;  %6363 = vmatpush3.bf16.msra.mxu0 %v7460_v9 }
0x11e8   :  { %6364 = vmatprep.subr.bf16.mxu0 %v7152_v2  ;;  %5772 = vmatprep.mubr.msk.f32.mxu0 %vm7154_vm3, %v7150_v0 }
0x11e9   :  { %6369 = vmatpush3.bf16.msra.mxu1 %v7525_v53  ;;  %5783 = vmatprep.mubr.msk.f32.mxu1 %vm7154_vm3, %v7150_v0 }
0x11ea   :  { %6370 = vmatprep.subr.bf16.mxu1 %v7152_v2 }
0x11eb   :  { %6366 = vmatpush3.bf16.msra.mxu0 %v7469_v13 }
0x11ec   :  { %6373 = vmatprep.subr.bf16.mxu0 %v7152_v2 }
0x11ed   :  { %6372 = vmatpush3.bf16.msra.mxu1 %v7531_v57 }
0x11ee   :  { %5773 = vmatmul.mubr.msk.f32.vlgmr.msra.gmra.mrb[24].mxu0 %vm400_vm13, %v1949_v1  ;;  %6379 = vmatprep.subr.bf16.mxu1 %v7152_v2 }
0x11ef   :  { %6375 = vmatpush3.bf16.msra.mxu0 %v7523_v49  ;;  %5794 = vmatprep.mubr.msk.f32.mxu0 %vm7154_vm3, %v7789_v3 }
0x11f0   :  { %6376 = vmatprep.subr.bf16.mxu0 %v7152_v2 }
0x11f3   :  { %6378 = vmatpush3.bf16.msra.mxu0 %v7528_v56 }
0x11f4   :  { %6385 = vmatprep.subr.bf16.mxu0 %v7152_v2 }
0x12b9   :  { %v1943_v0 = vpop.f32.mrb[22].mxu0 }
0x12ba   :  { %v2018_v4 = vpop.f32.mrb[18].mxu1  ;;  %v5752_v5 = vpop.f32.mrb[23].mxu0 }
0x12bb   :  { %v2019_v12 = vadd.f32 %v2018_v4, %v1943_v0  ;;  %v5763_v6 = vpop.f32.mrb[19].mxu1 }
0x12bd   :  { %v2022_v7 = vadd.f32 %v7590_v21, %v2019_v12 }
0x12bf   :  { %6760 = vtanh.f32 %v2022_v7  ;;  %v5162_v26 = vmul.f32 -1.442695, %v2022_v7 }
0x12c1   :  { %v2113_v8 = vpop.f32.mrb[24].mxu0 }
0x12c2   :  { %v2117_v10 = vadd.f32 %v2113_v8, %v7588_v19  ;;  %v5774_v11 = vpop.f32.mrb[25].mxu0 }
0x12c4   :  { %v2118_v20 = vadd.f32 %v7493_v24, %v2117_v10 }
0x12c6   :  { %6762 = vtanh.f32 %v2118_v20  ;;  %v5164_v27 = vmul.f32 -1.442695, %v2118_v20 }
0x12c7   :  { %6764 = vpow2.f32 %v5162_v26 }
0x12c8   :  { %6766 = vpow2.f32 %v5164_v27 }
0x12c9   :  { %v6761_v23 = vpop.eup %6760 }
0x12ca   :  { %2032 = vrot.lane.b32.xlu0 %v6761_v23, %s7155_s10 }
0x12d0   :  { %v6763_v25 = vpop.eup %6762 }
0x12d1   :  { %2128 = vrot.lane.b32.xlu1 %v6763_v25, %s7155_s10  ;;  %v6765_v28 = vpop.eup %6764 }
0x12d2   :  { %v2026_v29 = vadd.f32 1.0, %v6765_v28  ;;  %v6767_v14 = vpop.eup %6766 }
0x12d3   :  { %v2122_v30 = vadd.f32 1.0, %v6767_v14 }
0x12d4   :  { %6768 = vrcp.f32 %v2026_v29 }
0x12d5   :  { %6770 = vrcp.f32 %v2122_v30 }
0x12de   :  { %v6769_v19 = vpop.eup %6768 }
0x12df   :  { %v6771_v32 = vpop.eup %6770  ;;  %v2030_v35 = vmul.f32 %v6769_v19, %v7760_v55 }
0x12e0   :  { %v2126_v37 = vmul.f32 %v6771_v32, %v7762_v58 }
0x133c   :  { %v2033_v31 = vpop.permute.xlu0 %2032 }
0x133d   :  { %v2035_v24 = vmul.f32 %v6769_v19, %v2033_v31 }
0x133f   :  { %2037 = vrot.lane.b32.xlu0 %v2035_v24, %s7155_s10 }
0x1343   :  { %v2129_v33 = vpop.permute.xlu1 %2128 }
0x1344   :  { %v2131_v34 = vmul.f32 %v6771_v32, %v2129_v33 }
0x1346   :  { %2133 = vrot.lane.b32.xlu1 %v2131_v34, %s7155_s10 }
0x13b1   :  { %v2038_v22 = vpop.permute.xlu0 %2037 }
0x13b2   :  { %v7804_v36 = vadd.f32 %v2038_v22, %v2030_v35 }
0x13b4   :  { %6772 = vtanh.f32 %v7804_v36 }
0x13b8   :  { %v2134_v38 = vpop.permute.xlu1 %2133 }
0x13b9   :  { %v7808_v40 = vadd.f32 %v2134_v38, %v2126_v37 }
0x13bb   :  { %6774 = vtanh.f32 %v7808_v40 }
0x13be   :  { %v6773_v41 = vpop.eup %6772 }
0x13bf   :  { %2043 = vrot.lane.b32.xlu0 %v6773_v41, %s7155_s10 }
0x13c5   :  { %v6775_v16 = vpop.eup %6774 }
0x13c6   :  { %2139 = vrot.lane.b32.xlu1 %v6775_v16, %s7155_s10 }
0x1431   :  { %v2044_v42 = vpop.permute.xlu0 %2043 }
0x1432   :  { %v2046_v43 = vmul.f32 %v6769_v19, %v2044_v42 }
0x1434   :  { %2144 = vrot.lane.b32.xlu0 %v2046_v43, %s7156_s25  ;;  %v2590_v43 = vld [vmem:[#allocation7 + $0x8] sm:$0xff] }
0x1438   :  { %v2140_v44 = vpop.permute.xlu1 %2139 }
0x1439   :  { %v2142_v45 = vmul.f32 %v6771_v32, %v2140_v44  ;;  %v2675_v44 = vld [vmem:[#allocation18] sm:$0xff] }
0x143b   :  { %2219 = vrot.lane.b32.xlu1 %v2142_v45, %s7156_s25 }
0x14a6   :  { %v2145_v46 = vpop.permute.xlu0 %2144 }
0x14a7   :  { %5784 = vmatmul.mubr.msk.f32.vlgmr.msra.gmra.mrb[20].mxu1 %vm400_vm13, %v2145_v46  ;;  %v2676_v46 = vld [vmem:[#allocation18 + $0x8] sm:$0xff] }
0x14a8   :  { %6381 = vmatpush3.bf16.msra.mxu1 %v7460_v9  ;;  %5805 = vmatprep.mubr.msk.f32.mxu1 %vm7154_vm3, %v7789_v3 }
0x14a9   :  { %6382 = vmatprep.subr.bf16.mxu1 %v7152_v2 }
0x14ac   :  { %6384 = vmatpush3.bf16.msra.mxu1 %v7469_v13 }
0x14ad   :  { %v2220_v47 = vpop.permute.xlu1 %2219  ;;  %6391 = vmatprep.subr.bf16.mxu1 %v7152_v2 }
0x14ae   :  { %5795 = vmatmul.mubr.msk.f32.vlgmr.msra.gmra.mrb[26].mxu0 %vm400_vm13, %v2220_v47 }
0x14af   :  { %5806 = vmatmul.mubr.msk.f32.vlgmr.msra.gmra.mrb[22].mxu1 %vm400_vm13, %v2220_v47  ;;  %6387 = vmatpush3.bf16.msra.mxu0 %v7525_v53  ;;  %v2591_v47 = vld [vmem:[#allocation7 + $0x10] sm:$0xff] }
0x14b0   :  { %6393 = vmatpush3.bf16.msra.mxu1 %v7523_v49  ;;  %6388 = vmatprep.subr.bf16.mxu0 %v7152_v2 }
0x14b1   :  { %6394 = vmatprep.subr.bf16.mxu1 %v7152_v2  ;;  %5827 = vmatprep.mubr.msk.f32.mxu1 %vm7154_vm3, %v7789_v3 }
0x14b2   :  { %5816 = vmatprep.mubr.msk.f32.mxu0 %vm7154_vm3, %v7789_v3 }
0x14b3   :  { %6390 = vmatpush3.bf16.msra.mxu0 %v7531_v57  ;;  %v6881_v57 = vld [vmem:[%s8380_s4] ss:$0 sm:$0xff] }
0x14b4   :  { %6396 = vmatpush3.bf16.msra.mxu1 %v7528_v56  ;;  %6397 = vmatprep.subr.bf16.mxu0 %v7152_v2 }
0x14b5   :  { %6403 = vmatprep.subr.bf16.mxu1 %v7152_v2 }
0x157a   :  { %v2214_v9 = vpop.f32.mrb[20].mxu1 }
0x157b   :  { %v5785_v13 = vpop.f32.mrb[21].mxu1 }
0x157c   :  { %v6404_v13 = vpack.c.bf16 %v2676_v46, %v2675_v44  ;;  %v5173_v44 = vld [vmem:[#allocation10] ss:$0 sm:$0xff] }
0x1581   :  { %v2289_v49 = vpop.f32.mrb[26].mxu0 }
0x1582   :  { %v2290_v53 = vadd.f32 %v2289_v49, %v2214_v9  ;;  %v2384_v48 = vpop.f32.mrb[22].mxu1  ;;  %v5796_v50 = vpop.f32.mrb[27].mxu0  ;;  %v2592_v9 = vld [vmem:[#allocation7 + $0x18] sm:$0xff] }
0x1583   :  { %v2388_v51 = vadd.f32 %v7586_v18, %v2384_v48  ;;  %v5807_v52 = vpop.f32.mrb[23].mxu1  ;;  %v2677_v49 = vld [vmem:[#allocation18 + $0x10] sm:$0xff]  ;;  %v6401_v48 = vpack.c.bf16 %v2592_v9, %v2591_v47 }
0x1584   :  { %v2293_v54 = vadd.f32 %v7590_v21, %v2290_v53  ;;  %v2678_v53 = vld [vmem:[#allocation18 + $0x18] sm:$0xff] }
0x1585   :  { %v2389_v56 = vadd.f32 %v6881_v57, %v2388_v51  ;;  %v6407_v50 = vpack.c.bf16 %v2678_v53, %v2677_v49  ;;  %v2775_v57 = vld [vmem:[#allocation9] sm:$0xff] }
0x1586   :  { %6776 = vtanh.f32 %v2293_v54  ;;  %v5167_v59 = vmul.f32 -1.442695, %v2293_v54 }
0x1587   :  { %6778 = vtanh.f32 %v2389_v56  ;;  %v5169_v17 = vmul.f32 -1.442695, %v2389_v56  ;;  %v2776_v56 = vld [vmem:[#allocation9 + $0x8] sm:$0xff] }
0x1588   :  { %6780 = vpow2.f32 %v5167_v59  ;;  %v7881_v59 = vpack.c.bf16 %v2776_v56, %v2775_v57 }
0x1589   :  { %6782 = vpow2.f32 %v5169_v17 }
0x1590   :  { %v6777_v55 = vpop.eup %6776 }
0x1591   :  { %v6779_v58 = vpop.eup %6778  ;;  %2303 = vrot.lane.b32.xlu0 %v6777_v55, %s7155_s10  ;;  %v2759_v55 = vld [vmem:[%s8384_s8] sm:$0xff] }
0x1592   :  { %2399 = vrot.lane.b32.xlu1 %v6779_v58, %s7155_s10  ;;  %v6781_v18 = vpop.eup %6780  ;;  %v2760_v58 = vld [vmem:[%s8384_s8 + $0x8] sm:$0xff] }
0x1593   :  { %v6783_v39 = vpop.eup %6782  ;;  %v2297_v60 = vadd.f32 1.0, %v6781_v18  ;;  %v7883_v17 = vpack.c.bf16 %v2760_v58, %v2759_v55  ;;  %v2777_v18 = vld [vmem:[#allocation9 + $0x10] sm:$0xff]  ;;  %v2944_v58 = vld [vmem:[#allocation12] sm:$0xff] }
0x1594   :  { %v2393_v61 = vadd.f32 1.0, %v6783_v39  ;;  %v2778_v39 = vld [vmem:[#allocation9 + $0x18] sm:$0xff] }
0x1595   :  { %6784 = vrcp.f32 %v2297_v60  ;;  %v2761_v60 = vld [vmem:[%s8384_s8 + $0x10] sm:$0xff] }
0x1596   :  { %6786 = vrcp.f32 %v2393_v61  ;;  %v2762_v61 = vld [vmem:[%s8384_s8 + $0x18] sm:$0xff] }
0x159f   :  { %v6785_v62 = vpop.eup %6784 }
0x15a0   :  { %v6787_v1 = vpop.eup %6786  ;;  %v2301_v12 = vmul.f32 %v6785_v62, %v7804_v36 }
0x15a1   :  { %v2397_v6 = vmul.f32 %v6787_v1, %v7808_v40 }
0x1603   :  { %v2304_v63 = vpop.permute.xlu0 %2303 }
0x1604   :  { %v2400_v0 = vpop.permute.xlu1 %2399  ;;  %v2306_v4 = vmul.f32 %v6785_v62, %v2304_v63  ;;  %v7895_v63 = vpack.c.bf16 %v2778_v39, %v2777_v18  ;;  %v2945_v18 = vld [vmem:[#allocation12 + $0x8] sm:$0xff]  ;;  %v2946_v39 = vld [vmem:[#allocation12 + $0x10] sm:$0xff] }
0x1605   :  { %v2402_v5 = vmul.f32 %v6787_v1, %v2400_v0  ;;  %v2763_v0 = vld [vmem:[%s8384_s8 + $0x20] sm:$0xff] }
0x1606   :  { %2308 = vrot.lane.b32.xlu0 %v2306_v4, %s7155_s10  ;;  %v2764_v4 = vld [vmem:[%s8384_s8 + $0x28] sm:$0xff] }
0x1607   :  { %2404 = vrot.lane.b32.xlu1 %v2402_v5, %s7155_s10  ;;  %v2948_v5 = vld [vmem:[#allocation13] sm:$0xff] }
0x1678   :  { %v2309_v7 = vpop.permute.xlu0 %2308 }
0x1679   :  { %v2405_v8 = vpop.permute.xlu1 %2404  ;;  %v2311_v10 = vadd.f32 %v2309_v7, %v2301_v12  ;;  %v2949_v12 = vld [vmem:[#allocation13 + $0x8] sm:$0xff] }
0x167a   :  { %v7847_v11 = vadd.f32 %v2405_v8, %v2397_v6  ;;  %v7913_v6 = vpack.c.bf16 %v2764_v4, %v2763_v0  ;;  %v7915_v7 = vpack.c.bf16 %v2949_v12, %v2948_v5  ;;  %v2765_v8 = vld [vmem:[%s8384_s8 + $0x30] sm:$0xff] }
0x167b   :  { %6788 = vtanh.f32 %v2311_v10 }
0x167c   :  { %6790 = vtanh.f32 %v7847_v11 }
0x1685   :  { %v6789_v20 = vpop.eup %6788 }
0x1686   :  { %v6791_v23 = vpop.eup %6790  ;;  %2314 = vrot.lane.b32.xlu0 %v6789_v20, %s7155_s10  ;;  %v2950_v20 = vld [vmem:[#allocation13 + $0x10] sm:$0xff] }
0x1687   :  { %2410 = vrot.lane.b32.xlu1 %v6791_v23, %s7155_s10  ;;  %v2951_v23 = vld [vmem:[#allocation13 + $0x18] sm:$0xff] }
0x16f8   :  { %v2315_v25 = vpop.permute.xlu0 %2314 }
0x16f9   :  { %v2411_v26 = vpop.permute.xlu1 %2410  ;;  %v2317_v27 = vmul.f32 %v6785_v62, %v2315_v25 }
0x16fa   :  { %v2413_v28 = vmul.f32 %v6787_v1, %v2411_v26  ;;  %v7897_v1 = vpack.c.bf16 %v2762_v61, %v2761_v60  ;;  %v7931_v26 = vpack.c.bf16 %v2951_v23, %v2950_v20  ;;  %v8016_v60 = vpack.c.bf16 %v2945_v18, %v2944_v58  ;;  %v2947_v61 = vld [vmem:[#allocation12 + $0x18] sm:$0xff] }
0x16fb   :  { %2415 = vrot.lane.b32.xlu0 %v2317_v27, %s7156_s25  ;;  %v2767_v27 = vld [vmem:[%s8384_s8 + $0x40] sm:$0xff] }
0x16fc   :  { %2490 = vrot.lane.b32.xlu1 %v2413_v28, %s7156_s25  ;;  %v2768_v28 = vld [vmem:[%s8384_s8 + $0x48] sm:$0xff] }
0x176d   :  { %v2416_v29 = vpop.permute.xlu0 %2415 }
0x176e   :  { %v7854_v14 = vpop.permute.xlu1 %2490  ;;  %5817 = vmatmul.mubr.msk.f32.vlgmr.msra.gmra.mrb[28].mxu0 %vm400_vm13, %v2416_v29  ;;  %v7945_v29 = vpack.c.bf16 %v2768_v28, %v2767_v27 }
0x176f   :  { %5828 = vmatmul.mubr.msk.f32.vlgmr.msra.gmra.mrb[24].mxu1 %vm400_vm13, %v7854_v14  ;;  %5838 = vmatprep.mubr.msk.f32.mxu0 %vm7154_vm3, %v7789_v3 }
0x1770   :  { %5849 = vmatprep.mubr.msk.f32.mxu1 %vm7154_vm3, %v7789_v3  ;;  %6405 = vmatpush3.bf16.msra.mxu1 %v6404_v13 }
0x1771   :  { %6406 = vmatprep.subr.bf16.mxu1 %v7152_v2 }
0x1774   :  { %6408 = vmatpush3.bf16.msra.mxu1 %v6407_v50 }
0x1775   :  { %6415 = vmatprep.subr.bf16.mxu1 %v7152_v2 }
0x1841   :  { %v2485_v30 = vpop.f32.mrb[28].mxu0 }
0x1842   :  { %v2560_v19 = vpop.f32.mrb[24].mxu1  ;;  %v5818_v31 = vpop.f32.mrb[29].mxu0 }
0x1843   :  { %v2561_v24 = vadd.f32 %v2560_v19, %v2485_v30  ;;  %v5829_v32 = vpop.f32.mrb[25].mxu1  ;;  %v2770_v30 = vld [vmem:[%s8384_s8 + $0x58] sm:$0xff]  ;;  %v2771_v31 = vld [vmem:[%s8384_s8 + $0x60] sm:$0xff] }
0x1845   :  { %v2564_v33 = vadd.f32 %v7590_v21, %v2561_v24  ;;  %v2589_v21 = vld [vmem:[#allocation7] sm:$0xff] }
0x1846   :  { %v6398_v45 = vpack.c.bf16 %v2590_v43, %v2589_v21  ;;  %v2772_v24 = vld [vmem:[%s8384_s8 + $0x68] sm:$0xff] }
0x1847   :  { %6792 = vtanh.f32 %v2564_v33  ;;  %v5172_v35 = vmul.f32 -1.442695, %v2564_v33  ;;  %v7969_v32 = vpack.c.bf16 %v2772_v24, %v2771_v31  ;;  %v2773_v33 = vld [vmem:[%s8384_s8 + $0x70] sm:$0xff] }
0x1848   :  { %6399 = vmatpush3.bf16.msra.mxu0 %v6398_v45 }
0x1849   :  { %6794 = vpow2.f32 %v5172_v35  ;;  %6400 = vmatprep.subr.bf16.mxu0 %v7152_v2 }
0x184c   :  { %6402 = vmatpush3.bf16.msra.mxu0 %v6401_v48 }
0x184d   :  { %6409 = vmatprep.subr.bf16.mxu0 %v7152_v2 }
0x1851   :  { %v6793_v34 = vpop.eup %6792 }
0x1852   :  { %2574 = vrot.lane.b32.xlu0 %v6793_v34, %s7155_s10  ;;  %v2774_v34 = vld [vmem:[%s8384_s8 + $0x78] sm:$0xff] }
0x1853   :  { %v6795_v22 = vpop.eup %6794  ;;  %v7979_v35 = vpack.c.bf16 %v2774_v34, %v2773_v33 }
0x1854   :  { %v2568_v36 = vadd.f32 1.0, %v6795_v22  ;;  %v2757_v22 = vld [vmem:[%s8402_s3] sm:$0xff] }
0x1856   :  { %6796 = vrcp.f32 %v2568_v36 }
0x1860   :  { %v6797_v37 = vpop.eup %6796 }
0x1861   :  { %v2572_v41 = vmul.f32 %v6797_v37, %v2311_v10  ;;  %v2766_v10 = vld [vmem:[%s8384_s8 + $0x38] sm:$0xff] }
0x1862   :  { %v7929_v25 = vpack.c.bf16 %v2766_v10, %v2765_v8  ;;  %v8029_v8 = vld [vmem:[#allocation15] ss:$0 sm:$0xff] }
0x18c4   :  { %v2575_v38 = vpop.permute.xlu0 %2574 }
0x18c5   :  { %v2577_v40 = vmul.f32 %v6797_v37, %v2575_v38 }
0x18c7   :  { %2579 = vrot.lane.b32.xlu1 %v2577_v40, %s7155_s10 }
0x1939   :  { %v2580_v16 = vpop.permute.xlu1 %2579 }
0x193a   :  { %v7866_v42 = vadd.f32 %v2580_v16, %v2572_v41 }
0x193c   :  { %6798 = vtanh.f32 %v7866_v42 }
0x1946   :  { %v6799_v51 = vpop.eup %6798 }
0x1947   :  { %2585 = vrot.lane.b32.xlu0 %v6799_v51, %s7155_s10 }
0x19b9   :  { %v2586_v52 = vpop.permute.xlu0 %2585 }
0x19ba   :  { %v2588_v54 = vmul.f32 %v6797_v37, %v2586_v52 }
0x19bc   :  { %2601 = vrot.lane.b32.xlu1 %v2588_v54, %s7156_s25 }
0x1a2e   :  { %v2602_v62 = vpop.permute.xlu1 %2601 }
0x1a2f   :  { %5839 = vmatmul.mubr.msk.f32.vlgmr.msra.gmra.mrb[30].mxu0 %vm400_vm13, %v2602_v62  ;;  %5850 = vmatmul.mubr.msk.f32.vlgmr.msra.gmra.mrb[26].mxu1 %vm400_vm13, %v2602_v62 }
0x1a30   :  { %6411 = vmatpush3.bf16.msra.mxu0 %v7881_v59  ;;  %6417 = vmatpush3.bf16.msra.mxu1 %v7883_v17 }
0x1a31   :  { %6412 = vmatprep.subr.bf16.mxu0 %v7152_v2  ;;  %6418 = vmatprep.subr.bf16.mxu1 %v7152_v2 }
0x1a32   :  { %5860 = vmatprep.mubr.msk.f32.mxu0 %vm7154_vm3, %v7789_v3  ;;  %5895 = vmatprep.mubr.msk.f32.mxu1 %vm7154_vm3, %v7789_v3 }
0x1a34   :  { %6414 = vmatpush3.bf16.msra.mxu0 %v7895_v63  ;;  %6420 = vmatpush3.bf16.msra.mxu1 %v7897_v1 }
0x1a35   :  { %6421 = vmatprep.subr.bf16.mxu1 %v7152_v2  ;;  %6439 = vmatprep.subr.bf16.mxu0 %v7152_v2 }
0x1a37   :  { %5861 = vmatmul.mubr.msk.f32.vlgmr.msra.gmra.mrb[32].mxu0 %vm400_vm13, %v7854_v14  ;;  %v2769_v14 = vld [vmem:[%s8384_s8 + $0x50] sm:$0xff] }
0x1a38   :  { %6423 = vmatpush3.bf16.msra.mxu1 %v7913_v6  ;;  %6441 = vmatpush3.bf16.msra.mxu0 %v7915_v7  ;;  %v7957_v19 = vpack.c.bf16 %v2770_v30, %v2769_v14 }
0x1a39   :  { %6424 = vmatprep.subr.bf16.mxu1 %v7152_v2  ;;  %6442 = vmatprep.subr.bf16.mxu0 %v7152_v2 }
0x1a3a   :  { %5906 = vmatprep.mubr.msk.f32.mxu0 %vm7154_vm3, %v7789_v3 }
0x1a3c   :  { %6426 = vmatpush3.bf16.msra.mxu1 %v7929_v25  ;;  %6444 = vmatpush3.bf16.msra.mxu0 %v7931_v26 }
0x1a3d   :  { %6427 = vmatprep.subr.bf16.mxu1 %v7152_v2  ;;  %6445 = vmatprep.subr.bf16.mxu0 %v7152_v2 }
0x1a3f   :  { %5907 = vmatmul.mubr.msk.f32.vlgmr.msra.gmra.mrb[34].mxu0 %vm400_vm13, %v2602_v62  ;;  %v8019_v62 = vpack.c.bf16 %v2947_v61, %v2946_v39 }
0x1a40   :  { %6429 = vmatpush3.bf16.msra.mxu1 %v7945_v29  ;;  %5917 = vmatprep.mubr.msk.f32.mxu0 %vm7154_vm3, %v7789_v3 }
0x1a41   :  { %6430 = vmatprep.subr.bf16.mxu1 %v7152_v2  ;;  %6447 = vmatpush3.bf16.msra.mxu0 %v8016_v60 }
0x1a42   :  { %6448 = vmatprep.subr.bf16.mxu0 %v7152_v2 }
0x1a44   :  { %6432 = vmatpush3.bf16.msra.mxu1 %v7957_v19 }
0x1a45   :  { %6433 = vmatprep.subr.bf16.mxu1 %v7152_v2  ;;  %6450 = vmatpush3.bf16.msra.mxu0 %v8019_v62 }
0x1a46   :  { %6451 = vmatprep.subr.bf16.mxu0 %v7152_v2 }
0x1a48   :  { %6435 = vmatpush3.bf16.msra.mxu1 %v7969_v32 }
0x1a49   :  { %6436 = vmatprep.subr.bf16.mxu1 %v7152_v2 }
0x1a4c   :  { %6438 = vmatpush3.bf16.msra.mxu1 %v7979_v35 }
0x1a4d   :  { %6463 = vmatprep.subr.bf16.mxu1 %v7152_v2 }
0x1a4f   :  { %5896 = vmatmul.mubr.f32.vlgmr.msra.gmra.mrb[28].mxu1 %v2757_v22 }
0x1a50   :  { %6465 = vmatpush3.bf16.msra.mxu1 %v7883_v17  ;;  %5974 = vmatprep.mubr.msk.f32.mxu1 %vm7154_vm3, %v7789_v3 }
0x1a51   :  { %6466 = vmatprep.subr.bf16.mxu1 %v7152_v2 }
0x1a54   :  { %6468 = vmatpush3.bf16.msra.mxu1 %v7897_v1 }
0x1a55   :  { %6469 = vmatprep.subr.bf16.mxu1 %v7152_v2 }
0x1a58   :  { %6471 = vmatpush3.bf16.msra.mxu1 %v7913_v6 }
0x1a59   :  { %6472 = vmatprep.subr.bf16.mxu1 %v7152_v2 }
0x1a5c   :  { %6474 = vmatpush3.bf16.msra.mxu1 %v7929_v25 }
0x1a5d   :  { %6475 = vmatprep.subr.bf16.mxu1 %v7152_v2 }
0x1a60   :  { %6477 = vmatpush3.bf16.msra.mxu1 %v7945_v29 }
0x1a61   :  { %6478 = vmatprep.subr.bf16.mxu1 %v7152_v2 }
0x1a64   :  { %6480 = vmatpush3.bf16.msra.mxu1 %v7957_v19 }
0x1a65   :  { %6481 = vmatprep.subr.bf16.mxu1 %v7152_v2 }
0x1a68   :  { %6483 = vmatpush3.bf16.msra.mxu1 %v7969_v32 }
0x1a69   :  { %6484 = vmatprep.subr.bf16.mxu1 %v7152_v2 }
0x1a6c   :  { %6486 = vmatpush3.bf16.msra.mxu1 %v7979_v35 }
0x1a6d   :  { %6511 = vmatprep.subr.bf16.mxu1 %v7152_v2 }
0x1b02   :  { %v2671_v36 = vpop.f32.mrb[30].mxu0  ;;  %v8005_v37 = vpop.f32.mrb[26].mxu1 }
0x1b03   :  { %v5840_v38 = vpop.f32.mrb[31].mxu0  ;;  %v5851_v40 = vpop.f32.mrb[27].mxu1  ;;  %v8007_v46 = vadd.f32 %v5173_v44, %v2671_v36 }
0x1b04   :  { %v3129_v38 = vld [vmem:[#allocation16] sm:$0xff]  ;;  %v3130_v40 = vld [vmem:[#allocation16 + $0x8] sm:$0xff] }
0x1b0a   :  { %v2845_v41 = vpop.f32.mrb[32].mxu0 }
0x1b0b   :  { %v5862_v16 = vpop.f32.mrb[33].mxu0 }
0x1b0c   :  { %v8038_v16 = vpack.c.bf16 %v3130_v40, %v3129_v38 }
0x1b12   :  { %v3018_v21 = vpop.f32.mrb[34].mxu0 }
0x1b13   :  { %v5908_v43 = vpop.f32.mrb[35].mxu0 }
0x1b22   :  { %v2915_v45 = vpop.f32.mrb[28].mxu1 }
0x1b23   :  { %v2916_v47 = vadd.f32 %v2915_v45, %v2845_v41  ;;  %v5897_v9 = vpop.f32.mrb[29].mxu1  ;;  %v3131_v41 = vld [vmem:[#allocation16 + $0x10] sm:$0xff] }
0x1b24   :  { %v5175_v9 = vld [vmem:[%s8393_s17] ss:$0 sm:$0xff] }
0x1b25   :  { %v2919_v13 = vadd.f32 %v2916_v47, %v8007_v46 }
0x1b27   :  { %6800 = vtanh.f32 %v2919_v13  ;;  %v5178_v53 = vmul.f32 -1.442695, %v2919_v13  ;;  %v8073_v13 = vadd.f32 %v5175_v9, %v8005_v37 }
0x1b29   :  { %6802 = vpow2.f32 %v5178_v53 }
0x1b31   :  { %v6801_v49 = vpop.eup %6800 }
0x1b32   :  { %2929 = vrot.lane.b32.xlu0 %v6801_v49, %s7155_s10 }
0x1b33   :  { %v6803_v48 = vpop.eup %6802 }
0x1b34   :  { %v2923_v50 = vadd.f32 1.0, %v6803_v48 }
0x1b36   :  { %6804 = vrcp.f32 %v2923_v50 }
0x1b40   :  { %v6805_v51 = vpop.eup %6804 }
0x1b41   :  { %v2927_v57 = vmul.f32 %v6805_v51, %v7847_v11 }
0x1ba4   :  { %v2930_v52 = vpop.permute.xlu0 %2929 }
0x1ba5   :  { %v2932_v54 = vmul.f32 %v6805_v51, %v2930_v52 }
0x1ba7   :  { %2934 = vrot.lane.b32.xlu1 %v2932_v54, %s7155_s10 }
0x1c19   :  { %v2935_v56 = vpop.permute.xlu1 %2934 }
0x1c1a   :  { %v8013_v55 = vadd.f32 %v2935_v56, %v2927_v57 }
0x1c1c   :  { %6806 = vtanh.f32 %v8013_v55 }
0x1c26   :  { %v6807_v11 = vpop.eup %6806 }
0x1c27   :  { %2940 = vrot.lane.b32.xlu0 %v6807_v11, %s7155_s10 }
0x1c99   :  { %v2941_v0 = vpop.permute.xlu0 %2940 }
0x1c9a   :  { %v2943_v4 = vmul.f32 %v6805_v51, %v2941_v0 }
0x1c9c   :  { %3023 = vrot.lane.b32.xlu1 %v2943_v4, %s7156_s25 }
0x1d0e   :  { %v3024_v5 = vpop.permute.xlu1 %3023 }
0x1d0f   :  { %5918 = vmatmul.mubr.msk.f32.vlgmr.msra.gmra.mrb[36].mxu0 %vm400_vm13, %v3024_v5 }
0x1d10   :  { %5928 = vmatprep.mubr.msk.f32.mxu0 %vm7154_vm3, %v7789_v3  ;;  %6453 = vmatpush3.bf16.msra.mxu0 %v8038_v16 }
0x1d11   :  { %6454 = vmatprep.subr.bf16.mxu0 %v7152_v2 }
0x1de2   :  { %v3093_v12 = vpop.f32.mrb[36].mxu0 }
0x1de3   :  { %v3094_v10 = vadd.f32 %v3093_v12, %v3018_v21  ;;  %v5919_v20 = vpop.f32.mrb[37].mxu0  ;;  %v3132_v21 = vld [vmem:[#allocation16 + $0x18] sm:$0xff] }
0x1de4   :  { %v8041_v43 = vpack.c.bf16 %v3132_v21, %v3131_v41 }
0x1de5   :  { %v3104_v23 = vadd.f32 %v8029_v8, %v3094_v10 }
0x1de6   :  { %6456 = vmatpush3.bf16.msra.mxu0 %v8041_v43 }
0x1de7   :  { %6808 = vtanh.f32 %v3104_v23  ;;  %v5182_v28 = vmul.f32 -1.442695, %v3104_v23  ;;  %6457 = vmatprep.subr.bf16.mxu0 %v7152_v2  ;;  %v7157_v23 = vmov 1.0  }
0x1de9   :  { %6810 = vpow2.f32 %v5182_v28 }
0x1df1   :  { %v6809_v27 = vpop.eup %6808 }
0x1df2   :  { %3114 = vrot.lane.b32.xlu0 %v6809_v27, %s7155_s10 }
0x1df3   :  { %v6811_v14 = vpop.eup %6810 }
0x1df4   :  { %v3108_v30 = vadd.f32 1.0, %v6811_v14 }
0x1df6   :  { %6812 = vrcp.f32 %v3108_v30 }
0x1e00   :  { %v6813_v31 = vpop.eup %6812 }
0x1e01   :  { %v3112_v34 = vmul.f32 %v6813_v31, %v7866_v42 }
0x1e64   :  { %v3115_v24 = vpop.permute.xlu0 %3114 }
0x1e65   :  { %v3117_v33 = vmul.f32 %v6813_v31, %v3115_v24 }
0x1e67   :  { %3119 = vrot.lane.b32.xlu1 %v3117_v33, %s7155_s10 }
0x1ed9   :  { %v3120_v22 = vpop.permute.xlu1 %3119 }
0x1eda   :  { %v8035_v36 = vadd.f32 %v3120_v22, %v3112_v34 }
0x1edc   :  { %6814 = vtanh.f32 %v8035_v36 }
0x1ee6   :  { %v6815_v42 = vpop.eup %6814 }
0x1ee7   :  { %3125 = vrot.lane.b32.xlu0 %v6815_v42, %s7155_s10 }
0x1f59   :  { %v3126_v44 = vpop.permute.xlu0 %3125 }
0x1f5a   :  { %v3128_v45 = vmul.f32 %v6813_v31, %v3126_v44 }
0x1f5c   :  { %3134 = vrot.lane.b32.xlu1 %v3128_v45, %s7156_s25 }
0x1fce   :  { %v3135_v47 = vpop.permute.xlu1 %3134 }
0x1fcf   :  { %5929 = vmatmul.mubr.msk.f32.vlgmr.msra.gmra.mrb[38].mxu0 %vm400_vm13, %v3135_v47 }
0x1fd0   :  { %6459 = vmatpush3.bf16.msra.mxu0 %v7881_v59  ;;  %5939 = vmatprep.mubr.msk.f32.mxu0 %vm7154_vm3, %v7789_v3 }
0x1fd1   :  { %6460 = vmatprep.subr.bf16.mxu0 %v7152_v2 }
0x1fd4   :  { %6462 = vmatpush3.bf16.msra.mxu0 %v7895_v63 }
0x1fd5   :  { %6487 = vmatprep.subr.bf16.mxu0 %v7152_v2 }
0x1fd7   :  { %5940 = vmatmul.mubr.msk.f32.vlgmr.msra.gmra.mrb[40].mxu0 %vm400_vm13, %v3024_v5 }
0x1fd8   :  { %6489 = vmatpush3.bf16.msra.mxu0 %v7915_v7  ;;  %5985 = vmatprep.mubr.msk.f32.mxu0 %vm7154_vm3, %v7789_v3 }
0x1fd9   :  { %6490 = vmatprep.subr.bf16.mxu0 %v7152_v2 }
0x1fdc   :  { %6492 = vmatpush3.bf16.msra.mxu0 %v7931_v26 }
0x1fdd   :  { %6493 = vmatprep.subr.bf16.mxu0 %v7152_v2 }
0x1fdf   :  { %5986 = vmatmul.mubr.msk.f32.vlgmr.msra.gmra.mrb[42].mxu0 %vm400_vm13, %v3135_v47 }
0x1fe0   :  { %6495 = vmatpush3.bf16.msra.mxu0 %v8016_v60  ;;  %5996 = vmatprep.mubr.msk.f32.mxu0 %vm7154_vm3, %v7789_v3 }
0x1fe1   :  { %6496 = vmatprep.subr.bf16.mxu0 %v7152_v2 }
0x1fe4   :  { %6498 = vmatpush3.bf16.msra.mxu0 %v8019_v62 }
0x1fe5   :  { %6499 = vmatprep.subr.bf16.mxu0 %v7152_v2 }
0x20a2   :  { %v3204_v49 = vpop.f32.mrb[38].mxu0 }
0x20a3   :  { %v3205_v53 = vadd.f32 %v3204_v49, %v8073_v13  ;;  %v5930_v48 = vpop.f32.mrb[39].mxu0 }
0x20a5   :  { %5184 = vst [vmem:[%s8394_s18 + $0x8] sm:$0xff] %v3205_v53  ;;  %v3210_v50 = vsel %vm2758_vm14, %v3205_v53, -3e+38 }
0x20a6   :  { %3211 = vmax.xlane.f32.xlu0 %v3210_v50 }
0x20aa   :  { %v3319_v51 = vpop.f32.mrb[40].mxu0 }
0x20ab   :  { %v5941_v52 = vpop.f32.mrb[41].mxu0 }
0x20b2   :  { %v8082_v54 = vpop.f32.mrb[42].mxu0 }
0x20b3   :  { %v5987_v37 = vpop.f32.mrb[43].mxu0 }
0x2133   :  { %v3212_v57 = vpop.xlane.xlu0 %3211 }
0x2134   :  { %vm3213_vm15 = vcmp.eq.f32.partialorder %v3210_v50, %v3212_v57 }
0x2135   :  { %vm3214_vm0 = vmand %vm3213_vm15, %vm2758_vm14 }
0x2136   :  { %v3215_v56 = vsel %vm3214_vm0, %v7480_v15, 128 }
0x2137   :  { %v3217_v58 = vshra.s32 %v3215_v56, 16  ;;  %v3216_v39 = vand.u32 65535, %v3215_v56 }
0x2139   :  { %v3219_v18 = vcvt.s32.f32 %v3217_v58  ;;  %v3218_v11 = vcvt.s32.f32 %v3216_v39 }
0x213b   :  { %3220 = vmin.xlane.f32.xlu1 %v3219_v18 }
0x21c8   :  { %v3221_v61 = vpop.xlane.xlu1 %3220 }
0x21c9   :  { %vm3222_vm1 = vcmp.eq.f32.partialorder %v3219_v18, %v3221_v61  ;;  %v3227_v4 = vcvt.f32.s32 %v3221_v61 }
0x21ca   :  { %v3223_v0 = vsel %vm3222_vm1, %v3218_v11, inf }
0x21cb   :  { %3224 = vmin.xlane.f32.xlu0 %v3223_v0  ;;  %v3228_v12 = vshll.u32 %v3227_v4, 16 }
0x2258   :  { %v3225_v5 = vpop.xlane.xlu0 %3224 }
0x2259   :  { %v3226_v10 = vcvt.f32.s32 %v3225_v5 }
0x225b   :  { %v3229_v20 = vadd.s32 %v3228_v12, %v3226_v10 }
0x225d   :  { %vm3230_vm2 = vcmp.eq.s32.totalorder %v7480_v15, %v3229_v20 }
0x225e   :  { %5975 = vmatmul.mubr.msk.f32.vlgmr.msra.gmra.mrb[30].mxu1 %vm3230_vm2, %v7157_v23 }
0x225f   :  { %6513 = vmatpush3.bf16.msra.mxu1 %v7883_v17  ;;  %6053 = vmatprep.mubr.msk.f32.mxu1 %vm7154_vm3, %v7789_v3 }
0x2260   :  { %6514 = vmatprep.subr.bf16.mxu1 %v7152_v2 }
0x2263   :  { %6516 = vmatpush3.bf16.msra.mxu1 %v7897_v1 }
0x2264   :  { %6517 = vmatprep.subr.bf16.mxu1 %v7152_v2 }
0x2267   :  { %6519 = vmatpush3.bf16.msra.mxu1 %v7913_v6 }
0x2268   :  { %6520 = vmatprep.subr.bf16.mxu1 %v7152_v2 }
0x226b   :  { %6522 = vmatpush3.bf16.msra.mxu1 %v7929_v25 }
0x226c   :  { %6523 = vmatprep.subr.bf16.mxu1 %v7152_v2 }
0x226f   :  { %6525 = vmatpush3.bf16.msra.mxu1 %v7945_v29 }
0x2270   :  { %6526 = vmatprep.subr.bf16.mxu1 %v7152_v2 }
0x2273   :  { %6528 = vmatpush3.bf16.msra.mxu1 %v7957_v19 }
0x2274   :  { %6529 = vmatprep.subr.bf16.mxu1 %v7152_v2 }
0x2277   :  { %6531 = vmatpush3.bf16.msra.mxu1 %v7969_v32 }
0x2278   :  { %6532 = vmatprep.subr.bf16.mxu1 %v7152_v2 }
0x227b   :  { %6534 = vmatpush3.bf16.msra.mxu1 %v7979_v35 }
0x227c   :  { %6559 = vmatprep.subr.bf16.mxu1 %v7152_v2 }
0x2331   :  { %v3389_v17 = vpop.f32.mrb[30].mxu1 }
0x2332   :  { %v3390_v1 = vadd.f32 %v3389_v17, %v3319_v51  ;;  %v5976_v6 = vpop.f32.mrb[31].mxu1 }
0x2334   :  { %v3393_v27 = vadd.f32 %v3390_v1, %v8007_v46 }
0x2336   :  { %6816 = vtanh.f32 %v3393_v27  ;;  %v5188_v14 = vmul.f32 -1.442695, %v3393_v27 }
0x2338   :  { %6818 = vpow2.f32 %v5188_v14 }
0x2340   :  { %v6817_v28 = vpop.eup %6816 }
0x2341   :  { %3403 = vrot.lane.b32.xlu0 %v6817_v28, %s7155_s10 }
0x2342   :  { %v6819_v30 = vpop.eup %6818 }
0x2343   :  { %v3397_v31 = vadd.f32 1.0, %v6819_v30 }
0x2345   :  { %6820 = vrcp.f32 %v3397_v31 }
0x234f   :  { %v6821_v24 = vpop.eup %6820 }
0x2350   :  { %v3401_v22 = vmul.f32 %v6821_v24, %v8013_v55 }
0x23b3   :  { %v3404_v33 = vpop.permute.xlu0 %3403 }
0x23b4   :  { %v3406_v34 = vmul.f32 %v6821_v24, %v3404_v33 }
0x23b6   :  { %3408 = vrot.lane.b32.xlu1 %v3406_v34, %s7155_s10 }
0x2428   :  { %v3409_v38 = vpop.permute.xlu1 %3408 }
0x2429   :  { %v8111_v40 = vadd.f32 %v3409_v38, %v3401_v22  ;;  %v8168_v38 = vld [vmem:[%s8394_s18] sm:$0xff] }
0x242b   :  { %6822 = vtanh.f32 %v8111_v40 }
0x2435   :  { %v6823_v41 = vpop.eup %6822 }
0x2436   :  { %3414 = vrot.lane.b32.xlu1 %v6823_v41, %s7155_s10 }
0x24a8   :  { %v3415_v21 = vpop.permute.xlu1 %3414 }
0x24a9   :  { %v3417_v42 = vmul.f32 %v6821_v24, %v3415_v21 }
0x24ab   :  { %3497 = vrot.lane.b32.xlu0 %v3417_v42, %s7156_s25 }
0x251d   :  { %v3498_v44 = vpop.permute.xlu0 %3497 }
0x251e   :  { %5997 = vmatmul.mubr.msk.f32.vlgmr.msra.gmra.mrb[44].mxu0 %vm400_vm13, %v3498_v44 }
0x251f   :  { %6501 = vmatpush3.bf16.msra.mxu0 %v8038_v16  ;;  %6007 = vmatprep.mubr.msk.f32.mxu0 %vm7154_vm3, %v7789_v3 }
0x2520   :  { %6502 = vmatprep.subr.bf16.mxu0 %v7152_v2 }
0x2523   :  { %6504 = vmatpush3.bf16.msra.mxu0 %v8041_v43 }
0x2524   :  { %6505 = vmatprep.subr.bf16.mxu0 %v7152_v2 }
0x25f1   :  { %v3567_v55 = vpop.f32.mrb[44].mxu0 }
0x25f2   :  { %v3568_v45 = vadd.f32 %v3567_v55, %v8082_v54  ;;  %v5998_v47 = vpop.f32.mrb[45].mxu0 }
0x25f4   :  { %v3578_v9 = vadd.f32 %v8029_v8, %v3568_v45 }
0x25f6   :  { %6824 = vtanh.f32 %v3578_v9  ;;  %v5192_v53 = vmul.f32 -1.442695, %v3578_v9 }
0x25f8   :  { %6826 = vpow2.f32 %v5192_v53 }
0x2600   :  { %v6825_v49 = vpop.eup %6824 }
0x2601   :  { %3588 = vrot.lane.b32.xlu1 %v6825_v49, %s7155_s10 }
0x2602   :  { %v6827_v48 = vpop.eup %6826 }
0x2603   :  { %v3582_v50 = vadd.f32 1.0, %v6827_v48 }
0x2605   :  { %6828 = vrcp.f32 %v3582_v50 }
0x260f   :  { %v6829_v51 = vpop.eup %6828 }
0x2610   :  { %v3586_v57 = vmul.f32 %v6829_v51, %v8035_v36 }
0x2673   :  { %v3589_v52 = vpop.permute.xlu1 %3588 }
0x2674   :  { %v3591_v37 = vmul.f32 %v6829_v51, %v3589_v52 }
0x2676   :  { %3593 = vrot.lane.b32.xlu0 %v3591_v37, %s7155_s10 }
0x26e8   :  { %v3594_v54 = vpop.permute.xlu0 %3593 }
0x26e9   :  { %v8128_v56 = vadd.f32 %v3594_v54, %v3586_v57 }
0x26eb   :  { %6830 = vtanh.f32 %v8128_v56 }
0x26f5   :  { %v6831_v58 = vpop.eup %6830 }
0x26f6   :  { %3599 = vrot.lane.b32.xlu1 %v6831_v58, %s7155_s10 }
0x2768   :  { %v3600_v18 = vpop.permute.xlu1 %3599 }
0x2769   :  { %v3602_v39 = vmul.f32 %v6829_v51, %v3600_v18 }
0x276b   :  { %3608 = vrot.lane.b32.xlu0 %v3602_v39, %s7156_s25 }
0x27dd   :  { %v3609_v61 = vpop.permute.xlu0 %3608 }
0x27de   :  { %6008 = vmatmul.mubr.msk.f32.vlgmr.msra.gmra.mrb[46].mxu0 %vm400_vm13, %v3609_v61 }
0x27df   :  { %6507 = vmatpush3.bf16.msra.mxu0 %v7881_v59  ;;  %6018 = vmatprep.mubr.msk.f32.mxu0 %vm7154_vm3, %v7789_v3 }
0x27e0   :  { %6508 = vmatprep.subr.bf16.mxu0 %v7152_v2 }
0x27e3   :  { %6510 = vmatpush3.bf16.msra.mxu0 %v7895_v63 }
0x27e4   :  { %6535 = vmatprep.subr.bf16.mxu0 %v7152_v2 }
0x27e6   :  { %6019 = vmatmul.mubr.msk.f32.vlgmr.msra.gmra.mrb[48].mxu0 %vm400_vm13, %v3498_v44 }
0x27e7   :  { %6537 = vmatpush3.bf16.msra.mxu0 %v7915_v7  ;;  %6064 = vmatprep.mubr.msk.f32.mxu0 %vm7154_vm3, %v7789_v3 }
0x27e8   :  { %6538 = vmatprep.subr.bf16.mxu0 %v7152_v2 }
0x27eb   :  { %6540 = vmatpush3.bf16.msra.mxu0 %v7931_v26 }
0x27ec   :  { %6541 = vmatprep.subr.bf16.mxu0 %v7152_v2 }
0x27ee   :  { %6065 = vmatmul.mubr.msk.f32.vlgmr.msra.gmra.mrb[50].mxu0 %vm400_vm13, %v3609_v61 }
0x27ef   :  { %6543 = vmatpush3.bf16.msra.mxu0 %v8016_v60  ;;  %6075 = vmatprep.mubr.msk.f32.mxu0 %vm7154_vm3, %v7789_v3 }
0x27f0   :  { %6544 = vmatprep.subr.bf16.mxu0 %v7152_v2 }
0x27f3   :  { %6546 = vmatpush3.bf16.msra.mxu0 %v8019_v62 }
0x27f4   :  { %6547 = vmatprep.subr.bf16.mxu0 %v7152_v2 }
0x28b1   :  { %v3678_v36 = vpop.f32.mrb[46].mxu0 }
0x28b2   :  { %v3679_v11 = vadd.f32 %v3678_v36, %v8073_v13  ;;  %v6009_v0 = vpop.f32.mrb[47].mxu0 }
0x28b4   :  { %5194 = vst [vmem:[%s8394_s18 + $0x10] sm:$0xff] %v3679_v11  ;;  %v3684_v4 = vsel %vm2758_vm14, %v3679_v11, -3e+38 }
0x28b5   :  { %3685 = vmax.xlane.f32.xlu1 %v3684_v4 }
0x28b9   :  { %v3793_v5 = vpop.f32.mrb[48].mxu0 }
0x28ba   :  { %v6020_v3 = vpop.f32.mrb[49].mxu0 }
0x28c1   :  { %v3966_v12 = vpop.f32.mrb[50].mxu0 }
0x28c2   :  { %v6066_v10 = vpop.f32.mrb[51].mxu0 }
0x2942   :  { %v3686_v20 = vpop.xlane.xlu1 %3685 }
0x2943   :  { %vm3687_vm4 = vcmp.eq.f32.partialorder %v3684_v4, %v3686_v20 }
0x2944   :  { %vm3688_vm5 = vmand %vm3687_vm4, %vm2758_vm14 }
0x2945   :  { %v3689_v17 = vsel %vm3688_vm5, %v7480_v15, 128 }
0x2946   :  { %v3691_v1 = vshra.s32 %v3689_v17, 16  ;;  %v3690_v27 = vand.u32 65535, %v3689_v17 }
0x2948   :  { %v3693_v6 = vcvt.s32.f32 %v3691_v1  ;;  %v3692_v14 = vcvt.s32.f32 %v3690_v27 }
0x294a   :  { %3694 = vmin.xlane.f32.xlu0 %v3693_v6 }
0x29d7   :  { %v3695_v28 = vpop.xlane.xlu0 %3694 }
0x29d8   :  { %vm3696_vm6 = vcmp.eq.f32.partialorder %v3693_v6, %v3695_v28  ;;  %v3701_v31 = vcvt.f32.s32 %v3695_v28 }
0x29d9   :  { %v3697_v30 = vsel %vm3696_vm6, %v3692_v14, inf }
0x29da   :  { %3698 = vmin.xlane.f32.xlu0 %v3697_v30  ;;  %v3702_v33 = vshll.u32 %v3701_v31, 16 }
0x2a67   :  { %v3699_v24 = vpop.xlane.xlu0 %3698 }
0x2a68   :  { %v3700_v34 = vcvt.f32.s32 %v3699_v24 }
0x2a6a   :  { %v3703_v22 = vadd.s32 %v3702_v33, %v3700_v34  ;;  %v4181_v34 = vld [vmem:[%s8384_s8] sm:$0xff] }
0x2a6c   :  { %vm3704_vm7 = vcmp.eq.s32.totalorder %v7480_v15, %v3703_v22  ;;  %v4182_v22 = vld [vmem:[%s8384_s8 + $0x8] sm:$0xff] }
0x2a6d   :  { %6054 = vmatmul.mubr.msk.f32.vlgmr.msra.gmra.mrb[32].mxu1 %vm3704_vm7, %v7157_v23 }
0x2a6e   :  { %6132 = vmatprep.mubr.msk.f32.mxu1 %vm7154_vm3, %v8168_v38 }
0x2b40   :  { %v3863_v41 = vpop.f32.mrb[32].mxu1 }
0x2b41   :  { %v3864_v21 = vadd.f32 %v3863_v41, %v3793_v5  ;;  %v6055_v42 = vpop.f32.mrb[33].mxu1  ;;  %v4183_v41 = vld [vmem:[%s8384_s8 + $0x10] sm:$0xff] }
0x2b42   :  { %v4184_v42 = vld [vmem:[%s8384_s8 + $0x18] sm:$0xff] }
0x2b43   :  { %v3867_v44 = vadd.f32 %v3864_v21, %v8007_v46  ;;  %v6560_v21 = vpack.c.bf16 %v4182_v22, %v4181_v34  ;;  %v4674_v34 = vld [vmem:[#allocation9 + $0x18] sm:$0xff] }
0x2b45   :  { %6832 = vtanh.f32 %v3867_v44  ;;  %v5198_v45 = vmul.f32 -1.442695, %v3867_v44  ;;  %6561 = vmatpush3.bf16.msra.mxu1 %v6560_v21  ;;  %v6563_v44 = vpack.c.bf16 %v4184_v42, %v4183_v41  ;;  %v4844_v41 = vld [vmem:[#allocation13] sm:$0xff] }
0x2b46   :  { %6562 = vmatprep.subr.bf16.mxu1 %v7152_v2 }
0x2b47   :  { %6834 = vpow2.f32 %v5198_v45  ;;  %v4186_v45 = vld [vmem:[%s8384_s8 + $0x28] sm:$0xff] }
0x2b49   :  { %6564 = vmatpush3.bf16.msra.mxu1 %v6563_v44 }
0x2b4a   :  { %6565 = vmatprep.subr.bf16.mxu1 %v7152_v2 }
0x2b4f   :  { %v6833_v55 = vpop.eup %6832 }
0x2b50   :  { %3877 = vrot.lane.b32.xlu1 %v6833_v55, %s7155_s10  ;;  %v4185_v55 = vld [vmem:[%s8384_s8 + $0x20] sm:$0xff] }
0x2b51   :  { %v6835_v47 = vpop.eup %6834 }
0x2b52   :  { %v3871_v9 = vadd.f32 1.0, %v6835_v47  ;;  %v6566_v47 = vpack.c.bf16 %v4186_v45, %v4185_v55  ;;  %v4847_v55 = vld [vmem:[#allocation13 + $0x18] sm:$0xff] }
0x2b54   :  { %6836 = vrcp.f32 %v3871_v9  ;;  %6567 = vmatpush3.bf16.msra.mxu1 %v6566_v47 }
0x2b55   :  { %6568 = vmatprep.subr.bf16.mxu1 %v7152_v2 }
0x2b58   :  { %6570 = vmatpush3.bf16.msra.mxu1 %v7929_v25 }
0x2b59   :  { %6571 = vmatprep.subr.bf16.mxu1 %v7152_v2 }
0x2b5c   :  { %6573 = vmatpush3.bf16.msra.mxu1 %v7945_v29 }
0x2b5d   :  { %6574 = vmatprep.subr.bf16.mxu1 %v7152_v2 }
0x2b5e   :  { %v6837_v49 = vpop.eup %6836 }
0x2b5f   :  { %v3875_v50 = vmul.f32 %v6837_v49, %v8111_v40 }
0x2b60   :  { %6576 = vmatpush3.bf16.msra.mxu1 %v7957_v19 }
0x2b61   :  { %6577 = vmatprep.subr.bf16.mxu1 %v7152_v2 }
0x2b64   :  { %6579 = vmatpush3.bf16.msra.mxu1 %v7969_v32 }
0x2b65   :  { %6580 = vmatprep.subr.bf16.mxu1 %v7152_v2 }
0x2b68   :  { %6582 = vmatpush3.bf16.msra.mxu1 %v7979_v35 }
0x2b69   :  { %6607 = vmatprep.subr.bf16.mxu1 %v7152_v2 }
0x2bc2   :  { %v3878_v53 = vpop.permute.xlu1 %3877 }
0x2bc3   :  { %v3880_v48 = vmul.f32 %v6837_v49, %v3878_v53 }
0x2bc5   :  { %3882 = vrot.lane.b32.xlu0 %v3880_v48, %s7155_s10 }
0x2c37   :  { %v3883_v51 = vpop.permute.xlu0 %3882 }
0x2c38   :  { %v8176_v52 = vadd.f32 %v3883_v51, %v3875_v50 }
0x2c3a   :  { %6838 = vtanh.f32 %v8176_v52 }
0x2c44   :  { %v6839_v37 = vpop.eup %6838 }
0x2c45   :  { %3888 = vrot.lane.b32.xlu1 %v6839_v37, %s7155_s10 }
0x2cb7   :  { %v3889_v57 = vpop.permute.xlu1 %3888 }
0x2cb8   :  { %v3891_v54 = vmul.f32 %v6837_v49, %v3889_v57 }
0x2cba   :  { %3971 = vrot.lane.b32.xlu1 %v3891_v54, %s7156_s25 }
0x2d2c   :  { %v3972_v58 = vpop.permute.xlu1 %3971 }
0x2d2d   :  { %6076 = vmatmul.mubr.msk.f32.vlgmr.msra.gmra.mrb[52].mxu0 %vm400_vm13, %v3972_v58 }
0x2d2e   :  { %6549 = vmatpush3.bf16.msra.mxu0 %v8038_v16  ;;  %6086 = vmatprep.mubr.msk.f32.mxu0 %vm7154_vm3, %v8168_v38 }
0x2d2f   :  { %6550 = vmatprep.subr.bf16.mxu0 %v7152_v2 }
0x2d32   :  { %6552 = vmatpush3.bf16.msra.mxu0 %v8041_v43 }
0x2d33   :  { %6553 = vmatprep.subr.bf16.mxu0 %v7152_v2 }
0x2e00   :  { %v4041_v40 = vpop.f32.mrb[52].mxu0 }
0x2e01   :  { %v4042_v18 = vadd.f32 %v4041_v40, %v3966_v12  ;;  %v6077_v39 = vpop.f32.mrb[53].mxu0 }
0x2e03   :  { %v4052_v61 = vadd.f32 %v8029_v8, %v4042_v18 }
0x2e05   :  { %6840 = vtanh.f32 %v4052_v61  ;;  %v5202_v11 = vmul.f32 -1.442695, %v4052_v61 }
0x2e07   :  { %6842 = vpow2.f32 %v5202_v11 }
0x2e0f   :  { %v6841_v36 = vpop.eup %6840 }
0x2e10   :  { %4062 = vrot.lane.b32.xlu0 %v6841_v36, %s7155_s10 }
0x2e11   :  { %v6843_v0 = vpop.eup %6842 }
0x2e12   :  { %v4056_v4 = vadd.f32 1.0, %v6843_v0 }
0x2e14   :  { %6844 = vrcp.f32 %v4056_v4 }
0x2e1e   :  { %v6845_v5 = vpop.eup %6844 }
0x2e1f   :  { %v4060_v20 = vmul.f32 %v6845_v5, %v8128_v56 }
0x2e82   :  { %v4063_v3 = vpop.permute.xlu0 %4062 }
0x2e83   :  { %v4065_v10 = vmul.f32 %v6845_v5, %v4063_v3 }
0x2e85   :  { %4067 = vrot.lane.b32.xlu1 %v4065_v10, %s7155_s10 }
0x2ef7   :  { %v4068_v12 = vpop.permute.xlu1 %4067 }
0x2ef8   :  { %v8192_v17 = vadd.f32 %v4068_v12, %v4060_v20 }
0x2efa   :  { %6846 = vtanh.f32 %v8192_v17 }
0x2f04   :  { %v6847_v1 = vpop.eup %6846 }
0x2f05   :  { %4073 = vrot.lane.b32.xlu0 %v6847_v1, %s7155_s10 }
0x2f77   :  { %v4074_v6 = vpop.permute.xlu0 %4073 }
0x2f78   :  { %v4076_v27 = vmul.f32 %v6845_v5, %v4074_v6 }
0x2f7a   :  { %4082 = vrot.lane.b32.xlu1 %v4076_v27, %s7156_s25 }
0x2fec   :  { %v4083_v28 = vpop.permute.xlu1 %4082 }
0x2fed   :  { %6087 = vmatmul.mubr.msk.f32.vlgmr.msra.gmra.mrb[54].mxu0 %vm400_vm13, %v4083_v28 }
0x2fee   :  { %6555 = vmatpush3.bf16.msra.mxu0 %v7881_v59  ;;  %6097 = vmatprep.mubr.msk.f32.mxu0 %vm7154_vm3, %v8168_v38 }
0x2fef   :  { %6556 = vmatprep.subr.bf16.mxu0 %v7152_v2 }
0x2ff2   :  { %6558 = vmatpush3.bf16.msra.mxu0 %v7895_v63 }
0x2ff3   :  { %6583 = vmatprep.subr.bf16.mxu0 %v7152_v2 }
0x2ff5   :  { %6098 = vmatmul.mubr.msk.f32.vlgmr.msra.gmra.mrb[56].mxu0 %vm400_vm13, %v3972_v58 }
0x2ff6   :  { %6585 = vmatpush3.bf16.msra.mxu0 %v7915_v7  ;;  %6143 = vmatprep.mubr.msk.f32.mxu0 %vm7154_vm3, %v8168_v38 }
0x2ff7   :  { %6586 = vmatprep.subr.bf16.mxu0 %v7152_v2 }
0x2ffa   :  { %6588 = vmatpush3.bf16.msra.mxu0 %v7931_v26 }
0x2ffb   :  { %6589 = vmatprep.subr.bf16.mxu0 %v7152_v2 }
0x2ffd   :  { %6144 = vmatmul.mubr.msk.f32.vlgmr.msra.gmra.mrb[58].mxu0 %vm400_vm13, %v4083_v28 }
0x2ffe   :  { %6591 = vmatpush3.bf16.msra.mxu0 %v8016_v60  ;;  %6154 = vmatprep.mubr.msk.f32.mxu0 %vm7154_vm3, %v8168_v38 }
0x2fff   :  { %6592 = vmatprep.subr.bf16.mxu0 %v7152_v2 }
0x3002   :  { %6594 = vmatpush3.bf16.msra.mxu0 %v8019_v62 }
0x3003   :  { %6595 = vmatprep.subr.bf16.mxu0 %v7152_v2 }
0x30c0   :  { %v4152_v59 = vpop.f32.mrb[54].mxu0 }
0x30c1   :  { %v4153_v63 = vadd.f32 %v4152_v59, %v8073_v13  ;;  %v6088_v7 = vpop.f32.mrb[55].mxu0 }
0x30c3   :  { %5204 = vst [vmem:[%s8394_s18 + $0x18] sm:$0xff] %v4153_v63  ;;  %v4158_v26 = vsel %vm2758_vm14, %v4153_v63, -3e+38 }
0x30c4   :  { %4159 = vmax.xlane.f32.xlu0 %v4158_v26 }
0x30c8   :  { %v4267_v60 = vpop.f32.mrb[56].mxu0 }
0x30c9   :  { %v6099_v56 = vpop.f32.mrb[57].mxu0 }
0x30d0   :  { %v8224_v14 = vpop.f32.mrb[58].mxu0 }
0x30d1   :  { %v6145_v30 = vpop.f32.mrb[59].mxu0 }
0x3151   :  { %v4160_v62 = vpop.xlane.xlu0 %4159 }
0x3152   :  { %vm4161_vm8 = vcmp.eq.f32.partialorder %v4158_v26, %v4160_v62  ;;  %v4671_v62 = vld [vmem:[#allocation9] sm:$0xff] }
0x3153   :  { %vm4162_vm9 = vmand %vm4161_vm8, %vm2758_vm14 }
0x3154   :  { %v4163_v31 = vsel %vm4162_vm9, %v7480_v15, 128 }
0x3155   :  { %v4165_v24 = vshra.s32 %v4163_v31, 16  ;;  %v4164_v9 = vand.u32 65535, %v4163_v31  ;;  %v4672_v31 = vld [vmem:[#allocation9 + $0x8] sm:$0xff] }
0x3157   :  { %v4167_v33 = vcvt.s32.f32 %v4165_v24  ;;  %v4166_v49 = vcvt.s32.f32 %v4164_v9  ;;  %v6602_v24 = vpack.c.bf16 %v4672_v31, %v4671_v62 }
0x3159   :  { %4168 = vmin.xlane.f32.xlu1 %v4167_v33 }
0x31e6   :  { %v4169_v25 = vpop.xlane.xlu1 %4168 }
0x31e7   :  { %vm4170_vm10 = vcmp.eq.f32.partialorder %v4167_v33, %v4169_v25  ;;  %v4175_v29 = vcvt.f32.s32 %v4169_v25  ;;  %v4673_v33 = vld [vmem:[#allocation9 + $0x10] sm:$0xff] }
0x31e8   :  { %v4171_v53 = vsel %vm4170_vm10, %v4166_v49, inf }
0x31e9   :  { %4172 = vmin.xlane.f32.xlu0 %v4171_v53  ;;  %v4176_v50 = vshll.u32 %v4175_v29, 16 }
0x3276   :  { %v4173_v48 = vpop.xlane.xlu0 %4172 }
0x3277   :  { %v4174_v19 = vcvt.f32.s32 %v4173_v48 }
0x3279   :  { %v4177_v51 = vadd.s32 %v4176_v50, %v4174_v19 }
0x327b   :  { %vm4178_vm11 = vcmp.eq.s32.totalorder %v7480_v15, %v4177_v51 }
0x327c   :  { %6133 = vmatmul.mubr.msk.f32.vlgmr.msra.gmra.mrb[34].mxu1 %vm4178_vm11, %v7157_v23 }
0x327d   :  { %6609 = vmatpush3.bf16.msra.mxu1 %v6560_v21  ;;  %6211 = vmatprep.mubr.msk.f32.mxu1 %vm7154_vm3, %v8168_v38  ;;  %v4845_v21 = vld [vmem:[#allocation13 + $0x8] sm:$0xff] }
0x327e   :  { %6610 = vmatprep.subr.bf16.mxu1 %v7152_v2  ;;  %v6632_v42 = vpack.c.bf16 %v4845_v21, %v4844_v41  ;;  %v4843_v21 = vld [vmem:[#allocation12 + $0x18] sm:$0xff] }
0x3281   :  { %6612 = vmatpush3.bf16.msra.mxu1 %v6563_v44  ;;  %v4846_v44 = vld [vmem:[#allocation13 + $0x10] sm:$0xff] }
0x3282   :  { %6613 = vmatprep.subr.bf16.mxu1 %v7152_v2  ;;  %v6635_v45 = vpack.c.bf16 %v4847_v55, %v4846_v44 }
0x3285   :  { %6615 = vmatpush3.bf16.msra.mxu1 %v6566_v47 }
0x3286   :  { %6616 = vmatprep.subr.bf16.mxu1 %v7152_v2 }
0x334f   :  { %v4337_v32 = vpop.f32.mrb[34].mxu1 }
0x3350   :  { %v4338_v35 = vadd.f32 %v4337_v32, %v4267_v60  ;;  %v6134_v37 = vpop.f32.mrb[35].mxu1 }
0x3351   :  { %v4661_v37 = vld [vmem:[%s8384_s8 + $0x30] sm:$0xff] }
0x3352   :  { %v4341_v57 = vadd.f32 %v4338_v35, %v8007_v46 }
0x3354   :  { %6848 = vtanh.f32 %v4341_v57  ;;  %v5208_v58 = vmul.f32 -1.442695, %v4341_v57  ;;  %v4662_v57 = vld [vmem:[%s8384_s8 + $0x38] sm:$0xff] }
0x3356   :  { %6850 = vpow2.f32 %v5208_v58  ;;  %v6617_v58 = vpack.c.bf16 %v4662_v57, %v4661_v37 }
0x3358   :  { %6618 = vmatpush3.bf16.msra.mxu1 %v6617_v58  ;;  %v5026_v58 = vld [vmem:[#allocation16 + $0x8] sm:$0xff] }
0x3359   :  { %6619 = vmatprep.subr.bf16.mxu1 %v7152_v2 }
0x335e   :  { %v6849_v54 = vpop.eup %6848 }
0x335f   :  { %4351 = vrot.lane.b32.xlu0 %v6849_v54, %s7155_s10  ;;  %v4663_v54 = vld [vmem:[%s8384_s8 + $0x40] sm:$0xff] }
0x3360   :  { %v6851_v40 = vpop.eup %6850 }
0x3361   :  { %v4345_v18 = vadd.f32 1.0, %v6851_v40  ;;  %v4664_v40 = vld [vmem:[%s8384_s8 + $0x48] sm:$0xff] }
0x3363   :  { %6852 = vrcp.f32 %v4345_v18  ;;  %v6620_v18 = vpack.c.bf16 %v4664_v40, %v4663_v54  ;;  %v5025_v54 = vld [vmem:[#allocation16] sm:$0xff]  ;;  %v5027_v40 = vld [vmem:[#allocation16 + $0x10] sm:$0xff] }
0x3365   :  { %6621 = vmatpush3.bf16.msra.mxu1 %v6620_v18  ;;  %v6644_v18 = vpack.c.bf16 %v5026_v58, %v5025_v54 }
0x3366   :  { %6622 = vmatprep.subr.bf16.mxu1 %v7152_v2 }
0x336d   :  { %v6853_v39 = vpop.eup %6852 }
0x336e   :  { %v4349_v11 = vmul.f32 %v6853_v39, %v8176_v52 }
0x33d1   :  { %v4352_v61 = vpop.permute.xlu0 %4351 }
0x33d2   :  { %v4354_v36 = vmul.f32 %v6853_v39, %v4352_v61  ;;  %v4666_v61 = vld [vmem:[%s8384_s8 + $0x58] sm:$0xff] }
0x33d4   :  { %4356 = vrot.lane.b32.xlu1 %v4354_v36, %s7155_s10 }
0x3446   :  { %v4357_v0 = vpop.permute.xlu1 %4356 }
0x3447   :  { %v8271_v4 = vadd.f32 %v4357_v0, %v4349_v11  ;;  %v4667_v11 = vld [vmem:[%s8384_s8 + $0x60] sm:$0xff]  ;;  %v4668_v0 = vld [vmem:[%s8384_s8 + $0x68] sm:$0xff] }
0x3449   :  { %6854 = vtanh.f32 %v8271_v4 }
0x3453   :  { %v6855_v5 = vpop.eup %6854 }
0x3454   :  { %4362 = vrot.lane.b32.xlu1 %v6855_v5, %s7155_s10  ;;  %v6626_v5 = vpack.c.bf16 %v4668_v0, %v4667_v11 }
0x34c6   :  { %v4363_v3 = vpop.permute.xlu1 %4362 }
0x34c7   :  { %v4365_v10 = vmul.f32 %v6853_v39, %v4363_v3  ;;  %v4665_v39 = vld [vmem:[%s8384_s8 + $0x50] sm:$0xff] }
0x34c8   :  { %v6623_v36 = vpack.c.bf16 %v4666_v61, %v4665_v39  ;;  %v5028_v39 = vld [vmem:[#allocation16 + $0x18] sm:$0xff] }
0x34c9   :  { %4445 = vrot.lane.b32.xlu0 %v4365_v10, %s7156_s25  ;;  %v6647_v61 = vpack.c.bf16 %v5028_v39, %v5027_v40 }
0x34ca   :  { %6624 = vmatpush3.bf16.msra.mxu1 %v6623_v36 }
0x34cb   :  { %6625 = vmatprep.subr.bf16.mxu1 %v7152_v2 }
0x34ce   :  { %6627 = vmatpush3.bf16.msra.mxu1 %v6626_v5 }
0x34cf   :  { %6628 = vmatprep.subr.bf16.mxu1 %v7152_v2 }
0x353b   :  { %v4446_v20 = vpop.permute.xlu0 %4445 }
0x353c   :  { %6155 = vmatmul.mubr.msk.f32.vlgmr.msra.gmra.mrb[60].mxu0 %vm400_vm13, %v4446_v20 }
0x353d   :  { %6597 = vmatpush3.bf16.msra.mxu0 %v8038_v16  ;;  %6165 = vmatprep.mubr.msk.f32.mxu0 %vm7154_vm3, %v8168_v38 }
0x353e   :  { %6598 = vmatprep.subr.bf16.mxu0 %v7152_v2 }
0x3541   :  { %6600 = vmatpush3.bf16.msra.mxu0 %v8041_v43 }
0x3542   :  { %6601 = vmatprep.subr.bf16.mxu0 %v7152_v2 }
0x360f   :  { %v4515_v52 = vpop.f32.mrb[60].mxu0 }
0x3610   :  { %v4516_v12 = vadd.f32 %v4515_v52, %v8224_v14  ;;  %v6156_v1 = vpop.f32.mrb[61].mxu0 }
0x3611   :  { %v4670_v1 = vld [vmem:[%s8384_s8 + $0x78] sm:$0xff] }
0x3612   :  { %v4526_v6 = vadd.f32 %v8029_v8, %v4516_v12  ;;  %v4669_v12 = vld [vmem:[%s8384_s8 + $0x70] sm:$0xff] }
0x3614   :  { %6856 = vtanh.f32 %v4526_v6  ;;  %v5212_v16 = vmul.f32 -1.442695, %v4526_v6  ;;  %v6629_v6 = vpack.c.bf16 %v4670_v1, %v4669_v12 }
0x3616   :  { %6858 = vpow2.f32 %v5212_v16  ;;  %6630 = vmatpush3.bf16.msra.mxu1 %v6629_v6 }
0x361e   :  { %v6857_v27 = vpop.eup %6856 }
0x361f   :  { %4536 = vrot.lane.b32.xlu1 %v6857_v27, %s7155_s10 }
0x3620   :  { %v6859_v28 = vpop.eup %6858 }
0x3621   :  { %v4530_v59 = vadd.f32 1.0, %v6859_v28 }
0x3623   :  { %6860 = vrcp.f32 %v4530_v59 }
0x362d   :  { %v6861_v63 = vpop.eup %6860 }
0x362e   :  { %v4534_v26 = vmul.f32 %v6861_v63, %v8192_v17  ;;  %v6605_v17 = vpack.c.bf16 %v4674_v34, %v4673_v33 }
0x3691   :  { %v4537_v7 = vpop.permute.xlu1 %4536 }
0x3692   :  { %v4539_v43 = vmul.f32 %v6861_v63, %v4537_v7 }
0x3694   :  { %4541 = vrot.lane.b32.xlu0 %v4539_v43, %s7155_s10 }
0x3706   :  { %v4542_v60 = vpop.permute.xlu0 %4541 }
0x3707   :  { %v8288_v56 = vadd.f32 %v4542_v60, %v4534_v26 }
0x3709   :  { %6862 = vtanh.f32 %v8288_v56 }
0x3713   :  { %v6863_v8 = vpop.eup %6862 }
0x3714   :  { %4547 = vrot.lane.b32.xlu1 %v6863_v8, %s7155_s10 }
0x3786   :  { %v4548_v14 = vpop.permute.xlu1 %4547 }
0x3787   :  { %v4550_v30 = vmul.f32 %v6861_v63, %v4548_v14 }
0x3789   :  { %4556 = vrot.lane.b32.xlu0 %v4550_v30, %s7156_s25 }
0x37fb   :  { %v4557_v22 = vpop.permute.xlu0 %4556 }
0x37fc   :  { %6166 = vmatmul.mubr.msk.f32.vlgmr.msra.gmra.mrb[62].mxu0 %vm400_vm13, %v4557_v22 }
0x37fd   :  { %6603 = vmatpush3.bf16.msra.mxu0 %v6602_v24  ;;  %6176 = vmatprep.mubr.msk.f32.mxu0 %vm7154_vm3, %v8168_v38 }
0x37fe   :  { %6604 = vmatprep.subr.bf16.mxu0 %v7152_v2 }
0x3801   :  { %6606 = vmatpush3.bf16.msra.mxu0 %v6605_v17  ;;  %v4842_v17 = vld [vmem:[#allocation12 + $0x10] sm:$0xff] }
0x3802   :  { %6631 = vmatprep.subr.bf16.mxu0 %v7152_v2 }
0x3804   :  { %6177 = vmatmul.mubr.msk.f32.vlgmr.msra.gmra.mrb[64].mxu0 %vm400_vm13, %v4446_v20 }
0x3805   :  { %6633 = vmatpush3.bf16.msra.mxu0 %v6632_v42  ;;  %6222 = vmatprep.mubr.msk.f32.mxu0 %vm7154_vm3, %v8168_v38  ;;  %v6641_v42 = vpack.c.bf16 %v4843_v21, %v4842_v17 }
0x3806   :  { %6634 = vmatprep.subr.bf16.mxu0 %v7152_v2 }
0x3809   :  { %6636 = vmatpush3.bf16.msra.mxu0 %v6635_v45 }
0x380a   :  { %6637 = vmatprep.subr.bf16.mxu0 %v7152_v2 }
0x380c   :  { %6223 = vmatmul.mubr.msk.f32.vlgmr.msra.gmra.mrb[66].mxu0 %vm400_vm13, %v4557_v22  ;;  %v4841_v22 = vld [vmem:[#allocation12 + $0x8] sm:$0xff] }
0x380d   :  { %6233 = vmatprep.mubr.msk.f32.mxu0 %vm7154_vm3, %v8168_v38 }
0x38cf   :  { %v4626_v47 = vpop.f32.mrb[62].mxu0 }
0x38d0   :  { %v4627_v9 = vadd.f32 %v4626_v47, %v8073_v13  ;;  %v6167_v25 = vpop.f32.mrb[63].mxu0 }
0x38d2   :  { %5214 = vst [vmem:[%s8394_s18 + $0x20] sm:$0xff] %v4627_v9  ;;  %v4632_v49 = vsel %vm2758_vm14, %v4627_v9, -3e+38  ;;  %v5221_v9 = vld [vmem:[#allocation15] ss:$0 sm:$0xff] }
0x38d3   :  { %4633 = vmax.xlane.f32.xlu1 %v4632_v49 }
0x38d7   :  { %v4741_v53 = vpop.f32.mrb[64].mxu0 }
0x38d8   :  { %v6178_v29 = vpop.f32.mrb[65].mxu0 }
0x38df   :  { %v8312_v48 = vpop.f32.mrb[66].mxu0 }
0x38e0   :  { %v6224_v50 = vpop.f32.mrb[67].mxu0 }
0x3960   :  { %v4634_v19 = vpop.xlane.xlu1 %4633 }
0x3961   :  { %vm4635_vm12 = vcmp.eq.f32.partialorder %v4632_v49, %v4634_v19 }
0x3962   :  { %vm4636_vm15 = vmand %vm4635_vm12, %vm2758_vm14 }
0x3963   :  { %v4637_v51 = vsel %vm4636_vm15, %v7480_v15, 128 }
0x3964   :  { %v4639_v32 = vshra.s32 %v4637_v51, 16  ;;  %v4638_v3 = vand.u32 65535, %v4637_v51 }
0x3966   :  { %v4641_v35 = vcvt.s32.f32 %v4639_v32  ;;  %v4640_v20 = vcvt.s32.f32 %v4638_v3 }
0x3968   :  { %4642 = vmin.xlane.f32.xlu0 %v4641_v35 }
0x39f5   :  { %v4643_v10 = vpop.xlane.xlu0 %4642 }
0x39f6   :  { %vm4644_vm14 = vcmp.eq.f32.partialorder %v4641_v35, %v4643_v10  ;;  %v4649_v27 = vcvt.f32.s32 %v4643_v10 }
0x39f7   :  { %v4645_v52 = vsel %vm4644_vm14, %v4640_v20, inf }
0x39f8   :  { %4646 = vmin.xlane.f32.xlu0 %v4645_v52  ;;  %v4650_v28 = vshll.u32 %v4649_v27, 16 }
0x3a85   :  { %v4647_v16 = vpop.xlane.xlu0 %4646 }
0x3a86   :  { %v4648_v59 = vcvt.f32.s32 %v4647_v16 }
0x3a88   :  { %v4651_v63 = vadd.s32 %v4650_v28, %v4648_v59 }
0x3a8a   :  { %vm4652_vm0 = vcmp.eq.s32.totalorder %v7480_v15, %v4651_v63 }
0x3a8b   :  { %6212 = vmatmul.mubr.msk.f32.vlgmr.msra.gmra.mrb[36].mxu1 %vm4652_vm0, %v7157_v23 }
0x3b5e   :  { %v4811_v7 = vpop.f32.mrb[36].mxu1 }
0x3b5f   :  { %v4812_v43 = vadd.f32 %v4811_v7, %v4741_v53  ;;  %v6213_v26 = vpop.f32.mrb[37].mxu1 }
0x3b61   :  { %v4815_v60 = vadd.f32 %v4812_v43, %v8007_v46  ;;  %v4840_v46 = vld [vmem:[#allocation12] sm:$0xff] }
0x3b62   :  { %v6638_v41 = vpack.c.bf16 %v4841_v22, %v4840_v46 }
0x3b63   :  { %6864 = vtanh.f32 %v4815_v60  ;;  %v5218_v14 = vmul.f32 -1.442695, %v4815_v60 }
0x3b64   :  { %6639 = vmatpush3.bf16.msra.mxu0 %v6638_v41 }
0x3b65   :  { %6866 = vpow2.f32 %v5218_v14  ;;  %6640 = vmatprep.subr.bf16.mxu0 %v7152_v2 }
0x3b68   :  { %6642 = vmatpush3.bf16.msra.mxu0 %v6641_v42 }
0x3b69   :  { %6643 = vmatprep.subr.bf16.mxu0 %v7152_v2 }
0x3b6d   :  { %v6865_v8 = vpop.eup %6864 }
0x3b6e   :  { %4825 = vrot.lane.b32.xlu1 %v6865_v8, %s7155_s10 }
0x3b6f   :  { %v6867_v30 = vpop.eup %6866 }
0x3b70   :  { %v4819_v62 = vadd.f32 1.0, %v6867_v30 }
0x3b72   :  { %6868 = vrcp.f32 %v4819_v62 }
0x3b7c   :  { %v6869_v31 = vpop.eup %6868 }
0x3b7d   :  { %v4823_v15 = vmul.f32 %v6869_v31, %v8271_v4 }
0x3be0   :  { %v4826_v24 = vpop.permute.xlu1 %4825 }
0x3be1   :  { %v4828_v33 = vmul.f32 %v6869_v31, %v4826_v24 }
0x3be3   :  { %4830 = vrot.lane.b32.xlu0 %v4828_v33, %s7155_s10 }
0x3c55   :  { %v4831_v23 = vpop.permute.xlu0 %4830 }
0x3c56   :  { %v4833_v34 = vadd.f32 %v4831_v23, %v4823_v15 }
0x3c58   :  { %6870 = vtanh.f32 %v4833_v34 }
0x3c62   :  { %v6871_v44 = vpop.eup %6870 }
0x3c63   :  { %4836 = vrot.lane.b32.xlu1 %v6871_v44, %s7155_s10 }
0x3cd5   :  { %v4837_v55 = vpop.permute.xlu1 %4836 }
0x3cd6   :  { %v4839_v4 = vmul.f32 %v6869_v31, %v4837_v55 }
0x3cd8   :  { %4919 = vrot.lane.b32.xlu1 %v4839_v4, %s7156_s25 }
0x3d4a   :  { %v4920_v45 = vpop.permute.xlu1 %4919 }
0x3d4b   :  { %6234 = vmatmul.mubr.msk.f32.vlgmr.msra.gmra.mrb[68].mxu0 %vm400_vm13, %v4920_v45 }
0x3d4c   :  { %6244 = vmatprep.mubr.msk.f32.mxu0 %vm7154_vm3, %v8168_v38  ;;  %6645 = vmatpush3.bf16.msra.mxu0 %v6644_v18 }
0x3d4d   :  { %6646 = vmatprep.subr.bf16.mxu0 %v7152_v2 }
0x3d50   :  { %6648 = vmatpush3.bf16.msra.mxu0 %v6647_v61 }
0x3e1e   :  { %v4989_v47 = vpop.f32.mrb[68].mxu0 }
0x3e1f   :  { %v4990_v25 = vadd.f32 %v4989_v47, %v8312_v48  ;;  %v6235_v49 = vpop.f32.mrb[69].mxu0 }
0x3e21   :  { %v5000_v53 = vadd.f32 %v5221_v9, %v4990_v25 }
0x3e23   :  { %6872 = vtanh.f32 %v5000_v53  ;;  %v5222_v50 = vmul.f32 -1.442695, %v5000_v53 }
0x3e25   :  { %6874 = vpow2.f32 %v5222_v50 }
0x3e2d   :  { %v6873_v29 = vpop.eup %6872 }
0x3e2e   :  { %5010 = vrot.lane.b32.xlu0 %v6873_v29, %s7155_s10 }
0x3e2f   :  { %v6875_v19 = vpop.eup %6874 }
0x3e30   :  { %v5004_v51 = vadd.f32 1.0, %v6875_v19 }
0x3e32   :  { %6876 = vrcp.f32 %v5004_v51 }
0x3e3c   :  { %v6877_v32 = vpop.eup %6876 }
0x3e3d   :  { %v5008_v38 = vmul.f32 %v6877_v32, %v8288_v56 }
0x3ea0   :  { %v5011_v35 = vpop.permute.xlu0 %5010 }
0x3ea1   :  { %v5013_v37 = vmul.f32 %v6877_v32, %v5011_v35 }
0x3ea3   :  { %5015 = vrot.lane.b32.xlu1 %v5013_v37, %s7155_s10 }
0x3f15   :  { %v5016_v57 = vpop.permute.xlu1 %5015 }
0x3f16   :  { %v5018_v48 = vadd.f32 %v5016_v57, %v5008_v38 }
0x3f18   :  { %6878 = vtanh.f32 %v5018_v48 }
0x3f22   :  { %v6879_v36 = vpop.eup %6878 }
0x3f23   :  { %5021 = vrot.lane.b32.xlu0 %v6879_v36, %s7155_s10 }
0x3f95   :  { %v5022_v11 = vpop.permute.xlu0 %5021 }
0x3f96   :  { %v5024_v0 = vmul.f32 %v6877_v32, %v5022_v11 }
0x3f98   :  { %5030 = vrot.lane.b32.xlu1 %v5024_v0, %s7156_s25 }
0x400a   :  { %v5031_v56 = vpop.permute.xlu1 %5030 }
0x400b   :  { %6245 = vmatmul.mubr.msk.f32.vlgmr.msra.gmra.mrb[70].mxu0 %vm400_vm13, %v5031_v56 }
0x40de   :  { %v5100_v5 = vpop.f32.mrb[70].mxu0 }
0x40df   :  { %v5101_v3 = vadd.f32 %v5100_v5, %v8073_v13  ;;  %v6246_v10 = vpop.f32.mrb[71].mxu0 }
0x40e1   :  { %5224 = vst [vmem:[%s8394_s18 + $0x28] sm:$0xff] %v5101_v3 }
0x40e2   :  { %5110 = vsyncpa [#allocation3], 1 }
0x40e3   :  { %5111 = vsyncpa [#allocation5], 1 }
0x40e4   :  { %5112 = vsyncpa [#allocation8], 1 }
0x40e5   :  { %5113 = vsyncpa [#allocation11], 1 }
0x40e6   :  { %5114 = vsyncpa [#allocation14], 1 }
0x40e7   :  { %5115 = vsyncpa [#allocation17], 1 }

</bundles_post_ra>
